<compile_context>
chip_gen: v6e
topology: v6e:2x2x1
jax: 0.10.0
libtpu: 0.0.40
codegen_flags: <defaults>
</compile_context>

<pallas_src>
import numpy as np
import jax
import jax.numpy as jnp
from jax import lax
from jax.experimental import pallas as pl
from jax.experimental.pallas import tpu as pltpu

KERNELS = (1, 3, 5, 7)
NK = len(KERNELS)
KMAX = max(KERNELS)                  # 7
MAXPAD = KMAX // 2                   # 3: pad once for the largest kernel
BN_EPS = 1e-5


def _seb_kernel(x_ref, wbig_ref, scale_ref, bias_ref,
                fcw_ref, fcb_ref, fcsw_ref, fcsb_ref, sel_ref, out_ref):
    Bt, C, N = out_ref.shape                 # output block: (Bt, C, H*W)
    _, Hp, Wp, _ = x_ref.shape               # padded input block
    H, W = Hp - 2 * MAXPAD, Wp - 2 * MAXPAD
    C4 = NK * C
    mm_dtype = wbig_ref.dtype

    # ---- in-VMEM im2col: (Bt*H*W, 49*C), tap-major / channel-minor ---------
    # 49 shifted views of the padded block, concatenated along lanes.  Nothing
    # here ever touches HBM; the reshape is layout-trivial for W % 8 == 0.
    taps = [x_ref[:, dy:dy + H, dx:dx + W, :]
            for dy in range(KMAX) for dx in range(KMAX)]
    patch = jnp.concatenate(taps, axis=-1)                   # (Bt, H, W, 49C)
    patch = patch.reshape(Bt * H * W, KMAX * KMAX * C).astype(mm_dtype)

    # ---- all four branch convolutions as a single MXU matmul ---------------
    feats = jnp.dot(patch, wbig_ref[...],
                    preferred_element_type=jnp.float32)      # (Bt*N, 4C) f32
    # folded conv-bias + inference-mode BN, then ReLU (full 128-lane vregs)
    feats = jnp.maximum(feats * scale_ref[...] + bias_ref[...], 0.0)

    # ---- squeeze + excite (per image) ---------------------------------------
    # The 1/(H*W) of the average pool and the sum over branch groups are
    # folded into fcw_ref (tiled (4C, d) weights) in the wrapper.
    s = jnp.concatenate(
        [jnp.sum(feats[b * N:(b + 1) * N, :], axis=0, keepdims=True)
         for b in range(Bt)], axis=0)                        # (Bt, 4C)
    z = jnp.dot(s, fcw_ref[...],
                preferred_element_type=jnp.float32) + fcb_ref[...]      # (Bt, d)
    logits = (jnp.dot(z, fcsw_ref[...],
                      preferred_element_type=jnp.float32)
              + fcsb_ref[...])                               # (Bt, 4C)

    # ---- softmax over the NK branches, per channel, lane-natively ----------
    # Lanes are branch-major / channel-minor (index b*C + c); cyclic rolls by
    # C and 2C visit exactly the NK branch-mates of each channel.
    def group_reduce(v, op):
        y = op(v, pltpu.roll(v, C, axis=1))
        return op(y, pltpu.roll(y, 2 * C, axis=1))

    m = group_reduce(logits, jnp.maximum)
    e = jnp.exp(logits - m)
    # Exact divide keeps the 1e-3 numerics check honest;
    # pl.reciprocal(..., approx=True) is a free EUP alternative if tolerable.
    attn = e / group_reduce(e, jnp.add)                      # (Bt, 4C)

    # ---- select: attention-weighted branch sum, emitted transposed ---------
    # sel is NK horizontally-tiled (C, C) identities; folding attn into it
    # lets ONE small MXU NT-matmul do the weighted branch sum AND the
    # (N, C) -> (C, N) transpose, so the stored block lands directly in NCHW
    # order (no replicated slab, no wrapper slice/transpose).
    for b in range(Bt):
        a_sel = sel_ref[...] * attn[b:b + 1, :]              # (C, 4C)
        v_t = lax.dot_general(
            a_sel, feats[b * N:(b + 1) * N, :],
            dimension_numbers=(((1,), (1,)), ((), ())),
            preferred_element_type=jnp.float32)              # (C, N)
        out_ref[b] = v_t.astype(out_ref.dtype)


def _pick_batch_tile(B, N):
    """Fold enough images into the matmul M dim to feed the MXU (~>=256 rows),
    but keep >=2 grid steps when possible so both v7x TensorCores get work."""
    divisors = [t for t in range(1, B + 1) if B % t == 0]
    target = max(1, -(-256 // N))                     # ceil(256 / N)
    cands = [t for t in divisors if t <= target] or [1]
    bt = max(cands)
    if B >= 2:
        two_step = [t for t in cands if B // t >= 2]
        if two_step:
            bt = max(two_step)
    return bt


def local_stage1_pallas(x_nchw, params, *, matmul_dtype=jnp.float32,
                        batch_tile=None):
    B, C, H, W = x_nchw.shape
    d = params['fc_w'].shape[1]
    N = H * W
    C4 = NK * C
    K49 = KMAX * KMAX * C
    Hp, Wp = H + 2 * MAXPAD, W + 2 * MAXPAD

    Bt = batch_tile if batch_tile is not None else _pick_batch_tile(B, N)
    assert B % Bt == 0

    # ---- compact padded NHWC input: the ONLY large HBM operand -------------
    x_nhwc = jnp.transpose(x_nchw, (0, 2, 3, 1))
    xp = jnp.pad(x_nhwc, ((0, 0), (MAXPAD, MAXPAD), (MAXPAD, MAXPAD), (0, 0)))

    # ---- fuse the 4 branch conv weights into one (49*C, 4*C) RHS -----------
    blocks = []
    for bi, k in enumerate(KERNELS):
        pad = MAXPAD - k // 2
        w = jnp.transpose(params['conv_w'][bi], (2, 3, 1, 0))       # (k,k,I,O)
        w7 = jnp.pad(w, ((pad, pad), (pad, pad), (0, 0), (0, 0)))   # (7,7,I,O)
        blocks.append(w7.reshape(K49, C))
    w_big = jnp.concatenate(blocks, axis=1).astype(matmul_dtype)    # (49C, 4C)

    # ---- fold conv bias + inference-mode BN into per-channel scale/bias ----
    scales, biases = [], []
    for i in range(NK):
        s = params['bn_gamma'][i] / jnp.sqrt(params['bn_var'][i] + BN_EPS)
        scales.append(s)
        biases.append((params['conv_b'][i] - params['bn_mean'][i]) * s
                      + params['bn_beta'][i])
    scale_cat = jnp.stack(scales, 0).reshape(1, C4).astype(jnp.float32)
    bias_cat = jnp.stack(biases, 0).reshape(1, C4).astype(jnp.float32)

    # ---- fold 1/(H*W) + branch sum of the squeeze into tiled fc weights ----
    fc_w_exp = (jnp.concatenate([params['fc_w']] * NK, axis=0)
                / float(N)).astype(jnp.float32)                      # (4C, d)
    fc_b = params['fc_b'].reshape(1, d).astype(jnp.float32)
    fcs_w_cat = jnp.transpose(params['fcs_w'], (1, 0, 2)).reshape(d, C4)
    fcs_w_cat = fcs_w_cat.astype(jnp.float32)                        # (d, 4C)
    fcs_b_cat = params['fcs_b'].reshape(1, C4).astype(jnp.float32)

    # branch-selection matrix: NK horizontally-tiled identities, (C, 4C)
    sel = jnp.tile(jnp.eye(C, dtype=jnp.float32), (1, NK))

    def full(shape):
        return pl.BlockSpec(shape, lambda g: (0,) * len(shape))

    itemsize = jnp.dtype(matmul_dtype).itemsize
    # explicit VMEM budget (v5e default scoped 16 MiB, v7x physical 64 MiB)
    vmem_est = (2 * Bt * Hp * Wp * C * 4          # input block, double-buffered
                + 2 * Bt * C * N * 4              # output block, double-buffered
                + 2 * K49 * C4 * itemsize         # fused conv weights
                + Bt * N * K49 * (4 + itemsize)   # f32 taps + cast patch value
                + 2 * Bt * N * C4 * 4             # feats + temporaries
                + 4 * (1 << 20))                  # small operands + slack
    vmem_limit = int(min(64 << 20, max(32 << 20, vmem_est)))

    cost = pl.CostEstimate(
        flops=2 * B * N * (K49 * C4 + C * C4) + 2 * B * (C4 * d + d * C4),
        transcendentals=B * C4,
        bytes_accessed=(B * Hp * Wp * C * 4 + K49 * C4 * itemsize
                        + B * C * N * 4 + 4 * C4 * 4 + 2 * C4 * d * 4))

    out = pl.pallas_call(
        _seb_kernel,
        out_shape=jax.ShapeDtypeStruct((B, C, N), x_nchw.dtype),
        grid=(B // Bt,),
        in_specs=[
            pl.BlockSpec((Bt, Hp, Wp, C), lambda g: (g, 0, 0, 0)),  # padded x
            full((K49, C4)),                                 # fused conv RHS
            full((1, C4)), full((1, C4)),                    # BN scale / bias
            full((C4, d)), full((1, d)),                     # fc (pre-folded)
            full((d, C4)), full((1, C4)),                    # fcs
            full((C, C4)),                                   # branch-select
        ],
        out_specs=pl.BlockSpec((Bt, C, N), lambda g: (g, 0, 0)),
        compiler_params=pltpu.CompilerParams(
            dimension_semantics=("parallel",),
            vmem_limit_bytes=vmem_limit),
        cost_estimate=cost,
    )(xp, w_big, scale_cat, bias_cat, fc_w_exp, fc_b,
      fcs_w_cat, fcs_b_cat, sel)

    # Kernel already emits (B, C, H*W): a free reshape restores NCHW.
    return out.reshape(B, C, H, W)


def local_stage1_ref(x, params):
    """Pure-JAX reference in NCHW, mirrors the PyTorch forward (eval-mode BN)."""
    outs = []
    for i, k in enumerate(KERNELS):
        y = jax.lax.conv_general_dilated(
            x, params['conv_w'][i], window_strides=(1, 1),
            padding=[(k // 2, k // 2)] * 2,
            dimension_numbers=('NCHW', 'OIHW', 'NCHW'))
        y = y + params['conv_b'][i][None, :, None, None]
        g = params['bn_gamma'][i][None, :, None, None]
        bb = params['bn_beta'][i][None, :, None, None]
        mu = params['bn_mean'][i][None, :, None, None]
        var = params['bn_var'][i][None, :, None, None]
        y = (y - mu) / jnp.sqrt(var + BN_EPS) * g + bb
        outs.append(jnp.maximum(y, 0.0))
    feats = jnp.stack(outs, 0)                               # (NK, B, C, H, W)
    U = outs[0] + outs[1] + outs[2] + outs[3]
    S = U.mean(-1).mean(-1)                                  # (B, C)
    Z = S @ params['fc_w'] + params['fc_b']                  # (B, d)
    ws = []
    for i in range(NK):
        w = Z @ params['fcs_w'][i] + params['fcs_b'][i]      # (B, C)
        ws.append(w[:, :, None, None])
    aw = jax.nn.softmax(jnp.stack(ws, 0), axis=0)            # (NK, B, C, 1, 1)
    return (aw * feats).sum(0)


if __name__ == "__main__":
    B, C, H, W = 2, 32, 8, 8
    reduction, L = 16, 32
    d = max(L, C // reduction)

    key = jax.random.PRNGKey(0)
    keys = iter(jax.random.split(key, 64))

    def nrm(shape, s=0.1):
        return s * jax.random.normal(next(keys), shape, jnp.float32)

    params = {
        'conv_w':   [nrm((C, C, k, k)) for k in KERNELS],
        'conv_b':   [nrm((C,)) for _ in KERNELS],
        'bn_gamma': [1.0 + nrm((C,)) for _ in KERNELS],
        'bn_beta':  [nrm((C,)) for _ in KERNELS],
        'bn_mean':  [nrm((C,)) for _ in KERNELS],
        'bn_var':   [jax.random.uniform(next(keys), (C,), jnp.float32, 0.5, 1.5)
                     for _ in KERNELS],
        'fc_w':     nrm((C, d)),
        'fc_b':     nrm((d,)),
        'fcs_w':    jnp.stack([nrm((d, C)) for _ in KERNELS], 0),
        'fcs_b':    jnp.stack([nrm((C,)) for _ in KERNELS], 0),
    }

    x = jax.random.normal(next(keys), (B, C, H, W), jnp.float32)

    out = jax.block_until_ready(local_stage1_pallas(x, params))
    ref = local_stage1_ref(x, params)
    np.testing.assert_allclose(np.asarray(out), np.asarray(ref),
                               rtol=1e-3, atol=1e-3)
    print("KERNEL_OK")
</pallas_src>

<mosaic_0001>
module attributes {stable_mosaic.version = 11 : i64} {
  func.func @_seb_kernel(%arg0: i32, %arg1: memref<1x14x14x32xf32, #tpu.memory_space<vmem>>, %arg2: memref<1568x128xf32, #tpu.memory_space<vmem>>, %arg3: memref<1x128xf32, #tpu.memory_space<vmem>>, %arg4: memref<1x128xf32, #tpu.memory_space<vmem>>, %arg5: memref<128x32xf32, #tpu.memory_space<vmem>>, %arg6: memref<1x32xf32, #tpu.memory_space<vmem>>, %arg7: memref<32x128xf32, #tpu.memory_space<vmem>>, %arg8: memref<1x128xf32, #tpu.memory_space<vmem>>, %arg9: memref<32x128xf32, #tpu.memory_space<vmem>>, %arg10: memref<1x32x64xf32, #tpu.memory_space<vmem>>) attributes {dimension_semantics = [#tpu.dimension_semantics<parallel>], iteration_bounds = array<i64: 2>, scalar_prefetch = 0 : i64, scratch_operands = 0 : i64, tpu.core_type = #tpu.core_type<tc>, window_params = [{transform_indices = @transform_0, window_bounds = array<i64: 1, 14, 14, 32>}, {pipeline_mode = #tpu.pipeline_mode<synchronous>, transform_indices = @transform_1, window_bounds = array<i64: 1568, 128>}, {pipeline_mode = #tpu.pipeline_mode<synchronous>, transform_indices = @transform_2, window_bounds = array<i64: 1, 128>}, {pipeline_mode = #tpu.pipeline_mode<synchronous>, transform_indices = @transform_3, window_bounds = array<i64: 1, 128>}, {pipeline_mode = #tpu.pipeline_mode<synchronous>, transform_indices = @transform_4, window_bounds = array<i64: 128, 32>}, {pipeline_mode = #tpu.pipeline_mode<synchronous>, transform_indices = @transform_5, window_bounds = array<i64: 1, 32>}, {pipeline_mode = #tpu.pipeline_mode<synchronous>, transform_indices = @transform_6, window_bounds = array<i64: 32, 128>}, {pipeline_mode = #tpu.pipeline_mode<synchronous>, transform_indices = @transform_7, window_bounds = array<i64: 1, 128>}, {pipeline_mode = #tpu.pipeline_mode<synchronous>, transform_indices = @transform_8, window_bounds = array<i64: 32, 128>}, {transform_indices = @transform_9, window_bounds = array<i64: 1, 32, 64>}]} {
    %c0 = arith.constant 0 : index
    %c0_0 = arith.constant 0 : index
    %c0_1 = arith.constant 0 : index
    %c0_2 = arith.constant 0 : index
    %0 = vector.load %arg1[%c0, %c0_0, %c0_1, %c0_2] : memref<1x14x14x32xf32, #tpu.memory_space<vmem>>, vector<1x8x8x32xf32>
    %c0_3 = arith.constant 0 : index
    %c0_4 = arith.constant 0 : index
    %c1 = arith.constant 1 : index
    %c0_5 = arith.constant 0 : index
    %1 = vector.load %arg1[%c0_3, %c0_4, %c1, %c0_5] : memref<1x14x14x32xf32, #tpu.memory_space<vmem>>, vector<1x8x8x32xf32>
    %c0_6 = arith.constant 0 : index
    %c0_7 = arith.constant 0 : index
    %c2 = arith.constant 2 : index
    %c0_8 = arith.constant 0 : index
    %2 = vector.load %arg1[%c0_6, %c0_7, %c2, %c0_8] : memref<1x14x14x32xf32, #tpu.memory_space<vmem>>, vector<1x8x8x32xf32>
    %c0_9 = arith.constant 0 : index
    %c0_10 = arith.constant 0 : index
    %c3 = arith.constant 3 : index
    %c0_11 = arith.constant 0 : index
    %3 = vector.load %arg1[%c0_9, %c0_10, %c3, %c0_11] : memref<1x14x14x32xf32, #tpu.memory_space<vmem>>, vector<1x8x8x32xf32>
    %c0_12 = arith.constant 0 : index
    %c0_13 = arith.constant 0 : index
    %c4 = arith.constant 4 : index
    %c0_14 = arith.constant 0 : index
    %4 = vector.load %arg1[%c0_12, %c0_13, %c4, %c0_14] : memref<1x14x14x32xf32, #tpu.memory_space<vmem>>, vector<1x8x8x32xf32>
    %c0_15 = arith.constant 0 : index
    %c0_16 = arith.constant 0 : index
    %c5 = arith.constant 5 : index
    %c0_17 = arith.constant 0 : index
    %5 = vector.load %arg1[%c0_15, %c0_16, %c5, %c0_17] : memref<1x14x14x32xf32, #tpu.memory_space<vmem>>, vector<1x8x8x32xf32>
    %c0_18 = arith.constant 0 : index
    %c0_19 = arith.constant 0 : index
    %c6 = arith.constant 6 : index
    %c0_20 = arith.constant 0 : index
    %6 = vector.load %arg1[%c0_18, %c0_19, %c6, %c0_20] : memref<1x14x14x32xf32, #tpu.memory_space<vmem>>, vector<1x8x8x32xf32>
    %c0_21 = arith.constant 0 : index
    %c1_22 = arith.constant 1 : index
    %c0_23 = arith.constant 0 : index
    %c0_24 = arith.constant 0 : index
    %7 = vector.load %arg1[%c0_21, %c1_22, %c0_23, %c0_24] : memref<1x14x14x32xf32, #tpu.memory_space<vmem>>, vector<1x8x8x32xf32>
    %c0_25 = arith.constant 0 : index
    %c1_26 = arith.constant 1 : index
    %c1_27 = arith.constant 1 : index
    %c0_28 = arith.constant 0 : index
    %8 = vector.load %arg1[%c0_25, %c1_26, %c1_27, %c0_28] : memref<1x14x14x32xf32, #tpu.memory_space<vmem>>, vector<1x8x8x32xf32>
    %c0_29 = arith.constant 0 : index
    %c1_30 = arith.constant 1 : index
    %c2_31 = arith.constant 2 : index
    %c0_32 = arith.constant 0 : index
    %9 = vector.load %arg1[%c0_29, %c1_30, %c2_31, %c0_32] : memref<1x14x14x32xf32, #tpu.memory_space<vmem>>, vector<1x8x8x32xf32>
    %c0_33 = arith.constant 0 : index
    %c1_34 = arith.constant 1 : index
    %c3_35 = arith.constant 3 : index
    %c0_36 = arith.constant 0 : index
    %10 = vector.load %arg1[%c0_33, %c1_34, %c3_35, %c0_36] : memref<1x14x14x32xf32, #tpu.memory_space<vmem>>, vector<1x8x8x32xf32>
    %c0_37 = arith.constant 0 : index
    %c1_38 = arith.constant 1 : index
    %c4_39 = arith.constant 4 : index
    %c0_40 = arith.constant 0 : index
    %11 = vector.load %arg1[%c0_37, %c1_38, %c4_39, %c0_40] : memref<1x14x14x32xf32, #tpu.memory_space<vmem>>, vector<1x8x8x32xf32>
    %c0_41 = arith.constant 0 : index
    %c1_42 = arith.constant 1 : index
    %c5_43 = arith.constant 5 : index
    %c0_44 = arith.constant 0 : index
    %12 = vector.load %arg1[%c0_41, %c1_42, %c5_43, %c0_44] : memref<1x14x14x32xf32, #tpu.memory_space<vmem>>, vector<1x8x8x32xf32>
    %c0_45 = arith.constant 0 : index
    %c1_46 = arith.constant 1 : index
    %c6_47 = arith.constant 6 : index
    %c0_48 = arith.constant 0 : index
    %13 = vector.load %arg1[%c0_45, %c1_46, %c6_47, %c0_48] : memref<1x14x14x32xf32, #tpu.memory_space<vmem>>, vector<1x8x8x32xf32>
    %c0_49 = arith.constant 0 : index
    %c2_50 = arith.constant 2 : index
    %c0_51 = arith.constant 0 : index
    %c0_52 = arith.constant 0 : index
    %14 = vector.load %arg1[%c0_49, %c2_50, %c0_51, %c0_52] : memref<1x14x14x32xf32, #tpu.memory_space<vmem>>, vector<1x8x8x32xf32>
    %c0_53 = arith.constant 0 : index
    %c2_54 = arith.constant 2 : index
    %c1_55 = arith.constant 1 : index
    %c0_56 = arith.constant 0 : index
    %15 = vector.load %arg1[%c0_53, %c2_54, %c1_55, %c0_56] : memref<1x14x14x32xf32, #tpu.memory_space<vmem>>, vector<1x8x8x32xf32>
    %c0_57 = arith.constant 0 : index
    %c2_58 = arith.constant 2 : index
    %c2_59 = arith.constant 2 : index
    %c0_60 = arith.constant 0 : index
    %16 = vector.load %arg1[%c0_57, %c2_58, %c2_59, %c0_60] : memref<1x14x14x32xf32, #tpu.memory_space<vmem>>, vector<1x8x8x32xf32>
    %c0_61 = arith.constant 0 : index
    %c2_62 = arith.constant 2 : index
    %c3_63 = arith.constant 3 : index
    %c0_64 = arith.constant 0 : index
    %17 = vector.load %arg1[%c0_61, %c2_62, %c3_63, %c0_64] : memref<1x14x14x32xf32, #tpu.memory_space<vmem>>, vector<1x8x8x32xf32>
    %c0_65 = arith.constant 0 : index
    %c2_66 = arith.constant 2 : index
    %c4_67 = arith.constant 4 : index
    %c0_68 = arith.constant 0 : index
    %18 = vector.load %arg1[%c0_65, %c2_66, %c4_67, %c0_68] : memref<1x14x14x32xf32, #tpu.memory_space<vmem>>, vector<1x8x8x32xf32>
    %c0_69 = arith.constant 0 : index
    %c2_70 = arith.constant 2 : index
    %c5_71 = arith.constant 5 : index
    %c0_72 = arith.constant 0 : index
    %19 = vector.load %arg1[%c0_69, %c2_70, %c5_71, %c0_72] : memref<1x14x14x32xf32, #tpu.memory_space<vmem>>, vector<1x8x8x32xf32>
    %c0_73 = arith.constant 0 : index
    %c2_74 = arith.constant 2 : index
    %c6_75 = arith.constant 6 : index
    %c0_76 = arith.constant 0 : index
    %20 = vector.load %arg1[%c0_73, %c2_74, %c6_75, %c0_76] : memref<1x14x14x32xf32, #tpu.memory_space<vmem>>, vector<1x8x8x32xf32>
    %c0_77 = arith.constant 0 : index
    %c3_78 = arith.constant 3 : index
    %c0_79 = arith.constant 0 : index
    %c0_80 = arith.constant 0 : index
    %21 = vector.load %arg1[%c0_77, %c3_78, %c0_79, %c0_80] : memref<1x14x14x32xf32, #tpu.memory_space<vmem>>, vector<1x8x8x32xf32>
    %c0_81 = arith.constant 0 : index
    %c3_82 = arith.constant 3 : index
    %c1_83 = arith.constant 1 : index
    %c0_84 = arith.constant 0 : index
    %22 = vector.load %arg1[%c0_81, %c3_82, %c1_83, %c0_84] : memref<1x14x14x32xf32, #tpu.memory_space<vmem>>, vector<1x8x8x32xf32>
    %c0_85 = arith.constant 0 : index
    %c3_86 = arith.constant 3 : index
    %c2_87 = arith.constant 2 : index
    %c0_88 = arith.constant 0 : index
    %23 = vector.load %arg1[%c0_85, %c3_86, %c2_87, %c0_88] : memref<1x14x14x32xf32, #tpu.memory_space<vmem>>, vector<1x8x8x32xf32>
    %c0_89 = arith.constant 0 : index
    %c3_90 = arith.constant 3 : index
    %c3_91 = arith.constant 3 : index
    %c0_92 = arith.constant 0 : index
    %24 = vector.load %arg1[%c0_89, %c3_90, %c3_91, %c0_92] : memref<1x14x14x32xf32, #tpu.memory_space<vmem>>, vector<1x8x8x32xf32>
    %c0_93 = arith.constant 0 : index
    %c3_94 = arith.constant 3 : index
    %c4_95 = arith.constant 4 : index
    %c0_96 = arith.constant 0 : index
    %25 = vector.load %arg1[%c0_93, %c3_94, %c4_95, %c0_96] : memref<1x14x14x32xf32, #tpu.memory_space<vmem>>, vector<1x8x8x32xf32>
    %c0_97 = arith.constant 0 : index
    %c3_98 = arith.constant 3 : index
    %c5_99 = arith.constant 5 : index
    %c0_100 = arith.constant 0 : index
    %26 = vector.load %arg1[%c0_97, %c3_98, %c5_99, %c0_100] : memref<1x14x14x32xf32, #tpu.memory_space<vmem>>, vector<1x8x8x32xf32>
    %c0_101 = arith.constant 0 : index
    %c3_102 = arith.constant 3 : index
    %c6_103 = arith.constant 6 : index
    %c0_104 = arith.constant 0 : index
    %27 = vector.load %arg1[%c0_101, %c3_102, %c6_103, %c0_104] : memref<1x14x14x32xf32, #tpu.memory_space<vmem>>, vector<1x8x8x32xf32>
    %c0_105 = arith.constant 0 : index
    %c4_106 = arith.constant 4 : index
    %c0_107 = arith.constant 0 : index
    %c0_108 = arith.constant 0 : index
    %28 = vector.load %arg1[%c0_105, %c4_106, %c0_107, %c0_108] : memref<1x14x14x32xf32, #tpu.memory_space<vmem>>, vector<1x8x8x32xf32>
    %c0_109 = arith.constant 0 : index
    %c4_110 = arith.constant 4 : index
    %c1_111 = arith.constant 1 : index
    %c0_112 = arith.constant 0 : index
    %29 = vector.load %arg1[%c0_109, %c4_110, %c1_111, %c0_112] : memref<1x14x14x32xf32, #tpu.memory_space<vmem>>, vector<1x8x8x32xf32>
    %c0_113 = arith.constant 0 : index
    %c4_114 = arith.constant 4 : index
    %c2_115 = arith.constant 2 : index
    %c0_116 = arith.constant 0 : index
    %30 = vector.load %arg1[%c0_113, %c4_114, %c2_115, %c0_116] : memref<1x14x14x32xf32, #tpu.memory_space<vmem>>, vector<1x8x8x32xf32>
    %c0_117 = arith.constant 0 : index
    %c4_118 = arith.constant 4 : index
    %c3_119 = arith.constant 3 : index
    %c0_120 = arith.constant 0 : index
    %31 = vector.load %arg1[%c0_117, %c4_118, %c3_119, %c0_120] : memref<1x14x14x32xf32, #tpu.memory_space<vmem>>, vector<1x8x8x32xf32>
    %c0_121 = arith.constant 0 : index
    %c4_122 = arith.constant 4 : index
    %c4_123 = arith.constant 4 : index
    %c0_124 = arith.constant 0 : index
    %32 = vector.load %arg1[%c0_121, %c4_122, %c4_123, %c0_124] : memref<1x14x14x32xf32, #tpu.memory_space<vmem>>, vector<1x8x8x32xf32>
    %c0_125 = arith.constant 0 : index
    %c4_126 = arith.constant 4 : index
    %c5_127 = arith.constant 5 : index
    %c0_128 = arith.constant 0 : index
    %33 = vector.load %arg1[%c0_125, %c4_126, %c5_127, %c0_128] : memref<1x14x14x32xf32, #tpu.memory_space<vmem>>, vector<1x8x8x32xf32>
    %c0_129 = arith.constant 0 : index
    %c4_130 = arith.constant 4 : index
    %c6_131 = arith.constant 6 : index
    %c0_132 = arith.constant 0 : index
    %34 = vector.load %arg1[%c0_129, %c4_130, %c6_131, %c0_132] : memref<1x14x14x32xf32, #tpu.memory_space<vmem>>, vector<1x8x8x32xf32>
    %c0_133 = arith.constant 0 : index
    %c5_134 = arith.constant 5 : index
    %c0_135 = arith.constant 0 : index
    %c0_136 = arith.constant 0 : index
    %35 = vector.load %arg1[%c0_133, %c5_134, %c0_135, %c0_136] : memref<1x14x14x32xf32, #tpu.memory_space<vmem>>, vector<1x8x8x32xf32>
    %c0_137 = arith.constant 0 : index
    %c5_138 = arith.constant 5 : index
    %c1_139 = arith.constant 1 : index
    %c0_140 = arith.constant 0 : index
    %36 = vector.load %arg1[%c0_137, %c5_138, %c1_139, %c0_140] : memref<1x14x14x32xf32, #tpu.memory_space<vmem>>, vector<1x8x8x32xf32>
    %c0_141 = arith.constant 0 : index
    %c5_142 = arith.constant 5 : index
    %c2_143 = arith.constant 2 : index
    %c0_144 = arith.constant 0 : index
    %37 = vector.load %arg1[%c0_141, %c5_142, %c2_143, %c0_144] : memref<1x14x14x32xf32, #tpu.memory_space<vmem>>, vector<1x8x8x32xf32>
    %c0_145 = arith.constant 0 : index
    %c5_146 = arith.constant 5 : index
    %c3_147 = arith.constant 3 : index
    %c0_148 = arith.constant 0 : index
    %38 = vector.load %arg1[%c0_145, %c5_146, %c3_147, %c0_148] : memref<1x14x14x32xf32, #tpu.memory_space<vmem>>, vector<1x8x8x32xf32>
    %c0_149 = arith.constant 0 : index
    %c5_150 = arith.constant 5 : index
    %c4_151 = arith.constant 4 : index
    %c0_152 = arith.constant 0 : index
    %39 = vector.load %arg1[%c0_149, %c5_150, %c4_151, %c0_152] : memref<1x14x14x32xf32, #tpu.memory_space<vmem>>, vector<1x8x8x32xf32>
    %c0_153 = arith.constant 0 : index
    %c5_154 = arith.constant 5 : index
    %c5_155 = arith.constant 5 : index
    %c0_156 = arith.constant 0 : index
    %40 = vector.load %arg1[%c0_153, %c5_154, %c5_155, %c0_156] : memref<1x14x14x32xf32, #tpu.memory_space<vmem>>, vector<1x8x8x32xf32>
    %c0_157 = arith.constant 0 : index
    %c5_158 = arith.constant 5 : index
    %c6_159 = arith.constant 6 : index
    %c0_160 = arith.constant 0 : index
    %41 = vector.load %arg1[%c0_157, %c5_158, %c6_159, %c0_160] : memref<1x14x14x32xf32, #tpu.memory_space<vmem>>, vector<1x8x8x32xf32>
    %c0_161 = arith.constant 0 : index
    %c6_162 = arith.constant 6 : index
    %c0_163 = arith.constant 0 : index
    %c0_164 = arith.constant 0 : index
    %42 = vector.load %arg1[%c0_161, %c6_162, %c0_163, %c0_164] : memref<1x14x14x32xf32, #tpu.memory_space<vmem>>, vector<1x8x8x32xf32>
    %c0_165 = arith.constant 0 : index
    %c6_166 = arith.constant 6 : index
    %c1_167 = arith.constant 1 : index
    %c0_168 = arith.constant 0 : index
    %43 = vector.load %arg1[%c0_165, %c6_166, %c1_167, %c0_168] : memref<1x14x14x32xf32, #tpu.memory_space<vmem>>, vector<1x8x8x32xf32>
    %c0_169 = arith.constant 0 : index
    %c6_170 = arith.constant 6 : index
    %c2_171 = arith.constant 2 : index
    %c0_172 = arith.constant 0 : index
    %44 = vector.load %arg1[%c0_169, %c6_170, %c2_171, %c0_172] : memref<1x14x14x32xf32, #tpu.memory_space<vmem>>, vector<1x8x8x32xf32>
    %c0_173 = arith.constant 0 : index
    %c6_174 = arith.constant 6 : index
    %c3_175 = arith.constant 3 : index
    %c0_176 = arith.constant 0 : index
    %45 = vector.load %arg1[%c0_173, %c6_174, %c3_175, %c0_176] : memref<1x14x14x32xf32, #tpu.memory_space<vmem>>, vector<1x8x8x32xf32>
    %c0_177 = arith.constant 0 : index
    %c6_178 = arith.constant 6 : index
    %c4_179 = arith.constant 4 : index
    %c0_180 = arith.constant 0 : index
    %46 = vector.load %arg1[%c0_177, %c6_178, %c4_179, %c0_180] : memref<1x14x14x32xf32, #tpu.memory_space<vmem>>, vector<1x8x8x32xf32>
    %c0_181 = arith.constant 0 : index
    %c6_182 = arith.constant 6 : index
    %c5_183 = arith.constant 5 : index
    %c0_184 = arith.constant 0 : index
    %47 = vector.load %arg1[%c0_181, %c6_182, %c5_183, %c0_184] : memref<1x14x14x32xf32, #tpu.memory_space<vmem>>, vector<1x8x8x32xf32>
    %c0_185 = arith.constant 0 : index
    %c6_186 = arith.constant 6 : index
    %c6_187 = arith.constant 6 : index
    %c0_188 = arith.constant 0 : index
    %48 = vector.load %arg1[%c0_185, %c6_186, %c6_187, %c0_188] : memref<1x14x14x32xf32, #tpu.memory_space<vmem>>, vector<1x8x8x32xf32>
    %49 = tpu.concatenate %0, %1, %2, %3, %4, %5, %6, %7, %8, %9, %10, %11, %12, %13, %14, %15 in 3 : vector<1x8x8x32xf32>, vector<1x8x8x32xf32>, vector<1x8x8x32xf32>, vector<1x8x8x32xf32>, vector<1x8x8x32xf32>, vector<1x8x8x32xf32>, vector<1x8x8x32xf32>, vector<1x8x8x32xf32>, vector<1x8x8x32xf32>, vector<1x8x8x32xf32>, vector<1x8x8x32xf32>, vector<1x8x8x32xf32>, vector<1x8x8x32xf32>, vector<1x8x8x32xf32>, vector<1x8x8x32xf32>, vector<1x8x8x32xf32> -> vector<1x8x8x512xf32>
    %50 = tpu.concatenate %16, %17, %18, %19, %20, %21, %22, %23, %24, %25, %26, %27, %28, %29, %30, %31 in 3 : vector<1x8x8x32xf32>, vector<1x8x8x32xf32>, vector<1x8x8x32xf32>, vector<1x8x8x32xf32>, vector<1x8x8x32xf32>, vector<1x8x8x32xf32>, vector<1x8x8x32xf32>, vector<1x8x8x32xf32>, vector<1x8x8x32xf32>, vector<1x8x8x32xf32>, vector<1x8x8x32xf32>, vector<1x8x8x32xf32>, vector<1x8x8x32xf32>, vector<1x8x8x32xf32>, vector<1x8x8x32xf32>, vector<1x8x8x32xf32> -> vector<1x8x8x512xf32>
    %51 = tpu.concatenate %32, %33, %34, %35, %36, %37, %38, %39, %40, %41, %42, %43, %44, %45, %46, %47 in 3 : vector<1x8x8x32xf32>, vector<1x8x8x32xf32>, vector<1x8x8x32xf32>, vector<1x8x8x32xf32>, vector<1x8x8x32xf32>, vector<1x8x8x32xf32>, vector<1x8x8x32xf32>, vector<1x8x8x32xf32>, vector<1x8x8x32xf32>, vector<1x8x8x32xf32>, vector<1x8x8x32xf32>, vector<1x8x8x32xf32>, vector<1x8x8x32xf32>, vector<1x8x8x32xf32>, vector<1x8x8x32xf32>, vector<1x8x8x32xf32> -> vector<1x8x8x512xf32>
    %52 = tpu.concatenate %49, %50, %51, %48 in 3 : vector<1x8x8x512xf32>, vector<1x8x8x512xf32>, vector<1x8x8x512xf32>, vector<1x8x8x32xf32> -> vector<1x8x8x1568xf32>
    %53 = vector.shape_cast %52 : vector<1x8x8x1568xf32> to vector<64x1568xf32>
    %c0_189 = arith.constant 0 : index
    %c0_190 = arith.constant 0 : index
    %54 = vector.load %arg2[%c0_189, %c0_190] : memref<1568x128xf32, #tpu.memory_space<vmem>>, vector<1568x128xf32>
    %cst = arith.constant dense<0.000000e+00> : vector<64x128xf32>
    %55 = tpu.matmul %53, %54, %cst {dimension_numbers = #tpu.dot_dimension_numbers<[1], [0], [0], [1], [0, 0, 1, 1], [], []>} : vector<64x1568xf32>, vector<1568x128xf32>, vector<64x128xf32> -> vector<64x128xf32>
    %c0_191 = arith.constant 0 : index
    %c0_192 = arith.constant 0 : index
    %56 = vector.load %arg3[%c0_191, %c0_192] : memref<1x128xf32, #tpu.memory_space<vmem>>, vector<1x128xf32>
    %57 = vector.broadcast %56 : vector<1x128xf32> to vector<64x128xf32>
    %58 = arith.mulf %55, %57 : vector<64x128xf32>
    %c0_193 = arith.constant 0 : index
    %c0_194 = arith.constant 0 : index
    %59 = vector.load %arg4[%c0_193, %c0_194] : memref<1x128xf32, #tpu.memory_space<vmem>>, vector<1x128xf32>
    %60 = vector.broadcast %59 : vector<1x128xf32> to vector<64x128xf32>
    %61 = arith.addf %58, %60 : vector<64x128xf32>
    %cst_195 = arith.constant 0.000000e+00 : f32
    %62 = vector.broadcast %cst_195 : f32 to vector<64x128xf32>
    %63 = arith.maximumf %61, %62 : vector<64x128xf32>
    %cst_196 = arith.constant dense<0.000000e+00> : vector<128xf32>
    %64 = vector.multi_reduction <add>, %63, %cst_196 [0] : vector<64x128xf32> to vector<128xf32>
    %65 = vector.shape_cast %64 : vector<128xf32> to vector<1x128xf32>
    %c0_197 = arith.constant 0 : index
    %c0_198 = arith.constant 0 : index
    %66 = vector.load %arg5[%c0_197, %c0_198] : memref<128x32xf32, #tpu.memory_space<vmem>>, vector<128x32xf32>
    %cst_199 = arith.constant dense<0.000000e+00> : vector<1x32xf32>
    %67 = tpu.matmul %65, %66, %cst_199 {dimension_numbers = #tpu.dot_dimension_numbers<[1], [0], [0], [1], [0, 0, 1, 1], [], []>} : vector<1x128xf32>, vector<128x32xf32>, vector<1x32xf32> -> vector<1x32xf32>
    %c0_200 = arith.constant 0 : index
    %c0_201 = arith.constant 0 : index
    %68 = vector.load %arg6[%c0_200, %c0_201] : memref<1x32xf32, #tpu.memory_space<vmem>>, vector<1x32xf32>
    %69 = arith.addf %67, %68 : vector<1x32xf32>
    %c0_202 = arith.constant 0 : index
    %c0_203 = arith.constant 0 : index
    %70 = vector.load %arg7[%c0_202, %c0_203] : memref<32x128xf32, #tpu.memory_space<vmem>>, vector<32x128xf32>
    %cst_204 = arith.constant dense<0.000000e+00> : vector<1x128xf32>
    %71 = tpu.matmul %69, %70, %cst_204 {dimension_numbers = #tpu.dot_dimension_numbers<[1], [0], [0], [1], [0, 0, 1, 1], [], []>} : vector<1x32xf32>, vector<32x128xf32>, vector<1x128xf32> -> vector<1x128xf32>
    %c0_205 = arith.constant 0 : index
    %c0_206 = arith.constant 0 : index
    %72 = vector.load %arg8[%c0_205, %c0_206] : memref<1x128xf32, #tpu.memory_space<vmem>>, vector<1x128xf32>
    %73 = arith.addf %71, %72 : vector<1x128xf32>
    %c32_i32 = arith.constant 32 : i32
    %74 = tpu.dynamic_rotate %73 by %c32_i32 dim 1 : vector<1x128xf32>, i32 -> vector<1x128xf32>
    %75 = arith.maximumf %73, %74 : vector<1x128xf32>
    %c64_i32 = arith.constant 64 : i32
    %76 = tpu.dynamic_rotate %75 by %c64_i32 dim 1 : vector<1x128xf32>, i32 -> vector<1x128xf32>
    %77 = arith.maximumf %75, %76 : vector<1x128xf32>
    %78 = arith.subf %73, %77 : vector<1x128xf32>
    %79 = math.exp %78 : vector<1x128xf32>
    %c32_i32_207 = arith.constant 32 : i32
    %80 = tpu.dynamic_rotate %79 by %c32_i32_207 dim 1 : vector<1x128xf32>, i32 -> vector<1x128xf32>
    %81 = arith.addf %79, %80 : vector<1x128xf32>
    %c64_i32_208 = arith.constant 64 : i32
    %82 = tpu.dynamic_rotate %81 by %c64_i32_208 dim 1 : vector<1x128xf32>, i32 -> vector<1x128xf32>
    %83 = arith.addf %81, %82 : vector<1x128xf32>
    %84 = arith.divf %79, %83 : vector<1x128xf32>
    %c0_209 = arith.constant 0 : index
    %c0_210 = arith.constant 0 : index
    %85 = vector.load %arg9[%c0_209, %c0_210] : memref<32x128xf32, #tpu.memory_space<vmem>>, vector<32x128xf32>
    %86 = vector.broadcast %84 : vector<1x128xf32> to vector<32x128xf32>
    %87 = arith.mulf %85, %86 : vector<32x128xf32>
    %cst_211 = arith.constant dense<0.000000e+00> : vector<32x64xf32>
    %88 = tpu.matmul %87, %63, %cst_211 {dimension_numbers = #tpu.dot_dimension_numbers<[1], [1], [0], [0], [0, 0, 1, 0], [], []>} : vector<32x128xf32>, vector<64x128xf32>, vector<32x64xf32> -> vector<32x64xf32>
    %c0_212 = arith.constant 0 : index
    %c0_213 = arith.constant 0 : index
    %c0_214 = arith.constant 0 : index
    %89 = vector.load %arg10[%c0_212, %c0_213, %c0_214] : memref<1x32x64xf32, #tpu.memory_space<vmem>>, vector<1x32x64xf32>
    %90 = vector.shape_cast %89 : vector<1x32x64xf32> to vector<32x64xf32>
    %91 = vector.shape_cast %88 : vector<32x64xf32> to vector<1x32x64xf32>
    tpu.vector_store %arg10[%c0_212, %c0_213, %c0_214], %91 {strides = array<i32>} : memref<1x32x64xf32, #tpu.memory_space<vmem>>, vector<1x32x64xf32>,
    return
  }
  func.func @transform_0(%arg0: i32) -> (i32, i32, i32, i32) {
    %c0_i32 = arith.constant 0 : i32
    %c0_i32_0 = arith.constant 0 : i32
    %c0_i32_1 = arith.constant 0 : i32
    %c0_i32_2 = arith.constant 0 : i32
    return %arg0, %c0_i32, %c0_i32_0, %c0_i32_1 : i32, i32, i32, i32
  }
  func.func @transform_1(%arg0: i32) -> (i32, i32) {
    %c0_i32 = arith.constant 0 : i32
    %c0_i32_0 = arith.constant 0 : i32
    %c0_i32_1 = arith.constant 0 : i32
    return %c0_i32, %c0_i32_0 : i32, i32
  }
  func.func @transform_2(%arg0: i32) -> (i32, i32) {
    %c0_i32 = arith.constant 0 : i32
    %c0_i32_0 = arith.constant 0 : i32
    %c0_i32_1 = arith.constant 0 : i32
    return %c0_i32, %c0_i32_0 : i32, i32
  }
  func.func @transform_3(%arg0: i32) -> (i32, i32) {
    %c0_i32 = arith.constant 0 : i32
    %c0_i32_0 = arith.constant 0 : i32
    %c0_i32_1 = arith.constant 0 : i32
    return %c0_i32, %c0_i32_0 : i32, i32
  }
  func.func @transform_4(%arg0: i32) -> (i32, i32) {
    %c0_i32 = arith.constant 0 : i32
    %c0_i32_0 = arith.constant 0 : i32
    %c0_i32_1 = arith.constant 0 : i32
    return %c0_i32, %c0_i32_0 : i32, i32
  }
  func.func @transform_5(%arg0: i32) -> (i32, i32) {
    %c0_i32 = arith.constant 0 : i32
    %c0_i32_0 = arith.constant 0 : i32
    %c0_i32_1 = arith.constant 0 : i32
    return %c0_i32, %c0_i32_0 : i32, i32
  }
  func.func @transform_6(%arg0: i32) -> (i32, i32) {
    %c0_i32 = arith.constant 0 : i32
    %c0_i32_0 = arith.constant 0 : i32
    %c0_i32_1 = arith.constant 0 : i32
    return %c0_i32, %c0_i32_0 : i32, i32
  }
  func.func @transform_7(%arg0: i32) -> (i32, i32) {
    %c0_i32 = arith.constant 0 : i32
    %c0_i32_0 = arith.constant 0 : i32
    %c0_i32_1 = arith.constant 0 : i32
    return %c0_i32, %c0_i32_0 : i32, i32
  }
  func.func @transform_8(%arg0: i32) -> (i32, i32) {
    %c0_i32 = arith.constant 0 : i32
    %c0_i32_0 = arith.constant 0 : i32
    %c0_i32_1 = arith.constant 0 : i32
    return %c0_i32, %c0_i32_0 : i32, i32
  }
  func.func @transform_9(%arg0: i32) -> (i32, i32, i32) {
    %c0_i32 = arith.constant 0 : i32
    %c0_i32_0 = arith.constant 0 : i32
    %c0_i32_1 = arith.constant 0 : i32
    return %arg0, %c0_i32, %c0_i32_0 : i32, i32, i32
  }
}

</mosaic_0001>

<bundles_post_ra>
// kernel: tpu_custom_call.1
= control target key start
LH: loop header
LB: loop body
LE: loop exit
PB: predicated region body
PF: predicated region fallthrough
CT: control target
= control target key end

     0   :  { %14 = vsyncpa [#allocation3], 0  ;;  %s6860_s0 = inlined_call_operand.vmem [shape: f32[2,14,14,32], index: 0, kind: input, shape index: {}]   ;;  %s6861_s1 = inlined_call_operand.hbm [shape: f32[1568,128], index: 1, kind: input, shape index: {}]   ;;  %s6862_s2 = inlined_call_operand.vmem [shape: f32[1,128], index: 2, kind: input, shape index: {}]   ;;  %s6863_s3 = inlined_call_operand.vmem [shape: f32[1,128], index: 3, kind: input, shape index: {}]   ;;  %s6864_s4 = inlined_call_operand.vmem [shape: f32[128,32], index: 4, kind: input, shape index: {}]   ;;  %s6865_s5 = inlined_call_operand.vmem [shape: f32[1,32], index: 5, kind: input, shape index: {}]   ;;  %s6866_s6 = inlined_call_operand.vmem [shape: f32[32,128], index: 6, kind: input, shape index: {}]   ;;  %s6867_s7 = inlined_call_operand.vmem [shape: f32[1,128], index: 7, kind: input, shape index: {}]   ;;  %s6868_s8 = inlined_call_operand.vmem [shape: f32[32,128], index: 8, kind: input, shape index: {}]   ;;  %s6869_s9 = inlined_call_operand.hbm [shape: f32[2,32,64], index: 9, kind: output, shape index: {}]  }
   0x1   :  { %15 = vsyncpa [#allocation4], 0 }
   0x2   :  { %17 = vsyncpa [#allocation4 + $0x1], 0  ;;  %s5332_s30 = smov 0   ;;  %s5334_s10 = smov 0  }
   0x3   :  { %s5336_s11 = smov 0   ;;  %s5338_s12 = smov 0  }
   0x4 LB: > { %s5353_s13 = sadd.s32 4294967295, %s5269_s12   ;;  %s3564_s14 = sadd.s32 4294967294, %s5269_s12   ;;  %s5269_s12 = sphi %s5338_s12, %s6910_s12   ;;  %s5265_s11 = sphi %s5336_s11, %s6909_s11   ;;  %s5261_s10 = sphi %s5334_s10, %s6908_s10   ;;  %s5257_s30 = sphi %s5332_s30, %s6907_s30  }
   0x5   : > { %s5357_s15 = sadd.s32 1, %s5269_s12   ;;  %s224_s16 = sadd.s32 1, %s5265_s11 }
   0x6   : > { %s221_s17 = ssub.s32 %s5269_s12, %s5357_s15  ;;  %p234_p0 = scmp.ne.s32.totalorder %s5265_s11, %s5261_s10 }
   0x7   : > { %p222_p1 = scmp.eq.s32.totalorder %s221_s17, 0  ;;  %p235_p2 = scmp.eq.s32.totalorder %s5353_s13, 1 }
   0x8   : > { %p240_p3 = scmp.ne.s32.totalorder %s5261_s10, %s5257_s30  ;;  %p241_p4 = scmp.eq.s32.totalorder %s3564_s14, 1 }
   0x9   : > { %s5368_s18 = scalar_select %p222_p1, %s5265_s11, %s224_s16  }
   0xa   : > { %p5370_p5 = por %p235_p2, %p234_p0  ;;  %p5374_p6 = por %p241_p4, %p240_p3 }
   0xb   : > { %p3565_p7 = scmp.ge.s32.totalorder %s5269_s12, 1  ;;  %p248_p8 = scmp.lt.s32.totalorder %s5269_s12, 3 }
   0xc   : > { %s6873_s20 = scalar_select %p5374_p6, 1, 0 }
   0xd   : > { %p4410_p9 = scmp.eq.s32.totalorder %s5353_s13, 0  ;;  %p5381_p10 = pnand %p3565_p7, %p248_p8 }
   0xe   : > { %s5271_s22 = smov [#allocation2]  }
   0xf   : > { %s260_s23 = sshll.u32 %s5271_s22, 4  ;;  %p4402_p11 = pneg %p5381_p10  ;;  %s261_s23 = int_to_ptr.vmem [resolvable:$true] %s260_s23 }
  0x10   : > { %s5190_s24 = scalar_lea.vmem %s261_s23, 25088  ;;  %p5198_p3 = scmp.lt.s32.totalorder %s261_s23, %s261_s23 }
  0x11   : > { %p4403_p12 = pnand %p4410_p9, %p4402_p11  ;;  %p5191_p0 = scmp.ne.s32.totalorder %s261_s23, %s5190_s24 }
  0x12   : > { %p5199_p4 = scmp.lt.s32.totalorder %s5190_s24, %s5190_s24 }
  0x13   : > { %p5181_p13 = pneg %p4403_p12 }
  0x14   : > { %p5200_p6 = por %p5199_p4, %p5198_p3 }
  0x15   : > { %p5193_p1 = pnand %p5191_p0, %p5181_p13 }
  0x17   : > { %p5194_p2 = pneg %p5193_p1 }
  0x19   : > { %p5201_p7 = pnand %p5200_p6, %p5194_p2 }
  0x1b   : > { %5204 = shalt.err (!%p5201_p7)
}
  0x1c   : > { %s5272_s25 = smov 128   ;;  %s5273_s26 = smov 8  }
  0x1d   : > { %4405 = dma.hbm_to_vmem [thread:$0]  (!%p4403_p12), %s6861_s1, 25088, %s261_s23, [#allocation3], %s5272_s25, %s5272_s25, %s5273_s26  }
  0x1e   : > { %305 = sbr.rel (%p5381_p10) target bundleno = 1783 (0x6f7), region = 56 }
  0x23   : > { %5248 = dma.done.wait (%p4410_p9), [#allocation3], 25088  }
  0x24   : > { %5250 = vsyncadd (%p4410_p9), [#allocation3], 4294942208  ;;  %p341_p8 = scmp.lt.s32.totalorder %s5353_s13, 1  ;;  %s5274_s21 = smov 96   ;;  %v2218_v45 = vld [vmem:[#allocation2 + $0xf8] sm:$0xff]  ;;  %v2217_v47 = vld [vmem:[#allocation2 + $0xf0] sm:$0xff] }
  0x25   : > { %s5275_s23 = smov 32   ;;  %s5276_s24 = smov 64   ;;  %v2202_v46 = vld [vmem:[#allocation2 + $0x78] sm:$0xff]  ;;  %3925 = vmatprep.subr.mxu0 %v2218_v45  ;;  %v2201_v49 = vld [vmem:[#allocation2 + $0x70] sm:$0xff]  ;;  %v2216_v51 = vld [vmem:[#allocation2 + $0xe8] sm:$0xff]  ;;  %vm1128_vm0 = vcmask 261120  }
  0x26   : > { %s342_s29 = scalar_select %p341_p8, %s5353_s13, 1  ;;  %3926 = vmatpush3.msra.mxu0 %v2202_v46  ;;  %v2200_v54 = vld [vmem:[#allocation2 + $0x68] sm:$0xff]  ;;  %v2215_v55 = vld [vmem:[#allocation2 + $0xe0] sm:$0xff]  ;;  %v2214_v59 = vld [vmem:[#allocation2 + $0xd8] sm:$0xff]  ;;  %vm1137_vm1 = vcmask 523264   ;;  %vm1146_vm2 = vcmask 785408  }
  0x27   : > { %3927 = vmatprep.subr.mxu0 %v2217_v47  ;;  %v2199_v57 = vld [vmem:[#allocation2 + $0x60] sm:$0xff]  ;;  %v2198_v61 = vld [vmem:[#allocation2 + $0x58] sm:$0xff]  ;;  %v2213_v62 = vld [vmem:[#allocation2 + $0xd0] sm:$0xff]  ;;  %vm5278_vm3 = vmmov 0  }
  0x28   : > { %s4395_s14 = smul.u32 224, %s342_s29  ;;  %3928 = vmatpush3.msra.mxu0 %v2201_v49  ;;  %v2207_v45 = vld [vmem:[#allocation2 + $0xa0] sm:$0xff]  ;;  %s338_s29 = sand.u32 1, %s5261_s10  }
  0x29   : > { %3929 = vmatprep.subr.mxu0 %v2216_v51  ;;  %v2247_v46 = vld [vmem:[#allocation2 + $0x1e0] sm:$0xff] }
  0x2a   : > { %s5403_s22 = scalar_lea.vmem %s6860_s0, %s4395_s14  ;;  %3930 = vmatpush3.msra.mxu0 %v2200_v54  ;;  %v2191_v49 = vld [vmem:[#allocation2 + $0x20] sm:$0xff]  ;;  %s3570_s14 = sshll.u32 %s338_s29, 5 }
  0x2b   : > { %v370_v0 = vld [vmem:[%s5403_s22 + $0x3] sm:$0xff]  ;;  %v5407_v1 = vld [vmem:[%s5403_s22 + $0x10] sm:$0xff]  ;;  %3931 = vmatprep.subr.mxu0 %v2215_v55  ;;  %s340_s16 = scalar_lea.vmem [#allocation5], %s3570_s14 }
  0x2c   : > { %v354_v2 = vld [vmem:[%s5403_s22 + $0x1] sm:$0xff]  ;;  %v4465_v3 = vpack.i.bf16 %v370_v0, %v5407_v1  ;;  %v355_v5 = vld [vmem:[%s5403_s22 + $0x11] sm:$0xff]  ;;  %3932 = vmatpush3.msra.mxu0 %v2199_v57  ;;  %s3490_s17 = sshll.u32 %s340_s16, 4  ;;  %s6811_s17 = int_to_ptr.vmem [resolvable:$true] %s3490_s17 }
  0x2d   : > { %v386_v4 = vld [vmem:[%s5403_s22 + $0x5] sm:$0xff]  ;;  %v387_v6 = vld [vmem:[%s5403_s22 + $0x15] sm:$0xff]  ;;  %3933 = vmatprep.subr.mxu0 %v2214_v59 }
  0x2e   : > { %v4455_v7 = vpack.i.bf16 %v354_v2, %v386_v4  ;;  %v362_v8 = vld [vmem:[%s5403_s22 + $0x2] sm:$0xff]  ;;  %4466 = vrot.lane.b32.xlu1 %v4465_v3, %s5274_s21  ;;  %v4470_v10 = vpack.i.bf16 %v355_v5, %v387_v6  ;;  %v371_v12 = vld [vmem:[%s5403_s22 + $0x13] sm:$0xff]  ;;  %3934 = vmatpush3.msra.mxu0 %v2198_v61 }
  0x2f   : > { %v394_v9 = vld [vmem:[%s5403_s22 + $0x6] sm:$0xff]  ;;  %v363_v14 = vld [vmem:[%s5403_s22 + $0x12] sm:$0xff]  ;;  %3935 = vmatprep.subr.mxu0 %v2213_v62 }
  0x30   : > { %4456 = vrot.lane.b32.xlu0 %v4455_v7, %s5275_s23  ;;  %v4460_v11 = vpack.i.bf16 %v362_v8, %v394_v9  ;;  %v5420_v13 = vld [vmem:[%s5403_s22 + $0x20] sm:$0xff]  ;;  %v395_v15 = vld [vmem:[%s5403_s22 + $0x16] sm:$0xff]  ;;  %v2212_v4 = vld [vmem:[#allocation2 + $0xc8] sm:$0xff] }
  0x31   : > { %v5426_v16 = vpack.i.bf16 %v371_v12, %v5420_v13  ;;  %v364_v17 = vld [vmem:[%s5403_s22 + $0x22] sm:$0xff]  ;;  %v5433_v19 = vld [vmem:[%s5403_s22 + $0x32] sm:$0xff]  ;;  %v4475_v20 = vpack.i.bf16 %v363_v14, %v395_v15 }
  0x32   : > { %4471 = vrot.lane.b32.xlu1 %v4470_v10, %s5275_s23  ;;  %v5430_v18 = vld [vmem:[%s5403_s22 + $0x25] sm:$0xff]  ;;  %v389_v23 = vld [vmem:[%s5403_s22 + $0x35] sm:$0xff] }
  0x33   : > { %v396_v21 = vld [vmem:[%s5403_s22 + $0x26] sm:$0xff]  ;;  %v4665_v24 = vpack.i.bf16 %v5430_v18, %v5433_v19  ;;  %v5444_v25 = vld [vmem:[%s5403_s22 + $0x36] sm:$0xff] }
  0x34   : > { %4461 = vrot.lane.b32.xlu0 %v4460_v11, %s5276_s24  ;;  %v5438_v22 = vld [vmem:[%s5403_s22 + $0x21] sm:$0xff]  ;;  %v5459_v30 = vpack.i.bf16 %v364_v17, %v396_v21  ;;  %v5465_v32 = vld [vmem:[%s5403_s22 + $0x53] sm:$0xff]  ;;  %v5505_v50 = vpack.i.bf16 %v5433_v19, %v5444_v25 }
  0x35   : > { %v5447_v26 = vld [vmem:[%s5403_s22 + $0x43] sm:$0xff]  ;;  %v4485_v33 = vpack.i.bf16 %v5438_v22, %v5430_v18  ;;  %v5471_v34 = vld [vmem:[%s5403_s22 + $0x31] sm:$0xff] }
  0x36   : > { %v5450_v27 = vld [vmem:[%s5403_s22 + $0x42] sm:$0xff]  ;;  %v4770_v29 = vpack.i.bf16 %v5444_v25, %v5447_v26  ;;  %4481 = vrot.lane.b32.xlu1 %v5426_v16, %s5274_s21  ;;  %v5477_v36 = vld [vmem:[%s5403_s22 + $0x52] sm:$0xff]  ;;  %v4500_v41 = vpack.i.bf16 %v5471_v34, %v389_v23 }
  0x37   : > { %v5453_v28 = vpack.i.bf16 %v389_v23, %v5450_v27  ;;  %v5462_v31 = vld [vmem:[%s5403_s22 + $0x46] sm:$0xff]  ;;  %v5483_v39 = vld [vmem:[%s5403_s22 + $0x30] sm:$0xff]  ;;  %v2250_v5 = vld [vmem:[#allocation2 + $0x1f8] sm:$0xff] }
  0x38   : > { %4476 = vrot.lane.b32.xlu0 %v4475_v20, %s5276_s24  ;;  %v5474_v35 = vld [vmem:[%s5403_s22 + $0x45] sm:$0xff]  ;;  %v4800_v37 = vpack.i.bf16 %v5462_v31, %v5465_v32  ;;  %v373_v43 = vld [vmem:[%s5403_s22 + $0x33] sm:$0xff]  ;;  %3981 = vmatprep.subr.mxu1 %v2250_v5  ;;  %v5540_v14 = vpack.i.bf16 %v5450_v27, %v5462_v31 }
  0x39   : > { %v372_v38 = vld [vmem:[%s5403_s22 + $0x23] sm:$0xff]  ;;  %v5487_v40 = vpack.i.bf16 %v5474_v35, %v5477_v36  ;;  %v5508_v52 = vld [vmem:[%s5403_s22 + $0x56] sm:$0xff] }
  0x3a   : > { %4491 = vrot.lane.b32.xlu1 %v5459_v30, %s5276_s24  ;;  %v5494_v42 = vpack.i.bf16 %v372_v38, %v5483_v39  ;;  %v3575_v44 = vld [vmem:[%s5403_s22 + $0x40] sm:$0xff]  ;;  %v5520_v58 = vld [vmem:[%s5403_s22 + $0x14] sm:$0xff]  ;;  %v2196_v6 = vld [vmem:[#allocation2 + $0x48] sm:$0xff] }
  0x3b   : > { %v5499_v48 = vpack.i.bf16 %v373_v43, %v3575_v44  ;;  %v5511_v53 = vld [vmem:[%s5403_s22 + $0x63] sm:$0xff]  ;;  %v4530_v63 = vpack.i.bf16 %v5520_v58, %v5438_v22  ;;  %v2197_v0 = vld [vmem:[#allocation2 + $0x50] sm:$0xff]  ;;  %v2234_v7 = vld [vmem:[#allocation2 + $0x178] sm:$0xff] }
  0x3c   : > { %4486 = vrot.lane.b32.xlu0 %v4485_v33, %s5275_s23  ;;  %v4830_v56 = vpack.i.bf16 %v5508_v52, %v5511_v53  ;;  %v5523_v60 = vld [vmem:[%s5403_s22 + $0x41] sm:$0xff]  ;;  %v3576_v3 = vld [vmem:[%s5403_s22 + $0x50] sm:$0xff]  ;;  %3936 = vmatpush3.msra.mxu0 %v2197_v0  ;;  %v2210_v15 = vld [vmem:[#allocation2 + $0xb8] sm:$0xff]  ;;  %v5582_v0 = vpack.i.bf16 %v5477_v36, %v5508_v52 }
  0x3d   : > { %v4525_v2 = vpack.i.bf16 %v5523_v60, %v5474_v35  ;;  %v2211_v8 = vld [vmem:[#allocation2 + $0xc0] sm:$0xff]  ;;  %3982 = vmatpush3.msra.mxu1 %v2234_v7  ;;  %v2249_v9 = vld [vmem:[#allocation2 + $0x1f0] sm:$0xff]  ;;  %v5535_v10 = vpack.i.bf16 %v5447_v26, %v3576_v3  ;;  %3937 = vmatprep.subr.mxu0 %v2212_v4  ;;  %v2248_v22 = vld [vmem:[#allocation2 + $0x1e8] sm:$0xff] }
  0x3e   : > { %4501 = vrot.lane.b32.xlu1 %v4500_v41, %s5275_s23  ;;  %v2195_v11 = vld [vmem:[#allocation2 + $0x40] sm:$0xff]  ;;  %v2233_v12 = vld [vmem:[#allocation2 + $0x170] sm:$0xff]  ;;  %3938 = vmatpush3.msra.mxu0 %v2196_v6  ;;  %v2232_v33 = vld [vmem:[#allocation2 + $0x168] sm:$0xff] }
  0x3f   : > { %v5546_v17 = vld [vmem:[%s5403_s22 + $0x73] sm:$0xff]  ;;  %3939 = vmatprep.subr.mxu0 %v2211_v8  ;;  %3983 = vmatprep.subr.mxu1 %v2249_v9  ;;  %v5555_v35 = vld [vmem:[%s5403_s22 + $0x24] sm:$0xff] }
  0x40   : > { %4496 = vrot.lane.b32.xlu0 %v5494_v42, %s5274_s21  ;;  %3940 = vmatpush3.msra.mxu0 %v2195_v11  ;;  %v2209_v21 = vld [vmem:[#allocation2 + $0xb0] sm:$0xff]  ;;  %v2208_v38 = vld [vmem:[#allocation2 + $0xa8] sm:$0xff]  ;;  %v5567_v47 = vpack.i.bf16 %v5555_v35, %v5471_v34  ;;  %v2231_v51 = vld [vmem:[#allocation2 + $0x160] sm:$0xff] }
  0x41   : > { %3984 = vmatpush3.msra.mxu1 %v2233_v12  ;;  %3941 = vmatprep.subr.mxu0 %v2210_v15  ;;  %v2193_v27 = vld [vmem:[#allocation2 + $0x30] sm:$0xff]  ;;  %v2192_v44 = vld [vmem:[#allocation2 + $0x28] sm:$0xff]  ;;  %v3577_v55 = vld [vmem:[%s5403_s22 + $0x60] sm:$0xff] }
  0x42   : > { %4511 = vrot.lane.b32.xlu1 %v5499_v48, %s5274_s21  ;;  %v5558_v41 = vld [vmem:[%s5403_s22 + $0x51] sm:$0xff]  ;;  %3985 = vmatprep.subr.mxu1 %v2248_v22  ;;  %v5577_v62 = vpack.i.bf16 %v5465_v32, %v3577_v55  ;;  %v2188_v3 = vld [vmem:[#allocation2 + $0x8] sm:$0xff]  ;;  %v2203_v4 = vld [vmem:[#allocation2 + $0x80] sm:$0xff] }
  0x43   : > { %v5561_v43 = vld [vmem:[%s5403_s22 + $0x55] sm:$0xff]  ;;  %3986 = vmatpush3.msra.mxu1 %v2232_v33  ;;  %v2187_v6 = vld [vmem:[#allocation2] sm:$0xff]  ;;  %v2244_v8 = vld [vmem:[#allocation2 + $0x1c8] sm:$0xff] }
  0x44   : > { %4506 = vrot.lane.b32.xlu0 %v5505_v50, %s5276_s24  ;;  %v4555_v54 = vpack.i.bf16 %v5558_v41, %v5561_v43  ;;  %v2206_v57 = vld [vmem:[#allocation2 + $0x98] sm:$0xff]  ;;  %3987 = vmatprep.subr.mxu1 %v2247_v46  ;;  %v2205_v61 = vld [vmem:[#allocation2 + $0x90] sm:$0xff]  ;;  %v5592_v9 = vld [vmem:[%s5403_s22 + $0x61] sm:$0xff] }
  0x45   : > { %v2190_v59 = vld [vmem:[#allocation2 + $0x18] sm:$0xff]  ;;  %3988 = vmatpush3.msra.mxu1 %v2231_v51  ;;  %v2245_v5 = vld [vmem:[#allocation2 + $0x1d0] sm:$0xff]  ;;  %v5595_v11 = vld [vmem:[%s5403_s22 + $0x65] sm:$0xff] }
  0x46   : > { %4521 = vrot.lane.b32.xlu1 %v5426_v16, %s5276_s24  ;;  %v5543_v16 = vld [vmem:[%s5403_s22 + $0x66] sm:$0xff]  ;;  %v2246_v34 = vld [vmem:[#allocation2 + $0x1d8] sm:$0xff]  ;;  %v2229_v7 = vld [vmem:[#allocation2 + $0x150] sm:$0xff] }
  0x47   : > { %v4860_v23 = vpack.i.bf16 %v5543_v16, %v5546_v17  ;;  %3989 = vmatprep.subr.mxu1 %v2246_v34  ;;  %v5589_v36 = vld [vmem:[%s5403_s22 + $0x34] sm:$0xff]  ;;  %v2228_v12 = vld [vmem:[#allocation2 + $0x148] sm:$0xff]  ;;  %v2243_v15 = vld [vmem:[#allocation2 + $0x1c0] sm:$0xff] }
  0x48   : > { %4516 = vrot.lane.b32.xlu0 %v4475_v20, %s5275_s23  ;;  %v2194_v20 = vld [vmem:[#allocation2 + $0x38] sm:$0xff]  ;;  %v2227_v22 = vld [vmem:[#allocation2 + $0x140] sm:$0xff]  ;;  %v3578_v33 = vld [vmem:[%s5403_s22 + $0x70] sm:$0xff] }
  0x49   : > { %3942 = vmatpush3.msra.mxu0 %v2194_v20  ;;  %v2282_v20 = vld [vmem:[#allocation2 + $0x2f8] sm:$0xff]  ;;  %v2241_v46 = vld [vmem:[#allocation2 + $0x1b0] sm:$0xff]  ;;  %v2240_v51 = vld [vmem:[#allocation2 + $0x1a8] sm:$0xff] }
  0x4a   : > { %4531 = vrot.lane.b32.xlu1 %v4530_v63, %s5274_s21  ;;  %3943 = vmatprep.subr.mxu0 %v2209_v21  ;;  %v2230_v63 = vld [vmem:[#allocation2 + $0x158] sm:$0xff]  ;;  %v5601_v21 = vpack.i.bf16 %v5589_v36, %v5523_v60  ;;  %v5614_v60 = vpack.i.bf16 %v5511_v53, %v3578_v33  ;;  %v2239_v55 = vld [vmem:[#allocation2 + $0x1a0] sm:$0xff] }
  0x4b   : > { %3944 = vmatpush3.msra.mxu0 %v2193_v27  ;;  %3990 = vmatpush3.msra.mxu1 %v2230_v63  ;;  %v4585_v27 = vpack.i.bf16 %v5592_v9, %v5595_v11  ;;  %v361_v34 = vld [vmem:[%s5403_s22 + $0x71] sm:$0xff]  ;;  %v3642_v18 = vld [vmem:[%s5403_s22 + $0x81] sm:$0xff] }
  0x4c   : > { %4526 = vrot.lane.b32.xlu0 %v4525_v2, %s5275_s23  ;;  %3945 = vmatprep.subr.mxu0 %v2208_v38  ;;  %v2204_v2 = vld [vmem:[#allocation2 + $0x88] sm:$0xff]  ;;  %v2242_v38 = vld [vmem:[#allocation2 + $0x1b8] sm:$0xff] }
  0x4d   : > { %3946 = vmatpush3.msra.mxu0 %v2192_v44  ;;  %3991 = vmatprep.subr.mxu1 %v2245_v5  ;;  %v5609_v44 = vld [vmem:[%s5403_s22 + $0x62] sm:$0xff]  ;;  %v2222_v63 = vld [vmem:[#allocation2 + $0x118] sm:$0xff] }
  0x4e   : > { %4541 = vrot.lane.b32.xlu1 %v5535_v10, %s5274_s21  ;;  %3947 = vmatprep.subr.mxu0 %v2207_v45  ;;  %v2226_v45 = vld [vmem:[#allocation2 + $0x138] sm:$0xff] }
  0x4f   : > { %3948 = vmatpush3.msra.mxu0 %v2191_v49  ;;  %3992 = vmatpush3.msra.mxu1 %v2229_v7  ;;  %v4595_v49 = vpack.i.bf16 %v5609_v44, %v5543_v16  ;;  %v2236_v7 = vld [vmem:[#allocation2 + $0x188] sm:$0xff] }
  0x50   : > { %4536 = vrot.lane.b32.xlu0 %v5540_v14, %s5276_s24  ;;  %3949 = vmatprep.subr.mxu0 %v2206_v57  ;;  %v2223_v57 = vld [vmem:[#allocation2 + $0x120] sm:$0xff] }
  0x51   : > { %3950 = vmatpush3.msra.mxu0 %v2190_v59  ;;  %3993 = vmatprep.subr.mxu1 %v2244_v8  ;;  %v5623_v59 = vld [vmem:[%s5403_s22 + $0x44] sm:$0xff]  ;;  %v5640_v8 = vld [vmem:[%s5403_s22 + $0x72] sm:$0xff] }
  0x52   : > { %4551 = vrot.lane.b32.xlu1 %v5494_v42, %s5276_s24  ;;  %3951 = vmatprep.subr.mxu0 %v2205_v61  ;;  %v2238_v61 = vld [vmem:[#allocation2 + $0x198] sm:$0xff] }
  0x53   : > { %3994 = vmatpush3.msra.mxu1 %v2228_v12  ;;  %v401_v12 = vld [vmem:[%s5403_s22 + $0x76] sm:$0xff] }
  0x54   : > { %4546 = vrot.lane.b32.xlu0 %v5459_v30, %s5275_s23  ;;  %v2189_v30 = vld [vmem:[#allocation2 + $0x10] sm:$0xff]  ;;  %3995 = vmatprep.subr.mxu1 %v2243_v15  ;;  %v2220_v15 = vld [vmem:[#allocation2 + $0x108] sm:$0xff] }
  0x55   : > { %3952 = vmatpush3.msra.mxu0 %v2189_v30  ;;  %3996 = vmatpush3.msra.mxu1 %v2227_v22  ;;  %v5627_v30 = vld [vmem:[%s5403_s22 + $0x75] sm:$0xff]  ;;  %v4625_v22 = vpack.i.bf16 %v5640_v8, %v401_v12 }
  0x56   : > { %4561 = vrot.lane.b32.xlu1 %v5567_v47, %s5274_s21  ;;  %3953 = vmatprep.subr.mxu0 %v2204_v2  ;;  %v2237_v2 = vld [vmem:[#allocation2 + $0x190] sm:$0xff]  ;;  %v4615_v5 = vpack.i.bf16 %v361_v34, %v5627_v30 }
  0x57   : > { %3954 = vmatpush3.msra.mxu0 %v2188_v3  ;;  %3997 = vmatprep.subr.mxu1 %v2242_v38  ;;  %v5633_v3 = vpack.i.bf16 %v5623_v59, %v5558_v41  ;;  %v5672_v38 = vld [vmem:[%s5403_s22 + $0x64] sm:$0xff] }
  0x58   : > { %4556 = vrot.lane.b32.xlu0 %v4555_v54, %s5275_s23  ;;  %3955 = vmatprep.subr.mxu0 %v2203_v4  ;;  %v2224_v54 = vld [vmem:[#allocation2 + $0x128] sm:$0xff]  ;;  %v2221_v4 = vld [vmem:[#allocation2 + $0x110] sm:$0xff] }
  0x59   : > { %3956 = vmatpush3.msra.mxu0 %v2187_v6  ;;  %3998 = vmatpush3.msra.mxu1 %v2226_v45  ;;  %v3579_v6 = vld [vmem:[%s5403_s22 + $0x80] sm:$0xff] }
  0x5a   : > { %4571 = vrot.lane.b32.xlu1 %v5577_v62, %s5274_s21  ;;  %4037 = vmatprep.subr.mxu0 %v2282_v20  ;;  %v2235_v20 = vld [vmem:[#allocation2 + $0x180] sm:$0xff]  ;;  %v5646_v41 = vpack.i.bf16 %v5546_v17, %v3579_v6 }
  0x5b   : > { %3999 = vmatprep.subr.mxu1 %v2241_v46  ;;  %v5711_v45 = vld [vmem:[%s5403_s22 + $0x83] sm:$0xff]  ;;  %v3635_v46 = vld [vmem:[%s5403_s22 + $0x90] sm:$0xff] }
  0x5c   : > { %4566 = vrot.lane.b32.xlu0 %v5582_v0, %s5276_s24 }
  0x5e   : > { %4581 = vrot.lane.b32.xlu1 %v5499_v48, %s5276_s24 }
  0x60   : > { %4576 = vrot.lane.b32.xlu0 %v5505_v50, %s5275_s23  ;;  %v2225_v50 = vld [vmem:[#allocation2 + $0x130] sm:$0xff] }
  0x61   : > { %4000 = vmatpush3.msra.mxu1 %v2225_v50  ;;  %v5716_v50 = vpack.i.bf16 %v5711_v45, %v3635_v46 }
  0x62   : > { %4591 = vrot.lane.b32.xlu1 %v5601_v21, %s5274_s21  ;;  %4001 = vmatprep.subr.mxu1 %v2240_v51 }
  0x63   : > { %4002 = vmatpush3.msra.mxu1 %v2224_v54  ;;  %v5732_v54 = vpack.i.bf16 %v5561_v43, %v5609_v44 }
  0x64   : > { %4586 = vrot.lane.b32.xlu0 %v4585_v27, %s5275_s23  ;;  %4003 = vmatprep.subr.mxu1 %v2239_v55  ;;  %v5654_v27 = vld [vmem:[%s5403_s22 + $0x54] sm:$0xff] }
  0x65   : > { %4004 = vmatpush3.msra.mxu1 %v2223_v57  ;;  %v5662_v33 = vpack.i.bf16 %v5654_v27, %v5592_v9 }
  0x66   : > { %4601 = vrot.lane.b32.xlu1 %v5614_v60, %s5274_s21  ;;  %4005 = vmatprep.subr.mxu1 %v2238_v61 }
  0x67   : > { %4006 = vmatpush3.msra.mxu1 %v2222_v63 }
  0x68   : > { %4596 = vrot.lane.b32.xlu0 %v4595_v49, %s5276_s24  ;;  %4007 = vmatprep.subr.mxu1 %v2237_v2  ;;  %v378_v2 = vld [vmem:[%s5403_s22 + $0x4] sm:$0xff] }
  0x69   : > { %4008 = vmatpush3.msra.mxu1 %v2221_v4 }
  0x6a   : > { %4611 = vrot.lane.b32.xlu1 %v5535_v10, %s5276_s24  ;;  %4009 = vmatprep.subr.mxu1 %v2236_v7 }
  0x6b   : > { %4010 = vmatpush3.msra.mxu1 %v2220_v15 }
  0x6c   : > { %4606 = vrot.lane.b32.xlu0 %v5540_v14, %s5275_s23  ;;  %v2219_v14 = vld [vmem:[#allocation2 + $0x100] sm:$0xff]  ;;  %4011 = vmatprep.subr.mxu1 %v2235_v20 }
  0x6d   : > { %4012 = vmatpush3.msra.mxu1 %v2219_v14 }
  0x6e   : > { %4621 = vrot.lane.b32.xlu1 %v5633_v3, %s5274_s21 }
  0x70   : > { %4616 = vrot.lane.b32.xlu0 %v4615_v5, %s5275_s23 }
  0x72   : > { %4631 = vrot.lane.b32.xlu1 %v5646_v41, %s5274_s21 }
  0x74   : > { %4626 = vrot.lane.b32.xlu0 %v4625_v22, %s5276_s24 }
  0x76   : > { %4641 = vrot.lane.b32.xlu1 %v5577_v62, %s5276_s24 }
  0x78   : > { %4636 = vrot.lane.b32.xlu0 %v5582_v0, %s5275_s23  ;;  %v2314_v0 = vld [vmem:[#allocation2 + $0x3f8] sm:$0xff] }
  0x79   : > { %4093 = vmatprep.subr.mxu1 %v2314_v0 }
  0x7a   : > { %4651 = vrot.lane.b32.xlu1 %v5494_v42, %s5275_s23  ;;  %v5681_v42 = vpack.i.bf16 %v5672_v38, %v361_v34 }
  0x7c   : > { %4646 = vrot.lane.b32.xlu0 %v5662_v33, %s5274_s21 }
  0x7e   : > { %4661 = vrot.lane.b32.xlu1 %v4595_v49, %s5275_s23  ;;  %v3611_v49 = vld [vmem:[%s5403_s22 + $0x84] sm:$0xff] }
  0x80   : > { %4656 = vrot.lane.b32.xlu0 %v5567_v47, %s5276_s24  ;;  %v3610_v47 = vld [vmem:[%s5403_s22 + $0x74] sm:$0xff] }
  0x81   : > { %v5696_v19 = vpack.i.bf16 %v3610_v47, %v3642_v18 }
  0x82   : > { %4671 = vrot.lane.b32.xlu1 %v5614_v60, %s5276_s24 }
  0x84   : > { %4666 = vrot.lane.b32.xlu0 %v4665_v24, %s5274_s21  ;;  %v5699_v24 = vld [vmem:[%s5403_s22 + $0x82] sm:$0xff] }
  0x86   : > { %4681 = vrot.lane.b32.xlu1 %v5499_v48, %s5275_s23  ;;  %v5702_v48 = vld [vmem:[%s5403_s22 + $0x86] sm:$0xff] }
  0x87   : > { %v4720_v9 = vpack.i.bf16 %v5699_v24, %v5702_v48 }
  0x88   : > { %4676 = vrot.lane.b32.xlu0 %v5681_v42, %s5274_s21 }
  0x8a   : > { %4691 = vrot.lane.b32.xlu1 %v4625_v22, %s5275_s23 }
  0x8c   : > { %4686 = vrot.lane.b32.xlu0 %v5601_v21, %s5276_s24 }
  0x8e   : > { %4701 = vrot.lane.b32.xlu1 %v5646_v41, %s5276_s24 }
  0x90   : > { %4696 = vrot.lane.b32.xlu0 %v5453_v28, %s5274_s21 }
  0x92   : > { %4711 = vrot.lane.b32.xlu1 %v5535_v10, %s5275_s23  ;;  %v3643_v10 = vld [vmem:[%s5403_s22 + $0x91] sm:$0xff] }
  0x93   : > { %v5726_v51 = vpack.i.bf16 %v3611_v49, %v3643_v10  ;;  %v2266_v49 = vld [vmem:[#allocation2 + $0x278] sm:$0xff] }
  0x94   : > { %4706 = vrot.lane.b32.xlu0 %v5696_v19, %s5274_s21 }
  0x96   : > { %4721 = vrot.lane.b32.xlu1 %v4720_v9, %s5275_s23 }
  0x98   : > { %4716 = vrot.lane.b32.xlu0 %v5633_v3, %s5276_s24 }
  0x9a   : > { %4731 = vrot.lane.b32.xlu1 %v5716_v50, %s5276_s24 }
  0x9c   : > { %4726 = vrot.lane.b32.xlu0 %v5487_v40, %s5274_s21 }
  0x9e   : > { %4741 = vrot.lane.b32.xlu1 %v5577_v62, %s5275_s23  ;;  %v346_v62 = vld [vmem:[%s5403_s22] sm:$0xff] }
  0xa0   : > { %4736 = vrot.lane.b32.xlu0 %v5726_v51, %s5274_s21  ;;  %v4467_v55 = vpop.permute.xlu1 %4466 }
  0xa1   : > { %v4469_v43 = vunpack.i.h.bf16 %v4467_v55  ;;  %v4468_v44 = vunpack.i.l.bf16 %v4467_v55 }
  0xa2   : > { %v4457_v57 = vpop.permute.xlu0 %4456  ;;  %4751 = vrot.lane.b32.xlu1 %v5732_v54, %s5274_s21 }
  0xa3   : > { %v4459_v61 = vunpack.i.h.bf16 %v4457_v57  ;;  %v4458_v34 = vunpack.i.l.bf16 %v4457_v57  ;;  %v2281_v57 = vld [vmem:[#allocation2 + $0x2f0] sm:$0xff] }
  0xa4   : > { %4746 = vrot.lane.b32.xlu0 %v5662_v33, %s5276_s24  ;;  %v4472_v63 = vpop.permute.xlu1 %4471 }
  0xa5   : > { %v4474_v7 = vunpack.i.h.bf16 %v4472_v63  ;;  %v4473_v12 = vunpack.i.l.bf16 %v4472_v63  ;;  %v1155_v15 = vsel %vm1128_vm0, %v378_v2, %v4458_v34  ;;  %v1129_v20 = vsel %vm1128_vm0, %v346_v62, %v4459_v61 }
  0xa6   : > { %v4462_v4 = vpop.permute.xlu0 %4461  ;;  %4761 = vrot.lane.b32.xlu1 %v5453_v28, %s5276_s24 }
  0xa7   : > { %v4464_v5 = vunpack.i.h.bf16 %v4462_v4  ;;  %v4463_v6 = vunpack.i.l.bf16 %v4462_v4  ;;  %v1156_v61 = vsel %vm1128_vm0, %v5520_v58, %v4473_v12  ;;  %v1130_v34 = vsel %vm1128_vm0, %v5407_v1, %v4474_v7  ;;  %v2280_v1 = vld [vmem:[#allocation2 + $0x2e8] sm:$0xff]  ;;  %v2279_v7 = vld [vmem:[#allocation2 + $0x2e0] sm:$0xff] }
  0xa8   : > { %4756 = vrot.lane.b32.xlu0 %v5601_v21, %s5275_s23  ;;  %v4482_v14 = vpop.permute.xlu1 %4481  ;;  %v5758_v21 = vpack.i.bf16 %v5595_v11, %v5640_v8 }
  0xa9   : > { %v1163_v22 = vsel %vm1137_vm1, %v1155_v15, %v4463_v6  ;;  %v1138_v0 = vsel %vm1137_vm1, %v1129_v20, %v4464_v5  ;;  %v4484_v47 = vunpack.i.h.bf16 %v4482_v14  ;;  %v4483_v18 = vunpack.i.l.bf16 %v4482_v14  ;;  %v2263_v15 = vld [vmem:[#allocation2 + $0x260] sm:$0xff] }
  0xaa   : > { %v4477_v9 = vpop.permute.xlu0 %4476  ;;  %v1171_v46 = vsel %vm1146_vm2, %v1163_v22, %v4468_v44  ;;  %v1147_v28 = vsel %vm1146_vm2, %v1138_v0, %v4469_v43  ;;  %4771 = vrot.lane.b32.xlu1 %v4770_v29, %s5274_s21  ;;  %v2264_v43 = vld [vmem:[#allocation2 + $0x268] sm:$0xff]  ;;  %v2278_v22 = vld [vmem:[#allocation2 + $0x2d8] sm:$0xff] }
  0xab   : > { %v4479_v10 = vunpack.i.h.bf16 %v4477_v9  ;;  %v4478_v55 = vunpack.i.l.bf16 %v4477_v9  ;;  %2471 = vmatprep.mubr.f32.mxu0 %v1171_v46 }
  0xac   : > { %4766 = vrot.lane.b32.xlu0 %v5614_v60, %s5275_s23  ;;  %2472 = vmatmul.mubr.f32.vlgmr.msra.gmra.mxu0 %v1147_v28  ;;  %v4492_v63 = vpop.permute.xlu1 %4491  ;;  %v2265_v60 = vld [vmem:[#allocation2 + $0x270] sm:$0xff]  ;;  %v2262_v28 = vld [vmem:[#allocation2 + $0x258] sm:$0xff] }
  0xad   : > { %v1164_v2 = vsel %vm1137_vm1, %v1156_v61, %v4478_v55  ;;  %v1139_v25 = vsel %vm1137_vm1, %v1130_v34, %v4479_v10  ;;  %4038 = vmatpush3.msra.mxu0 %v2266_v49  ;;  %v4494_v58 = vunpack.i.h.bf16 %v4492_v63  ;;  %v4493_v4 = vunpack.i.l.bf16 %v4492_v63  ;;  %v2277_v55 = vld [vmem:[#allocation2 + $0x2d0] sm:$0xff] }
  0xae   : > { %v4487_v26 = vpop.permute.xlu0 %4486  ;;  %v1172_v29 = vsel %vm1146_vm2, %v1164_v2, %v4483_v18  ;;  %v1148_v11 = vsel %vm1146_vm2, %v1139_v25, %v4484_v47  ;;  %4039 = vmatprep.subr.mxu0 %v2281_v57  ;;  %4781 = vrot.lane.b32.xlu1 %v5758_v21, %s5274_s21  ;;  %v5792_v61 = vpack.i.bf16 %v5627_v30, %v5699_v24  ;;  %v2261_v34 = vld [vmem:[#allocation2 + $0x250] sm:$0xff] }
  0xaf   : > { %v4489_v8 = vunpack.i.h.bf16 %v4487_v26  ;;  %v4488_v62 = vunpack.i.l.bf16 %v4487_v26  ;;  %2476 = vmatprep.mubr.f32.mxu0 %v1172_v29  ;;  %4040 = vmatpush3.msra.mxu0 %v2265_v60  ;;  %v3612_v26 = vld [vmem:[%s5403_s22 + $0x15] sm:$0xff]  ;;  %v2276_v29 = vld [vmem:[#allocation2 + $0x2c8] sm:$0xff] }
  0xb0   : > { %4776 = vrot.lane.b32.xlu0 %v5681_v42, %s5276_s24  ;;  %2477 = vmatmul.mubr.f32.gmra.mxu0 %v1148_v11  ;;  %v4502_v44 = vpop.permute.xlu1 %4501 }
  0xb1   : > { %v1157_v5 = vsel %vm1128_vm0, %v5555_v35, %v4488_v62  ;;  %v1131_v6 = vsel %vm1128_vm0, %v5420_v13, %v4489_v8  ;;  %4041 = vmatprep.subr.mxu0 %v2280_v1  ;;  %v4504_v0 = vunpack.i.h.bf16 %v4502_v44  ;;  %v4503_v47 = vunpack.i.l.bf16 %v4502_v44  ;;  %v2260_v8 = vld [vmem:[#allocation2 + $0x248] sm:$0xff]  ;;  %v2275_v62 = vld [vmem:[#allocation2 + $0x2c0] sm:$0xff] }
  0xb2   : > { %v4497_v12 = vpop.permute.xlu0 %4496  ;;  %4791 = vrot.lane.b32.xlu1 %v5487_v40, %s5276_s24  ;;  %4042 = vmatpush3.msra.mxu0 %v2264_v43  ;;  %v1165_v35 = vsel %vm1137_vm1, %v1157_v5, %v4493_v4  ;;  %v1140_v13 = vsel %vm1137_vm1, %v1131_v6, %v4494_v58  ;;  %v2259_v43 = vld [vmem:[#allocation2 + $0x240] sm:$0xff] }
  0xb3   : > { %v4499_v20 = vunpack.i.h.bf16 %v4497_v12  ;;  %v4498_v14 = vunpack.i.l.bf16 %v4497_v12  ;;  %4043 = vmatprep.subr.mxu0 %v2279_v7  ;;  %v1158_v63 = vsel %vm1128_vm0, %v5589_v36, %v4503_v47  ;;  %v1132_v2 = vsel %vm1128_vm0, %v5483_v39, %v4504_v0  ;;  %v2274_v7 = vld [vmem:[#allocation2 + $0x2b8] sm:$0xff] }
  0xb4   : > { %4786 = vrot.lane.b32.xlu0 %v5633_v3, %s5275_s23  ;;  %v4512_v18 = vpop.permute.xlu1 %4511  ;;  %4044 = vmatpush3.msra.mxu0 %v2263_v15 }
  0xb5   : > { %v1173_v9 = vsel %vm1146_vm2, %v1165_v35, %v4498_v14  ;;  %v1149_v46 = vsel %vm1146_vm2, %v1140_v13, %v4499_v20  ;;  %v4514_v40 = vunpack.i.h.bf16 %v4512_v18  ;;  %v4513_v49 = vunpack.i.l.bf16 %v4512_v18  ;;  %4045 = vmatprep.subr.mxu0 %v2278_v22  ;;  %v2258_v20 = vld [vmem:[#allocation2 + $0x238] sm:$0xff]  ;;  %v5821_v35 = vld [vmem:[%s5403_s22 + $0x85] sm:$0xff] }
  0xb6   : > { %v4507_v10 = vpop.permute.xlu0 %4506  ;;  %2481 = vmatprep.mubr.f32.mxu0 %v1173_v9  ;;  %4801 = vrot.lane.b32.xlu1 %v4800_v37, %s5274_s21  ;;  %v3706_v13 = vld [vmem:[%s5403_s22 + $0x92] sm:$0xff]  ;;  %v350_v9 = vld [vmem:[%s5403_s22 + $0x40] sm:$0xff] }
  0xb7   : > { %v4509_v57 = vunpack.i.h.bf16 %v4507_v10  ;;  %v4508_v3 = vunpack.i.l.bf16 %v4507_v10  ;;  %2482 = vmatmul.mubr.f32.gmra.mxu0 %v1149_v46  ;;  %v2257_v46 = vld [vmem:[#allocation2 + $0x230] sm:$0xff]  ;;  %v2298_v10 = vld [vmem:[#allocation2 + $0x378] sm:$0xff] }
  0xb8   : > { %4796 = vrot.lane.b32.xlu0 %v5646_v41, %s5275_s23  ;;  %4046 = vmatpush3.msra.mxu0 %v2262_v28  ;;  %v4522_v25 = vpop.permute.xlu1 %4521  ;;  %v3580_v41 = vld [vmem:[%s5403_s22 + $0x11] sm:$0xff] }
  0xb9   : > { %v1166_v31 = vsel %vm1137_vm1, %v1158_v63, %v4508_v3  ;;  %v1141_v32 = vsel %vm1137_vm1, %v1132_v2, %v4509_v57  ;;  %4047 = vmatprep.subr.mxu0 %v2277_v55  ;;  %v4524_v36 = vunpack.i.h.bf16 %v4522_v25  ;;  %v4523_v11 = vunpack.i.l.bf16 %v4522_v25  ;;  %v2313_v63 = vld [vmem:[#allocation2 + $0x3f0] sm:$0xff] }
  0xba   : > { %v4517_v37 = vpop.permute.xlu0 %4516  ;;  %v1174_v30 = vsel %vm1146_vm2, %v1166_v31, %v4513_v49  ;;  %v1150_v24 = vsel %vm1146_vm2, %v1141_v32, %v4514_v40  ;;  %4048 = vmatpush3.msra.mxu0 %v2261_v34  ;;  %4811 = vrot.lane.b32.xlu1 %v5792_v61, %s5274_s21  ;;  %v5830_v3 = vpack.i.bf16 %v5821_v35, %v3706_v13  ;;  %v2256_v34 = vld [vmem:[#allocation2 + $0x228] sm:$0xff] }
  0xbb   : > { %v4519_v60 = vunpack.i.h.bf16 %v4517_v37  ;;  %v4518_v39 = vunpack.i.l.bf16 %v4517_v37  ;;  %2486 = vmatprep.mubr.f32.mxu0 %v1174_v30  ;;  %4049 = vmatprep.subr.mxu0 %v2276_v29 }
  0xbc   : > { %4806 = vrot.lane.b32.xlu0 %v5696_v19, %s5276_s24  ;;  %2487 = vmatmul.mubr.f32.gmra.mxu0 %v1150_v24  ;;  %v4532_v1 = vpop.permute.xlu1 %4531  ;;  %v2297_v24 = vld [vmem:[#allocation2 + $0x370] sm:$0xff] }
  0xbd   : > { %v1203_v58 = vsel %vm1128_vm0, %v3612_v26, %v4518_v39  ;;  %v1179_v4 = vsel %vm1128_vm0, %v3580_v41, %v4519_v60  ;;  %v4534_v44 = vunpack.i.h.bf16 %v4532_v1  ;;  %v4533_v5 = vunpack.i.l.bf16 %v4532_v1  ;;  %4050 = vmatpush3.msra.mxu0 %v2260_v8  ;;  %v2312_v60 = vld [vmem:[#allocation2 + $0x3e8] sm:$0xff]  ;;  %v5848_v39 = vld [vmem:[%s5403_s22 + $0x93] sm:$0xff]  ;;  %v5851_v8 = vld [vmem:[%s5403_s22 + $0xa0] sm:$0xff] }
  0xbe   : > { %v4527_v6 = vpop.permute.xlu0 %4526  ;;  %4821 = vrot.lane.b32.xlu1 %v5732_v54, %s5276_s24  ;;  %v1211_v12 = vsel %vm1137_vm1, %v1203_v58, %v4523_v11  ;;  %v1187_v15 = vsel %vm1137_vm1, %v1179_v4, %v4524_v36  ;;  %4051 = vmatprep.subr.mxu0 %v2275_v62  ;;  %v2273_v54 = vld [vmem:[#allocation2 + $0x2b0] sm:$0xff]  ;;  %v2255_v11 = vld [vmem:[#allocation2 + $0x220] sm:$0xff]  ;;  %v2270_v62 = vld [vmem:[#allocation2 + $0x298] sm:$0xff] }
  0xbf   : > { %v4529_v14 = vunpack.i.h.bf16 %v4527_v6  ;;  %v4528_v22 = vunpack.i.l.bf16 %v4527_v6  ;;  %v1219_v0 = vsel %vm1146_vm2, %v1211_v12, %v4533_v5  ;;  %v1195_v47 = vsel %vm1146_vm2, %v1187_v15, %v4534_v44  ;;  %4052 = vmatpush3.msra.mxu0 %v2259_v43  ;;  %v2254_v43 = vld [vmem:[#allocation2 + $0x218] sm:$0xff] }
  0xc0   : > { %4816 = vrot.lane.b32.xlu0 %v5662_v33, %s5275_s23  ;;  %v4542_v18 = vpop.permute.xlu1 %4541  ;;  %2576 = vmatprep.mubr.f32.mxu1 %v1219_v0  ;;  %v2272_v33 = vld [vmem:[#allocation2 + $0x2a8] sm:$0xff] }
  0xc1   : > { %4053 = vmatprep.subr.mxu0 %v2274_v7  ;;  %v4544_v28 = vunpack.i.h.bf16 %v4542_v18  ;;  %v4543_v40 = vunpack.i.l.bf16 %v4542_v18  ;;  %2577 = vmatmul.mubr.f32.vlgmr.msra.gmra.mxu1 %v1195_v47  ;;  %v1159_v2 = vsel %vm1128_vm0, %v5623_v59, %v4528_v22  ;;  %v1133_v25 = vsel %vm1128_vm0, %v350_v9, %v4529_v14  ;;  %v2271_v59 = vld [vmem:[#allocation2 + $0x2a0] sm:$0xff]  ;;  %v2269_v7 = vld [vmem:[#allocation2 + $0x290] sm:$0xff]  ;;  %v2268_v9 = vld [vmem:[#allocation2 + $0x288] sm:$0xff] }
  0xc2   : > { %v4537_v49 = vpop.permute.xlu0 %4536  ;;  %4054 = vmatpush3.msra.mxu0 %v2258_v20  ;;  %4831 = vrot.lane.b32.xlu1 %v4830_v56, %s5274_s21  ;;  %v3613_v56 = vld [vmem:[%s5403_s22 + $0x25] sm:$0xff]  ;;  %v4855_v20 = vpack.i.bf16 %v5848_v39, %v5851_v8  ;;  %v3675_v14 = vld [vmem:[%s5403_s22 + $0x95] sm:$0xff] }
  0xc3   : > { %v4539_v55 = vunpack.i.h.bf16 %v4537_v49  ;;  %v4538_v57 = vunpack.i.l.bf16 %v4537_v49  ;;  %4055 = vmatprep.subr.mxu0 %v2273_v54  ;;  %4094 = vmatpush3.msra.mxu1 %v2298_v10  ;;  %v2253_v22 = vld [vmem:[#allocation2 + $0x210] sm:$0xff]  ;;  %v3707_v54 = vld [vmem:[%s5403_s22 + $0xa2] sm:$0xff] }
  0xc4   : > { %4826 = vrot.lane.b32.xlu0 %v5716_v50, %s5275_s23  ;;  %4056 = vmatpush3.msra.mxu0 %v2257_v46  ;;  %v4552_v31 = vpop.permute.xlu1 %4551  ;;  %v3581_v50 = vld [vmem:[%s5403_s22 + $0x21] sm:$0xff]  ;;  %v5868_v18 = vld [vmem:[%s5403_s22 + $0x94] sm:$0xff] }
  0xc5   : > { %v1167_v52 = vsel %vm1137_vm1, %v1159_v2, %v4538_v57  ;;  %v1142_v53 = vsel %vm1137_vm1, %v1133_v25, %v4539_v55  ;;  %4057 = vmatprep.subr.mxu0 %v2272_v33  ;;  %4095 = vmatprep.subr.mxu1 %v2313_v63  ;;  %v4554_v26 = vunpack.i.h.bf16 %v4552_v31  ;;  %v4553_v41 = vunpack.i.l.bf16 %v4552_v31  ;;  %v2252_v49 = vld [vmem:[#allocation2 + $0x208] sm:$0xff]  ;;  %v2251_v25 = vld [vmem:[#allocation2 + $0x200] sm:$0xff] }
  0xc6   : > { %v4547_v32 = vpop.permute.xlu0 %4546  ;;  %v1175_v37 = vsel %vm1146_vm2, %v1167_v52, %v4543_v40  ;;  %v1151_v30 = vsel %vm1146_vm2, %v1142_v53, %v4544_v28  ;;  %4058 = vmatpush3.msra.mxu0 %v2256_v34  ;;  %4841 = vrot.lane.b32.xlu1 %v5830_v3, %s5274_s21  ;;  %v3699_v28 = vld [vmem:[%s5403_s22 + $0xa1] sm:$0xff]  ;;  %v5872_v40 = vld [vmem:[%s5403_s22 + $0x50] sm:$0xff]  ;;  %v5878_v2 = vpack.i.bf16 %v3675_v14, %v3707_v54 }
  0xc7   : > { %v4549_v29 = vunpack.i.h.bf16 %v4547_v32  ;;  %v4548_v36 = vunpack.i.l.bf16 %v4547_v32  ;;  %2491 = vmatprep.mubr.f32.mxu0 %v1175_v37  ;;  %4059 = vmatprep.subr.mxu0 %v2271_v59  ;;  %v2296_v57 = vld [vmem:[#allocation2 + $0x368] sm:$0xff]  ;;  %v2311_v31 = vld [vmem:[#allocation2 + $0x3e0] sm:$0xff]  ;;  %v5884_v53 = vpack.i.bf16 %v5868_v18, %v3699_v28  ;;  %v3614_v32 = vld [vmem:[%s5403_s22 + $0x35] sm:$0xff] }
  0xc8   : > { %4836 = vrot.lane.b32.xlu0 %v5726_v51, %s5276_s24  ;;  %2492 = vmatmul.mubr.f32.gmra.mxu0 %v1151_v30  ;;  %v4562_v1 = vpop.permute.xlu1 %4561  ;;  %v2295_v59 = vld [vmem:[#allocation2 + $0x360] sm:$0xff] }
  0xc9   : > { %v1204_v58 = vsel %vm1128_vm0, %v3613_v56, %v4548_v36  ;;  %v1180_v4 = vsel %vm1128_vm0, %v3581_v50, %v4549_v29  ;;  %4096 = vmatpush3.msra.mxu1 %v2297_v24  ;;  %v4564_v44 = vunpack.i.h.bf16 %v4562_v1  ;;  %v4563_v5 = vunpack.i.l.bf16 %v4562_v1  ;;  %4060 = vmatpush3.msra.mxu0 %v2255_v11  ;;  %v3582_v50 = vld [vmem:[%s5403_s22 + $0x31] sm:$0xff]  ;;  %v5897_v11 = vld [vmem:[%s5403_s22 + $0x45] sm:$0xff] }
  0xca   : > { %v4557_v6 = vpop.permute.xlu0 %4556  ;;  %4097 = vmatprep.subr.mxu1 %v2312_v60  ;;  %4851 = vrot.lane.b32.xlu1 %v5758_v21, %s5276_s24  ;;  %v1212_v12 = vsel %vm1137_vm1, %v1204_v58, %v4553_v41  ;;  %v1188_v15 = vsel %vm1137_vm1, %v1180_v4, %v4554_v26  ;;  %v2346_v24 = vld [vmem:[#allocation2 + $0x4f8] sm:$0xff] }
  0xcb   : > { %4061 = vmatprep.subr.mxu0 %v2270_v62  ;;  %v4559_v0 = vunpack.i.h.bf16 %v4557_v6  ;;  %v4558_v47 = vunpack.i.l.bf16 %v4557_v6  ;;  %v1220_v13 = vsel %vm1146_vm2, %v1212_v12, %v4563_v5  ;;  %v1196_v21 = vsel %vm1146_vm2, %v1188_v15, %v4564_v44  ;;  %4098 = vmatpush3.msra.mxu1 %v2296_v57  ;;  %v5900_v60 = vld [vmem:[%s5403_s22 + $0x52] sm:$0xff] }
  0xcc   : > { %4846 = vrot.lane.b32.xlu0 %v5681_v42, %s5275_s23  ;;  %4062 = vmatpush3.msra.mxu0 %v2254_v43  ;;  %v4572_v46 = vpop.permute.xlu1 %4571  ;;  %v2267_v42 = vld [vmem:[#allocation2 + $0x280] sm:$0xff]  ;;  %v2310_v62 = vld [vmem:[#allocation2 + $0x3d8] sm:$0xff]  ;;  %v2309_v5 = vld [vmem:[#allocation2 + $0x3d0] sm:$0xff]  ;;  %v4890_v15 = vpack.i.bf16 %v5897_v11, %v5900_v60 }
  0xcd   : > { %2581 = vmatprep.mubr.f32.mxu1 %v1220_v13  ;;  %4063 = vmatprep.subr.mxu0 %v2269_v7  ;;  %v4574_v33 = vunpack.i.h.bf16 %v4572_v46  ;;  %v4573_v10 = vunpack.i.l.bf16 %v4572_v46  ;;  %v1160_v52 = vsel %vm1128_vm0, %v5654_v27, %v4558_v47  ;;  %v1134_v56 = vsel %vm1128_vm0, %v5872_v40, %v4559_v0  ;;  %v5905_v1 = vld [vmem:[%s5403_s22 + $0x76] sm:$0xff]  ;;  %v2308_v47 = vld [vmem:[#allocation2 + $0x3c8] sm:$0xff] }
  0xce   : > { %v4567_v55 = vpop.permute.xlu0 %4566  ;;  %2582 = vmatmul.mubr.f32.gmra.mxu1 %v1196_v21  ;;  %4064 = vmatpush3.msra.mxu0 %v2253_v22  ;;  %v2294_v58 = vld [vmem:[#allocation2 + $0x358] sm:$0xff]  ;;  %v4885_v0 = vpack.i.bf16 %v5905_v1, %v5711_v45  ;;  %v2292_v46 = vld [vmem:[#allocation2 + $0x348] sm:$0xff]  ;;  %v2307_v45 = vld [vmem:[#allocation2 + $0x3c0] sm:$0xff] }
  0xcf   : > { %v4569_v34 = vunpack.i.h.bf16 %v4567_v55  ;;  %v4568_v63 = vunpack.i.l.bf16 %v4567_v55  ;;  %4861 = vrot.lane.b32.xlu1 %v4860_v23, %s5274_s21  ;;  %4065 = vmatprep.subr.mxu0 %v2268_v9  ;;  %v5922_v9 = vld [vmem:[%s5403_s22 + $0x46] sm:$0xff] }
  0xd0   : > { %4856 = vrot.lane.b32.xlu0 %v4855_v20, %s5275_s23  ;;  %4066 = vmatpush3.msra.mxu0 %v2252_v49  ;;  %v4582_v16 = vpop.permute.xlu1 %4581  ;;  %v2293_v20 = vld [vmem:[#allocation2 + $0x350] sm:$0xff] }
  0xd1   : > { %v1168_v17 = vsel %vm1137_vm1, %v1160_v52, %v4568_v63  ;;  %v1143_v23 = vsel %vm1137_vm1, %v1134_v56, %v4569_v34  ;;  %4067 = vmatprep.subr.mxu0 %v2267_v42  ;;  %4099 = vmatprep.subr.mxu1 %v2311_v31  ;;  %v4584_v26 = vunpack.i.h.bf16 %v4582_v16  ;;  %v4583_v41 = vunpack.i.l.bf16 %v4582_v16  ;;  %v3820_v49 = vld [vmem:[%s5403_s22 + $0x53] sm:$0xff] }
  0xd2   : > { %v4577_v37 = vpop.permute.xlu0 %4576  ;;  %v1176_v27 = vsel %vm1146_vm2, %v1168_v17, %v4573_v10  ;;  %v1152_v30 = vsel %vm1146_vm2, %v1143_v23, %v4574_v33  ;;  %4068 = vmatpush3.msra.mxu0 %v2251_v25  ;;  %4100 = vmatpush3.msra.mxu1 %v2295_v59  ;;  %v5926_v33 = vld [vmem:[%s5403_s22 + $0x60] sm:$0xff]  ;;  %v2306_v63 = vld [vmem:[#allocation2 + $0x3b8] sm:$0xff]  ;;  %v4895_v31 = vpack.i.bf16 %v5922_v9, %v3820_v49 }
  0xd3   : > { %v4579_v29 = vunpack.i.h.bf16 %v4577_v37  ;;  %v4578_v36 = vunpack.i.l.bf16 %v4577_v37  ;;  %2496 = vmatprep.mubr.f32.mxu0 %v1176_v27  ;;  %4871 = vrot.lane.b32.xlu1 %v5878_v2, %s5274_s21  ;;  %v3828_v23 = vld [vmem:[%s5403_s22 + $0x54] sm:$0xff]  ;;  %v3583_v27 = vld [vmem:[%s5403_s22 + $0x41] sm:$0xff] }
  0xd4   : > { %4866 = vrot.lane.b32.xlu0 %v5884_v53, %s5276_s24  ;;  %2497 = vmatmul.mubr.f32.gmra.mxu0 %v1152_v30  ;;  %v4592_v4 = vpop.permute.xlu1 %4591  ;;  %v2290_v30 = vld [vmem:[#allocation2 + $0x338] sm:$0xff] }
  0xd5   : > { %v1205_v43 = vsel %vm1128_vm0, %v3614_v32, %v4578_v36  ;;  %v1181_v44 = vsel %vm1128_vm0, %v3582_v50, %v4579_v29  ;;  %4149 = vmatprep.subr.mxu0 %v2346_v24  ;;  %v4594_v6 = vunpack.i.h.bf16 %v4592_v4  ;;  %v4593_v7 = vunpack.i.l.bf16 %v4592_v4  ;;  %4101 = vmatprep.subr.mxu1 %v2310_v62  ;;  %v5947_v29 = vld [vmem:[%s5403_s22 + $0x62] sm:$0xff]  ;;  %v2305_v36 = vld [vmem:[#allocation2 + $0x3b0] sm:$0xff]  ;;  %v2302_v49 = vld [vmem:[#allocation2 + $0x398] sm:$0xff] }
  0xd6   : > { %v4587_v12 = vpop.permute.xlu0 %4586  ;;  %v1213_v14 = vsel %vm1137_vm1, %v1205_v43, %v4583_v41  ;;  %v1189_v22 = vsel %vm1137_vm1, %v1181_v44, %v4584_v26  ;;  %4102 = vmatpush3.msra.mxu1 %v2294_v58  ;;  %v5944_v41 = vld [vmem:[%s5403_s22 + $0x55] sm:$0xff]  ;;  %v4905_v62 = vpack.i.bf16 %v5872_v40, %v3828_v23 }
  0xd7   : > { %4881 = vrot.lane.b32.xlu1 %v5792_v61, %s5276_s24  ;;  %v4589_v13 = vunpack.i.h.bf16 %v4587_v12  ;;  %v4588_v21 = vunpack.i.l.bf16 %v4587_v12  ;;  %v1221_v54 = vsel %vm1146_vm2, %v1213_v14, %v4593_v7  ;;  %v1197_v61 = vsel %vm1146_vm2, %v1189_v22, %v4594_v6  ;;  %4103 = vmatprep.subr.mxu1 %v2309_v5  ;;  %v2289_v58 = vld [vmem:[#allocation2 + $0x330] sm:$0xff]  ;;  %v2304_v5 = vld [vmem:[#allocation2 + $0x3a8] sm:$0xff]  ;;  %v2303_v14 = vld [vmem:[#allocation2 + $0x3a0] sm:$0xff] }
  0xd8   : > { %4876 = vrot.lane.b32.xlu0 %v5696_v19, %s5275_s23  ;;  %v4602_v28 = vpop.permute.xlu1 %4601  ;;  %2586 = vmatprep.mubr.f32.mxu1 %v1221_v54  ;;  %v2291_v19 = vld [vmem:[#allocation2 + $0x340] sm:$0xff]  ;;  %v4920_v12 = vpack.i.bf16 %v5944_v41, %v5947_v29  ;;  %v5969_v54 = vld [vmem:[%s5403_s22 + $0x70] sm:$0xff] }
  0xd9   : > { %4104 = vmatpush3.msra.mxu1 %v2293_v20  ;;  %v4604_v10 = vunpack.i.h.bf16 %v4602_v28  ;;  %v4603_v55 = vunpack.i.l.bf16 %v4602_v28  ;;  %v1161_v25 = vsel %vm1128_vm0, %v5672_v38, %v4588_v21  ;;  %v1135_v52 = vsel %vm1128_vm0, %v5926_v33, %v4589_v13  ;;  %v5966_v21 = vld [vmem:[%s5403_s22 + $0x74] sm:$0xff] }
  0xda   : > { %v4597_v42 = vpop.permute.xlu0 %4596  ;;  %2587 = vmatmul.mubr.f32.gmra.mxu1 %v1197_v61  ;;  %4105 = vmatprep.subr.mxu1 %v2308_v47  ;;  %v4915_v20 = vpack.i.bf16 %v5702_v48, %v5848_v39  ;;  %v2287_v61 = vld [vmem:[#allocation2 + $0x320] sm:$0xff]  ;;  %v5972_v28 = vld [vmem:[%s5403_s22 + $0x56] sm:$0xff] }
  0xdb   : > { %v4599_v57 = vunpack.i.h.bf16 %v4597_v42  ;;  %v4598_v34 = vunpack.i.l.bf16 %v4597_v42  ;;  %4891 = vrot.lane.b32.xlu1 %v4890_v15, %s5275_s23  ;;  %4106 = vmatpush3.msra.mxu1 %v2292_v46  ;;  %v2288_v15 = vld [vmem:[#allocation2 + $0x328] sm:$0xff]  ;;  %v2286_v42 = vld [vmem:[#allocation2 + $0x318] sm:$0xff] }
  0xdc   : > { %4886 = vrot.lane.b32.xlu0 %v4885_v0, %s5274_s21  ;;  %4107 = vmatprep.subr.mxu1 %v2307_v45  ;;  %v4612_v56 = vpop.permute.xlu1 %4611  ;;  %v3821_v48 = vld [vmem:[%s5403_s22 + $0x63] sm:$0xff] }
  0xdd   : > { %v1169_v16 = vsel %vm1137_vm1, %v1161_v25, %v4598_v34  ;;  %v1144_v17 = vsel %vm1137_vm1, %v1135_v52, %v4599_v57  ;;  %4108 = vmatpush3.msra.mxu1 %v2291_v19  ;;  %v4614_v50 = vunpack.i.h.bf16 %v4612_v56  ;;  %v4613_v59 = vunpack.i.l.bf16 %v4612_v56  ;;  %v2301_v34 = vld [vmem:[#allocation2 + $0x390] sm:$0xff] }
  0xde   : > { %v4607_v32 = vpop.permute.xlu0 %4606  ;;  %v1177_v37 = vsel %vm1146_vm2, %v1169_v16, %v4603_v55  ;;  %v1153_v38 = vsel %vm1146_vm2, %v1144_v17, %v4604_v10  ;;  %4109 = vmatprep.subr.mxu1 %v2306_v63  ;;  %v5980_v25 = vpack.i.bf16 %v5972_v28, %v3821_v48  ;;  %v3829_v17 = vld [vmem:[%s5403_s22 + $0x64] sm:$0xff]  ;;  %v3822_v48 = vld [vmem:[%s5403_s22 + $0x73] sm:$0xff] }
  0xdf   : > { %v4609_v24 = vunpack.i.h.bf16 %v4607_v32  ;;  %v4608_v26 = vunpack.i.l.bf16 %v4607_v32  ;;  %2501 = vmatprep.mubr.f32.mxu0 %v1177_v37  ;;  %4901 = vrot.lane.b32.xlu1 %v5726_v51, %s5275_s23 }
  0xe0   : > { %4896 = vrot.lane.b32.xlu0 %v4895_v31, %s5276_s24  ;;  %2502 = vmatmul.mubr.f32.gmra.mxu0 %v1153_v38  ;;  %v4622_v4 = vpop.permute.xlu1 %4621  ;;  %v3584_v38 = vld [vmem:[%s5403_s22 + $0x51] sm:$0xff] }
  0xe1   : > { %v1206_v43 = vsel %vm1128_vm0, %v5897_v11, %v4608_v26  ;;  %v1182_v44 = vsel %vm1128_vm0, %v3583_v27, %v4609_v24  ;;  %4110 = vmatpush3.msra.mxu1 %v2290_v30  ;;  %v4624_v51 = vunpack.i.h.bf16 %v4622_v4  ;;  %v4623_v6 = vunpack.i.l.bf16 %v4622_v4  ;;  %v2285_v27 = vld [vmem:[#allocation2 + $0x310] sm:$0xff]  ;;  %v2284_v4 = vld [vmem:[#allocation2 + $0x308] sm:$0xff] }
  0xe2   : > { %v4617_v7 = vpop.permute.xlu0 %4616  ;;  %4111 = vmatprep.subr.mxu1 %v2305_v36  ;;  %v1214_v40 = vsel %vm1137_vm1, %v1206_v43, %v4613_v59  ;;  %v1190_v11 = vsel %vm1137_vm1, %v1182_v44, %v4614_v50  ;;  %v2300_v59 = vld [vmem:[#allocation2 + $0x388] sm:$0xff]  ;;  %v5995_v36 = vpack.i.bf16 %v5926_v33, %v3829_v17  ;;  %v2283_v33 = vld [vmem:[#allocation2 + $0x300] sm:$0xff] }
  0xe3   : > { %4911 = vrot.lane.b32.xlu1 %v5830_v3, %s5276_s24  ;;  %4112 = vmatpush3.msra.mxu1 %v2289_v58  ;;  %v4619_v22 = vunpack.i.h.bf16 %v4617_v7  ;;  %v4618_v0 = vunpack.i.l.bf16 %v4617_v7  ;;  %v1222_v47 = vsel %vm1146_vm2, %v1214_v40, %v4623_v6  ;;  %v1198_v13 = vsel %vm1146_vm2, %v1190_v11, %v4624_v51  ;;  %v6001_v58 = vld [vmem:[%s5403_s22 + $0x72] sm:$0xff]  ;;  %v3770_v51 = vld [vmem:[%s5403_s22 + $0xa3] sm:$0xff] }
  0xe4   : > { %4906 = vrot.lane.b32.xlu0 %v4905_v62, %s5274_s21  ;;  %4113 = vmatprep.subr.mxu1 %v2304_v5  ;;  %v4632_v46 = vpop.permute.xlu1 %4631  ;;  %v5998_v62 = vld [vmem:[%s5403_s22 + $0x65] sm:$0xff]  ;;  %v3738_v5 = vld [vmem:[%s5403_s22 + $0x96] sm:$0xff] }
  0xe5   : > { %2591 = vmatprep.mubr.f32.mxu1 %v1222_v47  ;;  %4114 = vmatpush3.msra.mxu1 %v2288_v15  ;;  %v4634_v45 = vunpack.i.h.bf16 %v4632_v46  ;;  %v4633_v10 = vunpack.i.l.bf16 %v4632_v46  ;;  %v1162_v63 = vsel %vm1128_vm0, %v5966_v21, %v4618_v0  ;;  %v1136_v31 = vsel %vm1128_vm0, %v5969_v54, %v4619_v22  ;;  %v2299_v6 = vld [vmem:[#allocation2 + $0x380] sm:$0xff]  ;;  %v2378_v40 = vld [vmem:[#allocation2 + $0x5f8] sm:$0xff] }
  0xe6   : > { %v4627_v55 = vpop.permute.xlu0 %4626  ;;  %2592 = vmatmul.mubr.f32.gmra.mxu1 %v1198_v13  ;;  %4115 = vmatprep.subr.mxu1 %v2303_v14  ;;  %v6016_v14 = vpack.i.bf16 %v3738_v5, %v3770_v51  ;;  %v6019_v22 = vld [vmem:[%s5403_s22 + $0xa4] sm:$0xff]  ;;  %v6022_v0 = vld [vmem:[%s5403_s22 + $0xb1] sm:$0xff] }
  0xe7   : > { %v4629_v19 = vunpack.i.h.bf16 %v4627_v55  ;;  %v4628_v57 = vunpack.i.l.bf16 %v4627_v55  ;;  %4921 = vrot.lane.b32.xlu1 %v4920_v12, %s5275_s23  ;;  %4116 = vmatpush3.msra.mxu1 %v2287_v61  ;;  %v6027_v46 = vld [vmem:[%s5403_s22 + $0x66] sm:$0xff] }
  0xe8   : > { %4916 = vrot.lane.b32.xlu0 %v4915_v20, %s5274_s21  ;;  %4117 = vmatprep.subr.mxu1 %v2302_v49  ;;  %v4642_v52 = vpop.permute.xlu1 %4641  ;;  %v3644_v49 = vld [vmem:[%s5403_s22 + $0x22] sm:$0xff] }
  0xe9   : > { %v1170_v56 = vsel %vm1137_vm1, %v1162_v63, %v4628_v57  ;;  %v1145_v16 = vsel %vm1137_vm1, %v1136_v31, %v4629_v19  ;;  %4118 = vmatpush3.msra.mxu1 %v2286_v42  ;;  %v4644_v24 = vunpack.i.h.bf16 %v4642_v52  ;;  %v4643_v26 = vunpack.i.l.bf16 %v4642_v52  ;;  %v3676_v19 = vld [vmem:[%s5403_s22 + $0x26] sm:$0xff] }
  0xea   : > { %v4637_v23 = vpop.permute.xlu0 %4636  ;;  %v1178_v32 = vsel %vm1146_vm2, %v1170_v56, %v4633_v10  ;;  %v1154_v37 = vsel %vm1146_vm2, %v1145_v16, %v4634_v45  ;;  %4119 = vmatprep.subr.mxu1 %v2301_v34  ;;  %v4960_v42 = vpack.i.bf16 %v6019_v22, %v6022_v0  ;;  %v6036_v57 = vld [vmem:[%s5403_s22 + $0xa5] sm:$0xff]  ;;  %v3763_v34 = vld [vmem:[%s5403_s22 + $0xb2] sm:$0xff]  ;;  %v6042_v52 = vpack.i.bf16 %v6027_v46, %v3822_v48 }
  0xeb   : > { %v4639_v30 = vunpack.i.h.bf16 %v4637_v23  ;;  %v4638_v50 = vunpack.i.l.bf16 %v4637_v23  ;;  %2506 = vmatprep.mubr.f32.mxu0 %v1178_v32  ;;  %4931 = vrot.lane.b32.xlu1 %v5884_v53, %s5275_s23  ;;  %v6047_v32 = vpack.i.bf16 %v6036_v57, %v3763_v34  ;;  %v3739_v51 = vld [vmem:[%s5403_s22 + $0xa6] sm:$0xff] }
  0xec   : > { %4926 = vrot.lane.b32.xlu0 %v5980_v25, %s5276_s24  ;;  %2507 = vmatmul.mubr.f32.gmra.mxu0 %v1154_v37  ;;  %v4652_v43 = vpop.permute.xlu1 %4651  ;;  %v6051_v37 = vpack.i.bf16 %v5969_v54, %v5966_v21  ;;  %v2344_v34 = vld [vmem:[#allocation2 + $0x4e8] sm:$0xff] }
  0xed   : > { %v1207_v44 = vsel %vm1128_vm0, %v5944_v41, %v4638_v50  ;;  %v1183_v53 = vsel %vm1128_vm0, %v3584_v38, %v4639_v30  ;;  %4120 = vmatpush3.msra.mxu1 %v2285_v27  ;;  %v4950_v41 = vpack.i.bf16 %v5998_v62, %v6001_v58  ;;  %v4654_v45 = vunpack.i.h.bf16 %v4652_v43 }
  0xee   : > { %v4647_v7 = vpop.permute.xlu0 %4646  ;;  %4121 = vmatprep.subr.mxu1 %v2300_v59  ;;  %v1215_v11 = vsel %vm1137_vm1, %v1207_v44, %v4643_v26  ;;  %v1191_v20 = vsel %vm1137_vm1, %v1183_v53, %v4644_v24  ;;  %v4653_v10 = vunpack.i.l.bf16 %v4652_v43  ;;  %v6055_v59 = vld [vmem:[%s5403_s22 + $0x75] sm:$0xff]  ;;  %v6058_v24 = vld [vmem:[%s5403_s22 + $0x82] sm:$0xff] }
  0xef   : > { %v4649_v12 = vunpack.i.h.bf16 %v4647_v7  ;;  %v4648_v15 = vunpack.i.l.bf16 %v4647_v7  ;;  %4941 = vrot.lane.b32.xlu1 %v5878_v2, %s5276_s24  ;;  %4122 = vmatpush3.msra.mxu1 %v2284_v4  ;;  %v1611_v16 = vsel %vm1128_vm0, %v3644_v49, %v4654_v45  ;;  %v6065_v43 = vld [vmem:[%s5403_s22 + $0x61] sm:$0xff]  ;;  %v2330_v7 = vld [vmem:[#allocation2 + $0x478] sm:$0xff] }
  0xf0   : > { %4936 = vrot.lane.b32.xlu0 %v5995_v36, %s5274_s21  ;;  %4123 = vmatprep.subr.mxu1 %v2299_v6  ;;  %v4662_v47 = vpop.permute.xlu1 %4661  ;;  %v1635_v23 = vsel %vm1128_vm0, %v3676_v19, %v4653_v10  ;;  %v3771_v6 = vld [vmem:[%s5403_s22 + $0xb3] sm:$0xff]  ;;  %v3799_v49 = vld [vmem:[%s5403_s22 + $0x80] sm:$0xff] }
  0xf1   : > { %v1223_v13 = vsel %vm1146_vm2, %v1215_v11, %v4648_v15  ;;  %v1199_v61 = vsel %vm1146_vm2, %v1191_v20, %v4649_v12  ;;  %4124 = vmatpush3.msra.mxu1 %v2283_v33  ;;  %v4664_v38 = vunpack.i.h.bf16 %v4662_v47  ;;  %v4663_v27 = vunpack.i.l.bf16 %v4662_v47  ;;  %v2345_v15 = vld [vmem:[#allocation2 + $0x4f0] sm:$0xff]  ;;  %v3831_v45 = vld [vmem:[%s5403_s22 + $0x84] sm:$0xff] }
  0xf2   : > { %v4657_v55 = vpop.permute.xlu0 %4656  ;;  %2596 = vmatprep.mubr.f32.mxu1 %v1223_v13  ;;  %4205 = vmatprep.subr.mxu1 %v2378_v40  ;;  %v4980_v12 = vpack.i.bf16 %v6055_v59, %v6058_v24  ;;  %v2329_v47 = vld [vmem:[#allocation2 + $0x470] sm:$0xff]  ;;  %v6083_v48 = vpack.i.bf16 %v3739_v51, %v3771_v6  ;;  %v3823_v19 = vld [vmem:[%s5403_s22 + $0x83] sm:$0xff]  ;;  %v2326_v51 = vld [vmem:[#allocation2 + $0x458] sm:$0xff] }
  0xf3   : > { %2597 = vmatmul.mubr.f32.gmra.mxu1 %v1199_v61  ;;  %4951 = vrot.lane.b32.xlu1 %v4950_v41, %s5275_s23  ;;  %v4659_v63 = vunpack.i.h.bf16 %v4657_v55  ;;  %v4658_v31 = vunpack.i.l.bf16 %v4657_v55  ;;  %v1208_v11 = vsel %vm1128_vm0, %v5998_v62, %v4663_v27  ;;  %v1184_v20 = vsel %vm1128_vm0, %v6065_v43, %v4664_v38  ;;  %v3645_v38 = vld [vmem:[%s5403_s22 + $0x32] sm:$0xff]  ;;  %v2343_v27 = vld [vmem:[#allocation2 + $0x4e0] sm:$0xff] }
  0xf4   : > { %4946 = vrot.lane.b32.xlu0 %v6016_v14, %s5274_s21  ;;  %v4672_v56 = vpop.permute.xlu1 %4671 }
  0xf5   : > { %v4674_v26 = vunpack.i.h.bf16 %v4672_v56  ;;  %v4673_v4 = vunpack.i.l.bf16 %v4672_v56  ;;  %v1643_v21 = vsel %vm1137_vm1, %v1635_v23, %v4658_v31  ;;  %v1619_v54 = vsel %vm1137_vm1, %v1611_v16, %v4659_v63  ;;  %v2328_v16 = vld [vmem:[#allocation2 + $0x468] sm:$0xff]  ;;  %v3677_v23 = vld [vmem:[%s5403_s22 + $0x36] sm:$0xff] }
  0xf6   : > { %v4667_v17 = vpop.permute.xlu0 %4666 }
  0xf7   : > { %v4669_v30 = vunpack.i.h.bf16 %v4667_v17  ;;  %v4668_v50 = vunpack.i.l.bf16 %v4667_v17  ;;  %4961 = vrot.lane.b32.xlu1 %v4960_v42, %s5275_s23  ;;  %v1216_v13 = vsel %vm1137_vm1, %v1208_v11, %v4673_v4  ;;  %v1192_v61 = vsel %vm1137_vm1, %v1184_v20, %v4674_v26  ;;  %v2327_v4 = vld [vmem:[#allocation2 + $0x460] sm:$0xff]  ;;  %v6113_v20 = vld [vmem:[%s5403_s22 + $0x71] sm:$0xff] }
  0xf8   : > { %4956 = vrot.lane.b32.xlu0 %v6042_v52, %s5276_s24  ;;  %v4682_v44 = vpop.permute.xlu1 %4681  ;;  %v6093_v17 = vpack.i.bf16 %v3799_v49, %v3831_v45  ;;  %v6100_v26 = vpack.i.bf16 %v5905_v1, %v3823_v19  ;;  %v2325_v49 = vld [vmem:[#allocation2 + $0x450] sm:$0xff] }
  0xf9   : > { %v1651_v53 = vsel %vm1146_vm2, %v1643_v21, %v4668_v50  ;;  %v1627_v5 = vsel %vm1146_vm2, %v1619_v54, %v4669_v30  ;;  %v4684_v63 = vunpack.i.h.bf16 %v4682_v44  ;;  %v4683_v31 = vunpack.i.l.bf16 %v4682_v44  ;;  %v2342_v54 = vld [vmem:[#allocation2 + $0x4d8] sm:$0xff] }
  0xfa   : > { %v4677_v33 = vpop.permute.xlu0 %4676  ;;  %2681 = vmatprep.mubr.f32.mxu0 %v1651_v53 }
  0xfb   : > { %v4679_v41 = vunpack.i.h.bf16 %v4677_v33  ;;  %v4678_v40 = vunpack.i.l.bf16 %v4677_v33  ;;  %2682 = vmatmul.mubr.f32.vlgmr.msra.gmra.mxu0 %v1627_v5  ;;  %4971 = vrot.lane.b32.xlu1 %v6047_v32, %s5276_s24  ;;  %v1636_v53 = vsel %vm1128_vm0, %v3677_v23, %v4683_v31  ;;  %v1612_v5 = vsel %vm1128_vm0, %v3645_v38, %v4684_v63  ;;  %v2324_v31 = vld [vmem:[#allocation2 + $0x448] sm:$0xff] }
  0xfc   : > { %4966 = vrot.lane.b32.xlu0 %v6051_v37, %s5274_s21  ;;  %4150 = vmatpush3.msra.mxu0 %v2330_v7  ;;  %v6087_v10 = vpop.permute.xlu1 %4691  ;;  %v6135_v38 = vld [vmem:[%s5403_s22 + $0x86] sm:$0xff] }
  0xfd   : > { %v1224_v55 = vsel %vm1146_vm2, %v1216_v13, %v4678_v40  ;;  %v1200_v42 = vsel %vm1146_vm2, %v1192_v61, %v4679_v41  ;;  %4151 = vmatprep.subr.mxu0 %v2345_v15  ;;  %v4694_v6 = vunpack.i.h.bf16 %v6087_v10  ;;  %v4693_v7 = vunpack.i.l.bf16 %v6087_v10 }
  0xfe   : > { %v4687_v56 = vpop.permute.xlu0 %4686  ;;  %2601 = vmatprep.mubr.f32.mxu1 %v1224_v55  ;;  %4152 = vmatpush3.msra.mxu0 %v2329_v47  ;;  %v5010_v10 = vpack.i.bf16 %v6065_v43, %v5998_v62  ;;  %v2340_v55 = vld [vmem:[#allocation2 + $0x4c8] sm:$0xff] }
  0xff   : > { %2602 = vmatmul.mubr.f32.gmra.mxu1 %v1200_v42  ;;  %4981 = vrot.lane.b32.xlu1 %v4980_v12, %s5275_s23  ;;  %v4689_v30 = vunpack.i.h.bf16 %v4687_v56  ;;  %v4688_v50 = vunpack.i.l.bf16 %v4687_v56  ;;  %v2341_v12 = vld [vmem:[#allocation2 + $0x4d0] sm:$0xff]  ;;  %v1185_v63 = vsel %vm1128_vm0, %v6113_v20, %v4694_v6  ;;  %v2322_v6 = vld [vmem:[#allocation2 + $0x438] sm:$0xff] }
 0x100   : > { %4976 = vrot.lane.b32.xlu0 %v6083_v48, %s5274_s21  ;;  %4153 = vmatprep.subr.mxu0 %v2344_v34  ;;  %v4702_v21 = vpop.permute.xlu1 %4701  ;;  %v1209_v34 = vsel %vm1128_vm0, %v6055_v59, %v4693_v7  ;;  %v6130_v56 = vld [vmem:[%s5403_s22 + $0x90] sm:$0xff] }
 0x101   : > { %4154 = vmatpush3.msra.mxu0 %v2328_v16  ;;  %v4704_v15 = vunpack.i.h.bf16 %v4702_v21  ;;  %v4703_v41 = vunpack.i.l.bf16 %v4702_v21  ;;  %v1644_v40 = vsel %vm1137_vm1, %v1636_v53, %v4688_v50  ;;  %v1620_v11 = vsel %vm1137_vm1, %v1612_v5, %v4689_v30 }
 0x102   : > { %v4697_v44 = vpop.permute.xlu0 %4696  ;;  %4155 = vmatprep.subr.mxu0 %v2343_v27  ;;  %v2339_v27 = vld [vmem:[#allocation2 + $0x4c0] sm:$0xff]  ;;  %v5020_v21 = vpack.i.bf16 %v6130_v56, %v5868_v18 }
 0x103   : > { %v4699_v33 = vunpack.i.h.bf16 %v4697_v44  ;;  %v4698_v1 = vunpack.i.l.bf16 %v4697_v44  ;;  %4991 = vrot.lane.b32.xlu1 %v6093_v17, %s5274_s21  ;;  %4156 = vmatpush3.msra.mxu0 %v2327_v4  ;;  %v1217_v62 = vsel %vm1137_vm1, %v1209_v34, %v4703_v41  ;;  %v1193_v43 = vsel %vm1137_vm1, %v1185_v63, %v4704_v15  ;;  %v2323_v4 = vld [vmem:[#allocation2 + $0x440] sm:$0xff]  ;;  %v2338_v44 = vld [vmem:[#allocation2 + $0x4b8] sm:$0xff]  ;;  %v2321_v15 = vld [vmem:[#allocation2 + $0x430] sm:$0xff] }
 0x104   : > { %4986 = vrot.lane.b32.xlu0 %v6100_v26, %s5276_s24  ;;  %4157 = vmatprep.subr.mxu0 %v2342_v54  ;;  %v4712_v47 = vpop.permute.xlu1 %4711  ;;  %v3646_v54 = vld [vmem:[%s5403_s22 + $0x42] sm:$0xff]  ;;  %v5040_v34 = vpack.i.bf16 %v6113_v20, %v6055_v59 }
 0x105   : > { %v1652_v13 = vsel %vm1146_vm2, %v1644_v40, %v4698_v1  ;;  %v1628_v61 = vsel %vm1146_vm2, %v1620_v11, %v4699_v33  ;;  %4158 = vmatpush3.msra.mxu0 %v2326_v51  ;;  %v4714_v30 = vunpack.i.h.bf16 %v4712_v47  ;;  %v4713_v50 = vunpack.i.l.bf16 %v4712_v47  ;;  %v2337_v33 = vld [vmem:[#allocation2 + $0x4b0] sm:$0xff]  ;;  %v2335_v63 = vld [vmem:[#allocation2 + $0x4a0] sm:$0xff] }
 0x106   : > { %v4707_v45 = vpop.permute.xlu0 %4706  ;;  %2686 = vmatprep.mubr.f32.mxu0 %v1652_v13  ;;  %4159 = vmatprep.subr.mxu0 %v2341_v12  ;;  %v5015_v51 = vpack.i.bf16 %v6135_v38, %v5848_v39  ;;  %v2336_v39 = vld [vmem:[#allocation2 + $0x4a8] sm:$0xff] }
 0x107   : > { %v4709_v42 = vunpack.i.h.bf16 %v4707_v45  ;;  %v4708_v19 = vunpack.i.l.bf16 %v4707_v45  ;;  %2687 = vmatmul.mubr.f32.gmra.mxu0 %v1628_v61  ;;  %5001 = vrot.lane.b32.xlu1 %v5995_v36, %s5276_s24  ;;  %v1637_v12 = vsel %vm1128_vm0, %v5922_v9, %v4713_v50  ;;  %v1613_v18 = vsel %vm1128_vm0, %v3646_v54, %v4714_v30  ;;  %v2318_v54 = vld [vmem:[#allocation2 + $0x418] sm:$0xff] }
 0x108   : > { %4996 = vrot.lane.b32.xlu0 %v5980_v25, %s5275_s23  ;;  %4160 = vmatpush3.msra.mxu0 %v2325_v49  ;;  %v4722_v16 = vpop.permute.xlu1 %4721  ;;  %v6153_v49 = vld [vmem:[%s5403_s22 + $0x81] sm:$0xff] }
 0x109   : > { %v1225_v36 = vsel %vm1146_vm2, %v1217_v62, %v4708_v19  ;;  %v1201_v23 = vsel %vm1146_vm2, %v1193_v43, %v4709_v42  ;;  %4161 = vmatprep.subr.mxu0 %v2340_v55  ;;  %v4724_v41 = vunpack.i.h.bf16 %v4722_v16  ;;  %v4723_v40 = vunpack.i.l.bf16 %v4722_v16  ;;  %v2320_v42 = vld [vmem:[#allocation2 + $0x428] sm:$0xff] }
 0x10a   : > { %v4717_v25 = vpop.permute.xlu0 %4716  ;;  %2606 = vmatprep.mubr.f32.mxu1 %v1225_v36  ;;  %4162 = vmatpush3.msra.mxu0 %v2324_v31  ;;  %v2319_v36 = vld [vmem:[#allocation2 + $0x420] sm:$0xff] }
 0x10b   : > { %2607 = vmatmul.mubr.f32.gmra.mxu1 %v1201_v23  ;;  %5011 = vrot.lane.b32.xlu1 %v5010_v10, %s5274_s21  ;;  %v4719_v53 = vunpack.i.h.bf16 %v4717_v25  ;;  %v4718_v5 = vunpack.i.l.bf16 %v4717_v25  ;;  %v1210_v43 = vsel %vm1128_vm0, %v5821_v35, %v4723_v40  ;;  %v1186_v16 = vsel %vm1128_vm0, %v6153_v49, %v4724_v41  ;;  %v2334_v35 = vld [vmem:[#allocation2 + $0x498] sm:$0xff] }
 0x10c   : > { %5006 = vrot.lane.b32.xlu0 %v5830_v3, %s5275_s23  ;;  %4163 = vmatprep.subr.mxu0 %v2339_v27  ;;  %v4732_v7 = vpop.permute.xlu1 %4731 }
 0x10d   : > { %4164 = vmatpush3.msra.mxu0 %v2323_v4  ;;  %v4734_v47 = vunpack.i.h.bf16 %v4732_v7  ;;  %v4733_v13 = vunpack.i.l.bf16 %v4732_v7  ;;  %v1645_v61 = vsel %vm1137_vm1, %v1637_v12, %v4718_v5  ;;  %v1621_v9 = vsel %vm1137_vm1, %v1613_v18, %v4719_v53  ;;  %v2333_v5 = vld [vmem:[#allocation2 + $0x490] sm:$0xff] }
 0x10e   : > { %v4727_v1 = vpop.permute.xlu0 %4726  ;;  %4165 = vmatprep.subr.mxu0 %v2338_v44  ;;  %v5050_v53 = vpack.i.bf16 %v5851_v8, %v6019_v22  ;;  %v3708_v12 = vld [vmem:[%s5403_s22 + $0x33] sm:$0xff] }
 0x10f   : > { %v4729_v3 = vunpack.i.h.bf16 %v4727_v1  ;;  %v4728_v11 = vunpack.i.l.bf16 %v4727_v1  ;;  %5021 = vrot.lane.b32.xlu1 %v5020_v21, %s5274_s21  ;;  %4166 = vmatpush3.msra.mxu0 %v2322_v6  ;;  %v1218_v59 = vsel %vm1137_vm1, %v1210_v43, %v4733_v13  ;;  %v1194_v20 = vsel %vm1137_vm1, %v1186_v16, %v4734_v47  ;;  %v2316_v47 = vld [vmem:[#allocation2 + $0x408] sm:$0xff] }
 0x110   : > { %5016 = vrot.lane.b32.xlu0 %v5015_v51, %s5276_s24  ;;  %4167 = vmatprep.subr.mxu0 %v2337_v33  ;;  %v4742_v45 = vpop.permute.xlu1 %4741 }
 0x111   : > { %v1653_v10 = vsel %vm1146_vm2, %v1645_v61, %v4728_v11  ;;  %v1629_v55 = vsel %vm1146_vm2, %v1621_v9, %v4729_v3  ;;  %4168 = vmatpush3.msra.mxu0 %v2321_v15  ;;  %v4744_v23 = vunpack.i.h.bf16 %v4742_v45  ;;  %v4743_v27 = vunpack.i.l.bf16 %v4742_v45  ;;  %v3740_v15 = vld [vmem:[%s5403_s22 + $0x40] sm:$0xff]  ;;  %v2332_v11 = vld [vmem:[#allocation2 + $0x488] sm:$0xff] }
 0x112   : > { %v4737_v19 = vpop.permute.xlu0 %4736  ;;  %2691 = vmatprep.mubr.f32.mxu0 %v1653_v10  ;;  %4169 = vmatprep.subr.mxu0 %v2336_v39  ;;  %v3894_v39 = vld [vmem:[%s5403_s22 + $0x85] sm:$0xff] }
 0x113   : > { %v4739_v31 = vunpack.i.h.bf16 %v4737_v19  ;;  %v4738_v62 = vunpack.i.l.bf16 %v4737_v19  ;;  %2692 = vmatmul.mubr.f32.gmra.mxu0 %v1629_v55  ;;  %5031 = vrot.lane.b32.xlu1 %v6051_v37, %s5276_s24  ;;  %v1638_v51 = vsel %vm1128_vm0, %v5972_v28, %v4743_v27  ;;  %v1614_v6 = vsel %vm1128_vm0, %v5900_v60, %v4744_v23  ;;  %v2317_v28 = vld [vmem:[#allocation2 + $0x410] sm:$0xff]  ;;  %v2331_v45 = vld [vmem:[#allocation2 + $0x480] sm:$0xff] }
 0x114   : > { %5026 = vrot.lane.b32.xlu0 %v6042_v52, %s5275_s23  ;;  %4170 = vmatpush3.msra.mxu0 %v2320_v42  ;;  %v4752_v30 = vpop.permute.xlu1 %4751  ;;  %v2315_v19 = vld [vmem:[#allocation2 + $0x400] sm:$0xff]  ;;  %v6204_v27 = vld [vmem:[%s5403_s22 + $0xb0] sm:$0xff] }
 0x115   : > { %v1226_v37 = vsel %vm1146_vm2, %v1218_v59, %v4738_v62  ;;  %v1202_v50 = vsel %vm1146_vm2, %v1194_v20, %v4739_v31  ;;  %4171 = vmatprep.subr.mxu0 %v2335_v63  ;;  %v4754_v25 = vunpack.i.h.bf16 %v4752_v30  ;;  %v4753_v4 = vunpack.i.l.bf16 %v4752_v30  ;;  %v6197_v62 = vld [vmem:[#allocation2 + $0x618] sm:$0xff] }
 0x116   : > { %v4747_v21 = vpop.permute.xlu0 %4746  ;;  %2611 = vmatprep.mubr.f32.mxu1 %v1226_v37  ;;  %4172 = vmatpush3.msra.mxu0 %v2319_v36  ;;  %v5070_v31 = vpack.i.bf16 %v6153_v49, %v3894_v39  ;;  %v2362_v59 = vld [vmem:[#allocation2 + $0x578] sm:$0xff]  ;;  %v2377_v49 = vld [vmem:[#allocation2 + $0x5f0] sm:$0xff]  ;;  %v2359_v39 = vld [vmem:[#allocation2 + $0x560] sm:$0xff] }
 0x117   : > { %v4749_v52 = vunpack.i.h.bf16 %v4747_v21  ;;  %v4748_v44 = vunpack.i.l.bf16 %v4747_v21  ;;  %2612 = vmatmul.mubr.f32.gmra.mxu1 %v1202_v50  ;;  %5041 = vrot.lane.b32.xlu1 %v5040_v34, %s5274_s21  ;;  %v3887_v21 = vld [vmem:[%s5403_s22 + $0x94] sm:$0xff] }
 0x118   : > { %5036 = vrot.lane.b32.xlu0 %v5878_v2, %s5275_s23  ;;  %4173 = vmatprep.subr.mxu0 %v2334_v35  ;;  %v4762_v7 = vpop.permute.xlu1 %4761  ;;  %v2361_v35 = vld [vmem:[#allocation2 + $0x570] sm:$0xff] }
 0x119   : > { %v1646_v33 = vsel %vm1137_vm1, %v1638_v51, %v4748_v44  ;;  %v1622_v1 = vsel %vm1137_vm1, %v1614_v6, %v4749_v52  ;;  %4174 = vmatpush3.msra.mxu0 %v2318_v54  ;;  %v4764_v41 = vunpack.i.h.bf16 %v4762_v7  ;;  %v4763_v40 = vunpack.i.l.bf16 %v4762_v7  ;;  %v2376_v54 = vld [vmem:[#allocation2 + $0x5e8] sm:$0xff]  ;;  %v6222_v6 = vld [vmem:[%s5403_s22 + $0x93] sm:$0xff] }
 0x11a   : > { %v4757_v8 = vpop.permute.xlu0 %4756  ;;  %v1654_v18 = vsel %vm1146_vm2, %v1646_v33, %v4753_v4  ;;  %v1630_v2 = vsel %vm1146_vm2, %v1622_v1, %v4754_v25  ;;  %4175 = vmatprep.subr.mxu0 %v2333_v5  ;;  %v3741_v1 = vld [vmem:[%s5403_s22 + $0x50] sm:$0xff] }
 0x11b   : > { %v4759_v60 = vunpack.i.h.bf16 %v4757_v8  ;;  %v4758_v3 = vunpack.i.l.bf16 %v4757_v8  ;;  %2696 = vmatprep.mubr.f32.mxu0 %v1654_v18  ;;  %5051 = vrot.lane.b32.xlu1 %v5050_v53, %s5274_s21 }
 0x11c   : > { %5046 = vrot.lane.b32.xlu0 %v6016_v14, %s5276_s24  ;;  %2697 = vmatmul.mubr.f32.gmra.mxu0 %v1630_v2  ;;  %v4772_v61 = vpop.permute.xlu1 %4771 }
 0x11d   : > { %v1659_v13 = vsel %vm1128_vm0, %v3708_v12, %v4759_v60  ;;  %v1683_v9 = vsel %vm1128_vm0, %v3740_v15, %v4758_v3  ;;  %4176 = vmatpush3.msra.mxu0 %v2317_v28  ;;  %v4774_v10 = vunpack.i.h.bf16 %v4772_v61  ;;  %v4773_v55 = vunpack.i.l.bf16 %v4772_v61  ;;  %v2360_v12 = vld [vmem:[#allocation2 + $0x568] sm:$0xff]  ;;  %v6232_v28 = vld [vmem:[%s5403_s22 + $0x91] sm:$0xff] }
 0x11e   : > { %v4767_v42 = vpop.permute.xlu0 %4766  ;;  %4177 = vmatprep.subr.mxu0 %v2332_v11  ;;  %v1691_v34 = vsel %vm1137_vm1, %v1683_v9, %v4763_v40  ;;  %v1667_v63 = vsel %vm1137_vm1, %v1659_v13, %v4764_v41  ;;  %v3895_v41 = vld [vmem:[%s5403_s22 + $0x95] sm:$0xff]  ;;  %v2375_v40 = vld [vmem:[#allocation2 + $0x5e0] sm:$0xff]  ;;  %v5085_v60 = vpack.i.bf16 %v6135_v38, %v6222_v6 }
 0x11f   : > { %5061 = vrot.lane.b32.xlu1 %v6093_v17, %s5276_s24  ;;  %4178 = vmatpush3.msra.mxu0 %v2316_v47  ;;  %v4769_v43 = vunpack.i.h.bf16 %v4767_v42  ;;  %v4768_v16 = vunpack.i.l.bf16 %v4767_v42  ;;  %v1699_v36 = vsel %vm1146_vm2, %v1691_v34, %v4773_v55  ;;  %v1675_v23 = vsel %vm1146_vm2, %v1667_v63, %v4774_v10  ;;  %v3834_v17 = vld [vmem:[%s5403_s22 + $0xb4] sm:$0xff]  ;;  %v3819_v11 = vld [vmem:[%s5403_s22 + $0xc2] sm:$0xff] }
 0x120   : > { %5056 = vrot.lane.b32.xlu0 %v6100_v26, %s5275_s23  ;;  %4179 = vmatprep.subr.mxu0 %v2331_v45  ;;  %v4782_v20 = vpop.permute.xlu1 %4781  ;;  %v6210_v4 = vpack.i.bf16 %v6204_v27, %v3834_v17  ;;  %v6240_v3 = vld [vmem:[%s5403_s22 + $0xb5] sm:$0xff]  ;;  %v5100_v42 = vpack.i.bf16 %v6232_v28, %v3895_v41  ;;  %v3742_v41 = vld [vmem:[%s5403_s22 + $0x60] sm:$0xff] }
 0x121   : > { %2786 = vmatprep.mubr.f32.mxu1 %v1699_v36  ;;  %4180 = vmatpush3.msra.mxu0 %v2315_v19  ;;  %v4784_v30 = vunpack.i.h.bf16 %v4782_v20  ;;  %v4783_v37 = vunpack.i.l.bf16 %v4782_v20  ;;  %v1639_v52 = vsel %vm1128_vm0, %v6027_v46, %v4768_v16  ;;  %v1615_v44 = vsel %vm1128_vm0, %v5947_v29, %v4769_v43  ;;  %v3709_v29 = vld [vmem:[%s5403_s22 + $0x43] sm:$0xff]  ;;  %v2374_v9 = vld [vmem:[#allocation2 + $0x5d8] sm:$0xff]  ;;  %v2373_v16 = vld [vmem:[#allocation2 + $0x5d0] sm:$0xff] }
 0x122   : > { %v4777_v50 = vpop.permute.xlu0 %4776  ;;  %2787 = vmatmul.mubr.f32.vlgmr.msra.gmra.mxu1 %v1675_v23  ;;  %4307 = vmatprep.subr.mxu0 %v6197_v62  ;;  %v5090_v46 = vpack.i.bf16 %v6130_v56, %v3887_v21  ;;  %v2358_v19 = vld [vmem:[#allocation2 + $0x558] sm:$0xff]  ;;  %v3803_v20 = vld [vmem:[%s5403_s22 + $0xc0] sm:$0xff] }
 0x123   : > { %v4779_v26 = vunpack.i.h.bf16 %v4777_v50  ;;  %v4778_v25 = vunpack.i.l.bf16 %v4777_v50  ;;  %5071 = vrot.lane.b32.xlu1 %v5070_v31, %s5274_s21  ;;  %4206 = vmatpush3.msra.mxu1 %v2362_v59  ;;  %v5095_v31 = vpack.i.bf16 %v6240_v3, %v3819_v11  ;;  %v3681_v43 = vld [vmem:[%s5403_s22 + $0x76] sm:$0xff] }
 0x124   : > { %5066 = vrot.lane.b32.xlu0 %v6047_v32, %s5275_s23  ;;  %4207 = vmatprep.subr.mxu1 %v2377_v49  ;;  %v4792_v53 = vpop.permute.xlu1 %4791  ;;  %v3835_v49 = vld [vmem:[%s5403_s22 + $0xc4] sm:$0xff]  ;;  %v3795_v50 = vld [vmem:[%s5403_s22 + $0xb6] sm:$0xff] }
 0x125   : > { %v1647_v5 = vsel %vm1137_vm1, %v1639_v52, %v4778_v25  ;;  %v1623_v51 = vsel %vm1137_vm1, %v1615_v44, %v4779_v26  ;;  %4208 = vmatpush3.msra.mxu1 %v2361_v35  ;;  %v4794_v8 = vunpack.i.h.bf16 %v4792_v53  ;;  %v4793_v18 = vunpack.i.l.bf16 %v4792_v53  ;;  %v3827_v35 = vld [vmem:[%s5403_s22 + $0xc3] sm:$0xff] }
 0x126   : > { %v4787_v7 = vpop.permute.xlu0 %4786  ;;  %v1655_v32 = vsel %vm1146_vm2, %v1647_v5, %v4783_v37  ;;  %v1631_v33 = vsel %vm1146_vm2, %v1623_v51, %v4784_v30  ;;  %4209 = vmatprep.subr.mxu1 %v2376_v54  ;;  %v2357_v30 = vld [vmem:[#allocation2 + $0x550] sm:$0xff]  ;;  %v2372_v26 = vld [vmem:[#allocation2 + $0x5c8] sm:$0xff]  ;;  %v6259_v5 = vpack.i.bf16 %v3803_v20, %v3835_v49  ;;  %v6262_v51 = vld [vmem:[%s5403_s22 + $0xa0] sm:$0xff] }
 0x127   : > { %v4789_v2 = vunpack.i.h.bf16 %v4787_v7  ;;  %v4788_v15 = vunpack.i.l.bf16 %v4787_v7  ;;  %2701 = vmatprep.mubr.f32.mxu0 %v1655_v32  ;;  %5081 = vrot.lane.b32.xlu1 %v6210_v4, %s5274_s21  ;;  %v2356_v52 = vld [vmem:[#allocation2 + $0x548] sm:$0xff]  ;;  %v2371_v7 = vld [vmem:[#allocation2 + $0x5c0] sm:$0xff] }
 0x128   : > { %5076 = vrot.lane.b32.xlu0 %v6083_v48, %s5276_s24  ;;  %2702 = vmatmul.mubr.f32.gmra.mxu0 %v1631_v33  ;;  %v4802_v47 = vpop.permute.xlu1 %4801  ;;  %v6266_v33 = vpack.i.bf16 %v3795_v50, %v3827_v35  ;;  %v2352_v49 = vld [vmem:[#allocation2 + $0x528] sm:$0xff] }
 0x129   : > { %v1684_v13 = vsel %vm1128_vm0, %v3741_v1, %v4788_v15  ;;  %v1660_v61 = vsel %vm1128_vm0, %v3709_v29, %v4789_v2  ;;  %4210 = vmatpush3.msra.mxu1 %v2360_v12  ;;  %v4804_v45 = vunpack.i.h.bf16 %v4802_v47  ;;  %v4803_v10 = vunpack.i.l.bf16 %v4802_v47 }
 0x12a   : > { %v4797_v55 = vpop.permute.xlu0 %4796  ;;  %4211 = vmatprep.subr.mxu1 %v2375_v40  ;;  %v1692_v34 = vsel %vm1137_vm1, %v1684_v13, %v4793_v18  ;;  %v1668_v63 = vsel %vm1137_vm1, %v1660_v61, %v4794_v8  ;;  %v5120_v15 = vpack.i.bf16 %v6262_v51, %v6019_v22  ;;  %v3710_v40 = vld [vmem:[%s5403_s22 + $0x53] sm:$0xff]  ;;  %v6283_v61 = vld [vmem:[%s5403_s22 + $0xa1] sm:$0xff] }
 0x12b   : > { %5091 = vrot.lane.b32.xlu1 %v5090_v46, %s5276_s24  ;;  %4212 = vmatpush3.msra.mxu1 %v2359_v39  ;;  %v4799_v36 = vunpack.i.h.bf16 %v4797_v55  ;;  %v4798_v23 = vunpack.i.l.bf16 %v4797_v55  ;;  %v1700_v17 = vsel %vm1146_vm2, %v1692_v34, %v4803_v10  ;;  %v1676_v59 = vsel %vm1146_vm2, %v1668_v63, %v4804_v45  ;;  %v2370_v13 = vld [vmem:[#allocation2 + $0x5b8] sm:$0xff]  ;;  %v2369_v55 = vld [vmem:[#allocation2 + $0x5b0] sm:$0xff] }
 0x12c   : > { %5086 = vrot.lane.b32.xlu0 %v5085_v60, %s5275_s23  ;;  %4213 = vmatprep.subr.mxu1 %v2374_v9  ;;  %v4812_v37 = vpop.permute.xlu1 %4811  ;;  %v2354_v22 = vld [vmem:[#allocation2 + $0x538] sm:$0xff]  ;;  %v2353_v63 = vld [vmem:[#allocation2 + $0x530] sm:$0xff] }
 0x12d   : > { %2791 = vmatprep.mubr.f32.mxu1 %v1700_v17  ;;  %4214 = vmatpush3.msra.mxu1 %v2358_v19  ;;  %v4814_v25 = vunpack.i.h.bf16 %v4812_v37  ;;  %v4813_v21 = vunpack.i.l.bf16 %v4812_v37  ;;  %v1640_v32 = vsel %vm1128_vm0, %v3681_v43, %v4798_v23  ;;  %v1616_v46 = vsel %vm1128_vm0, %v6001_v58, %v4799_v36  ;;  %v2355_v58 = vld [vmem:[#allocation2 + $0x540] sm:$0xff]  ;;  %v2368_v36 = vld [vmem:[#allocation2 + $0x5a8] sm:$0xff] }
 0x12e   : > { %v4807_v54 = vpop.permute.xlu0 %4806  ;;  %2792 = vmatmul.mubr.f32.gmra.mxu1 %v1676_v59  ;;  %4215 = vmatprep.subr.mxu1 %v2373_v16  ;;  %v5125_v16 = vpack.i.bf16 %v6283_v61, %v6036_v57  ;;  %v2367_v37 = vld [vmem:[#allocation2 + $0x5a0] sm:$0xff] }
 0x12f   : > { %v4809_v44 = vunpack.i.h.bf16 %v4807_v54  ;;  %v4808_v53 = vunpack.i.l.bf16 %v4807_v54  ;;  %5101 = vrot.lane.b32.xlu1 %v5100_v42, %s5274_s21  ;;  %4216 = vmatpush3.msra.mxu1 %v2357_v30  ;;  %v2366_v54 = vld [vmem:[#allocation2 + $0x598] sm:$0xff] }
 0x130   : > { %5096 = vrot.lane.b32.xlu0 %v5095_v31, %s5275_s23  ;;  %4217 = vmatprep.subr.mxu1 %v2372_v26  ;;  %v4822_v1 = vpop.permute.xlu1 %4821  ;;  %v2351_v26 = vld [vmem:[#allocation2 + $0x520] sm:$0xff] }
 0x131   : > { %v1648_v29 = vsel %vm1137_vm1, %v1640_v32, %v4808_v53  ;;  %v1624_v12 = vsel %vm1137_vm1, %v1616_v46, %v4809_v44  ;;  %4218 = vmatpush3.msra.mxu1 %v2356_v52  ;;  %v4824_v60 = vunpack.i.h.bf16 %v4822_v1  ;;  %v4823_v11 = vunpack.i.l.bf16 %v4822_v1  ;;  %v3743_v46 = vld [vmem:[%s5403_s22 + $0x70] sm:$0xff] }
 0x132   : > { %v4817_v8 = vpop.permute.xlu0 %4816  ;;  %v1656_v18 = vsel %vm1146_vm2, %v1648_v29, %v4813_v21  ;;  %v1632_v2 = vsel %vm1146_vm2, %v1624_v12, %v4814_v25  ;;  %4219 = vmatprep.subr.mxu1 %v2371_v7 }
 0x133   : > { %v4819_v39 = vunpack.i.h.bf16 %v4817_v8  ;;  %v4818_v47 = vunpack.i.l.bf16 %v4817_v8  ;;  %2706 = vmatprep.mubr.f32.mxu0 %v1656_v18  ;;  %5111 = vrot.lane.b32.xlu1 %v6259_v5, %s5274_s21  ;;  %v6313_v18 = vld [vmem:[%s5403_s22 + $0xc1] sm:$0xff] }
 0x134   : > { %5106 = vrot.lane.b32.xlu0 %v6266_v33, %s5276_s24  ;;  %2707 = vmatmul.mubr.f32.gmra.mxu0 %v1632_v2  ;;  %v4832_v9 = vpop.permute.xlu1 %4831  ;;  %v3898_v2 = vld [vmem:[%s5403_s22 + $0xc5] sm:$0xff] }
 0x135   : > { %v1685_v45 = vsel %vm1128_vm0, %v3742_v41, %v4818_v47  ;;  %v1661_v10 = vsel %vm1128_vm0, %v3710_v40, %v4819_v39  ;;  %4220 = vmatpush3.msra.mxu1 %v2355_v58  ;;  %v4834_v42 = vunpack.i.h.bf16 %v4832_v9  ;;  %v4833_v19 = vunpack.i.l.bf16 %v4832_v9  ;;  %v3851_v41 = vld [vmem:[%s5403_s22 + $0xc6] sm:$0xff]  ;;  %v3883_v40 = vld [vmem:[%s5403_s22 + $0xd3] sm:$0xff] }
 0x136   : > { %v4827_v34 = vpop.permute.xlu0 %4826  ;;  %4221 = vmatprep.subr.mxu1 %v2370_v13  ;;  %v1693_v31 = vsel %vm1137_vm1, %v1685_v45, %v4823_v11  ;;  %v1669_v43 = vsel %vm1137_vm1, %v1661_v10, %v4824_v60  ;;  %v2349_v58 = vld [vmem:[#allocation2 + $0x510] sm:$0xff]  ;;  %v2364_v47 = vld [vmem:[#allocation2 + $0x588] sm:$0xff]  ;;  %v5155_v45 = vpack.i.bf16 %v6313_v18, %v3898_v2 }
 0x137   : > { %5121 = vrot.lane.b32.xlu1 %v5120_v15, %s5276_s24  ;;  %4222 = vmatpush3.msra.mxu1 %v2354_v22  ;;  %v4829_v23 = vunpack.i.h.bf16 %v4827_v34  ;;  %v4828_v17 = vunpack.i.l.bf16 %v4827_v34  ;;  %v1701_v59 = vsel %vm1146_vm2, %v1693_v31, %v4833_v19  ;;  %v1677_v20 = vsel %vm1146_vm2, %v1669_v43, %v4834_v42  ;;  %v2365_v15 = vld [vmem:[#allocation2 + $0x590] sm:$0xff]  ;;  %v2363_v34 = vld [vmem:[#allocation2 + $0x580] sm:$0xff] }
 0x138   : > { %5116 = vrot.lane.b32.xlu0 %v6016_v14, %s5275_s23  ;;  %4223 = vmatprep.subr.mxu1 %v2369_v55  ;;  %v4842_v30 = vpop.permute.xlu1 %4841  ;;  %v5140_v14 = vpack.i.bf16 %v6022_v0, %v6240_v3  ;;  %v5160_v42 = vpack.i.bf16 %v3851_v41, %v3883_v40  ;;  %v6328_v19 = vld [vmem:[%s5403_s22 + $0x96] sm:$0xff] }
 0x139   : > { %2796 = vmatprep.mubr.f32.mxu1 %v1701_v59  ;;  %4224 = vmatpush3.msra.mxu1 %v2353_v63  ;;  %v4844_v50 = vunpack.i.h.bf16 %v4842_v30  ;;  %v4843_v35 = vunpack.i.l.bf16 %v4842_v30  ;;  %v1641_v52 = vsel %vm1128_vm0, %v6135_v38, %v4828_v17  ;;  %v1617_v44 = vsel %vm1128_vm0, %v6058_v24, %v4829_v23  ;;  %v3711_v38 = vld [vmem:[%s5403_s22 + $0x63] sm:$0xff]  ;;  %v2350_v24 = vld [vmem:[#allocation2 + $0x518] sm:$0xff]  ;;  %v3859_v59 = vld [vmem:[%s5403_s22 + $0xd0] sm:$0xff] }
 0x13a   : > { %v4837_v57 = vpop.permute.xlu0 %4836  ;;  %2797 = vmatmul.mubr.f32.gmra.mxu1 %v1677_v20  ;;  %4225 = vmatprep.subr.mxu1 %v2368_v36  ;;  %v3899_v36 = vld [vmem:[%s5403_s22 + $0xd5] sm:$0xff]  ;;  %v2347_v23 = vld [vmem:[#allocation2 + $0x500] sm:$0xff] }
 0x13b   : > { %v4839_v25 = vunpack.i.h.bf16 %v4837_v57  ;;  %v4838_v21 = vunpack.i.l.bf16 %v4837_v57  ;;  %5131 = vrot.lane.b32.xlu1 %v6083_v48, %s5275_s23  ;;  %4226 = vmatpush3.msra.mxu1 %v2352_v49  ;;  %v3891_v20 = vld [vmem:[%s5403_s22 + $0xd4] sm:$0xff] }
 0x13c   : > { %5126 = vrot.lane.b32.xlu0 %v5125_v16, %s5274_s21  ;;  %4227 = vmatprep.subr.mxu1 %v2367_v37  ;;  %v4852_v53 = vpop.permute.xlu1 %4851  ;;  %v3867_v16 = vld [vmem:[%s5403_s22 + $0xd1] sm:$0xff] }
 0x13d   : > { %v1649_v7 = vsel %vm1137_vm1, %v1641_v52, %v4838_v21  ;;  %v1625_v48 = vsel %vm1137_vm1, %v1617_v44, %v4839_v25  ;;  %4228 = vmatpush3.msra.mxu1 %v2351_v26  ;;  %v4854_v1 = vunpack.i.h.bf16 %v4852_v53  ;;  %v4853_v29 = vunpack.i.l.bf16 %v4852_v53  ;;  %v6339_v49 = vld [vmem:[%s5403_s22 + $0x92] sm:$0xff] }
 0x13e   : > { %v4847_v0 = vpop.permute.xlu0 %4846  ;;  %v1657_v3 = vsel %vm1146_vm2, %v1649_v7, %v4843_v35  ;;  %v1633_v32 = vsel %vm1146_vm2, %v1625_v48, %v4844_v50  ;;  %4229 = vmatprep.subr.mxu1 %v2366_v54  ;;  %v5170_v57 = vpack.i.bf16 %v3867_v16, %v3899_v36  ;;  %v5165_v25 = vpack.i.bf16 %v3859_v59, %v3891_v20  ;;  %v3744_v48 = vld [vmem:[%s5403_s22 + $0x80] sm:$0xff] }
 0x13f   : > { %v4849_v12 = vunpack.i.h.bf16 %v4847_v0  ;;  %v4848_v8 = vunpack.i.l.bf16 %v4847_v0  ;;  %2711 = vmatprep.mubr.f32.mxu0 %v1657_v3  ;;  %5141 = vrot.lane.b32.xlu1 %v5140_v14, %s5274_s21  ;;  %v3712_v0 = vld [vmem:[%s5403_s22 + $0x73] sm:$0xff] }
 0x140   : > { %5136 = vrot.lane.b32.xlu0 %v6210_v4, %s5276_s24  ;;  %2712 = vmatmul.mubr.f32.gmra.mxu0 %v1633_v32  ;;  %v2348_v4 = vld [vmem:[#allocation2 + $0x508] sm:$0xff] }
 0x141   : > { %v4862_v60 = vpop.permute.xlu1 %4861  ;;  %v1686_v11 = vsel %vm1128_vm0, %v3743_v46, %v4848_v8  ;;  %v1662_v39 = vsel %vm1128_vm0, %v3711_v38, %v4849_v12  ;;  %4230 = vmatpush3.msra.mxu1 %v2350_v24 }
 0x142   : > { %v4864_v13 = vunpack.i.h.bf16 %v4862_v60  ;;  %v4863_v22 = vunpack.i.l.bf16 %v4862_v60  ;;  %v4857_v9 = vpop.permute.xlu0 %4856  ;;  %4231 = vmatprep.subr.mxu1 %v2365_v15  ;;  %v1694_v10 = vsel %vm1137_vm1, %v1686_v11, %v4853_v29  ;;  %v1670_v55 = vsel %vm1137_vm1, %v1662_v39, %v4854_v1 }
 0x143   : > { %5151 = vrot.lane.b32.xlu1 %v6259_v5, %s5276_s24  ;;  %4232 = vmatpush3.msra.mxu1 %v2349_v58  ;;  %v4859_v63 = vunpack.i.h.bf16 %v4857_v9  ;;  %v4858_v31 = vunpack.i.l.bf16 %v4857_v9 }
 0x144   : > { %5146 = vrot.lane.b32.xlu0 %v6266_v33, %s5275_s23  ;;  %v1702_v43 = vsel %vm1146_vm2, %v1694_v10, %v4863_v22  ;;  %v1678_v5 = vsel %vm1146_vm2, %v1670_v55, %v4864_v13  ;;  %4233 = vmatprep.subr.mxu1 %v2364_v47  ;;  %v3772_v13 = vld [vmem:[%s5403_s22 + $0x44] sm:$0xff]  ;;  %v3804_v22 = vld [vmem:[%s5403_s22 + $0x51] sm:$0xff] }
 0x145   : > { %v4872_v17 = vpop.permute.xlu1 %4871  ;;  %2801 = vmatprep.mubr.f32.mxu1 %v1702_v43  ;;  %4234 = vmatpush3.msra.mxu1 %v2348_v4  ;;  %v1642_v26 = vsel %vm1128_vm0, %v6328_v19, %v4858_v31  ;;  %v1618_v21 = vsel %vm1128_vm0, %v6339_v49, %v4859_v63 }
 0x146   : > { %v4874_v30 = vunpack.i.h.bf16 %v4872_v17  ;;  %v4873_v37 = vunpack.i.l.bf16 %v4872_v17  ;;  %v4867_v50 = vpop.permute.xlu0 %4866  ;;  %2802 = vmatmul.mubr.f32.gmra.mxu1 %v1678_v5  ;;  %4235 = vmatprep.subr.mxu1 %v2363_v34  ;;  %v3713_v17 = vld [vmem:[%s5403_s22 + $0x83] sm:$0xff] }
 0x147   : > { %v4869_v33 = vunpack.i.h.bf16 %v4867_v50  ;;  %v4868_v35 = vunpack.i.l.bf16 %v4867_v50  ;;  %5161 = vrot.lane.b32.xlu1 %v5160_v42, %s5275_s23  ;;  %4236 = vmatpush3.msra.mxu1 %v2347_v23  ;;  %v2381_v50 = vld [vmem:[#allocation2 + $0x610] sm:$0xff] }
 0x148   : > { %5156 = vrot.lane.b32.xlu0 %v5155_v45, %s5274_s21 }
 0x149   : > { %v4882_v14 = vpop.permute.xlu1 %4881  ;;  %v1650_v54 = vsel %vm1137_vm1, %v1642_v26, %v4868_v35  ;;  %v1626_v52 = vsel %vm1137_vm1, %v1618_v21, %v4869_v33 }
 0x14a   : > { %v4877_v44 = vpop.permute.xlu0 %4876  ;;  %v1658_v53 = vsel %vm1146_vm2, %v1650_v54, %v4873_v37  ;;  %v1634_v7 = vsel %vm1146_vm2, %v1626_v52, %v4874_v30  ;;  %v4884_v46 = vunpack.i.h.bf16 %v4882_v14  ;;  %v4883_v38 = vunpack.i.l.bf16 %v4882_v14  ;;  %v2380_v14 = vld [vmem:[#allocation2 + $0x608] sm:$0xff] }
 0x14b   : > { %v4879_v3 = vunpack.i.h.bf16 %v4877_v44  ;;  %v4878_v32 = vunpack.i.l.bf16 %v4877_v44  ;;  %2716 = vmatprep.mubr.f32.mxu0 %v1658_v53  ;;  %5171 = vrot.lane.b32.xlu1 %v5170_v57, %s5274_s21 }
 0x14c   : > { %5166 = vrot.lane.b32.xlu0 %v5165_v25, %s5276_s24  ;;  %2717 = vmatmul.mubr.f32.gmra.mxu0 %v1634_v7 }
 0x14d   : > { %v4892_v24 = vpop.permute.xlu1 %4891  ;;  %v1687_v1 = vsel %vm1128_vm0, %v3744_v48, %v4878_v32  ;;  %v1663_v29 = vsel %vm1128_vm0, %v3712_v0, %v4879_v3  ;;  %v2379_v48 = vld [vmem:[#allocation2 + $0x600] sm:$0xff]  ;;  %v3773_v3 = vld [vmem:[%s5403_s22 + $0x54] sm:$0xff] }
 0x14e   : > { %v4887_v12 = vpop.permute.xlu0 %4886  ;;  %v1695_v15 = vsel %vm1137_vm1, %v1687_v1, %v4883_v38  ;;  %v1671_v41 = vsel %vm1137_vm1, %v1663_v29, %v4884_v46  ;;  %v4894_v11 = vunpack.i.h.bf16 %v4892_v24  ;;  %v4893_v39 = vunpack.i.l.bf16 %v4892_v24  ;;  %v3805_v0 = vld [vmem:[%s5403_s22 + $0x61] sm:$0xff] }
 0x14f   : > { %v4889_v8 = vunpack.i.h.bf16 %v4887_v12  ;;  %v4888_v2 = vunpack.i.l.bf16 %v4887_v12 }
 0x150   : > { %v2091_v10 = vsel %vm1128_vm0, %v3772_v13, %v4894_v11  ;;  %v2115_v42 = vsel %vm1128_vm0, %v3804_v22, %v4893_v39 }
 0x151   : > { %v4902_v40 = vpop.permute.xlu1 %4901  ;;  %v1703_v58 = vsel %vm1146_vm2, %v1695_v15, %v4888_v2  ;;  %v1679_v60 = vsel %vm1146_vm2, %v1671_v41, %v4889_v8 }
 0x152   : > { %v4897_v47 = vpop.permute.xlu0 %4896  ;;  %2806 = vmatprep.mubr.f32.mxu1 %v1703_v58  ;;  %v4904_v34 = vunpack.i.h.bf16 %v4902_v40  ;;  %v4903_v63 = vunpack.i.l.bf16 %v4902_v40 }
 0x153   : > { %2807 = vmatmul.mubr.f32.gmra.mxu1 %v1679_v60  ;;  %v4899_v9 = vunpack.i.h.bf16 %v4897_v47  ;;  %v4898_v45 = vunpack.i.l.bf16 %v4897_v47 }
 0x154   : > { %v1688_v57 = vsel %vm1128_vm0, %v6130_v56, %v4903_v63  ;;  %v1664_v26 = vsel %vm1128_vm0, %v3713_v17, %v4904_v34 }
 0x155   : > { %v4912_v4 = vpop.permute.xlu1 %4911  ;;  %v2099_v5 = vsel %vm1137_vm1, %v2091_v10, %v4899_v9  ;;  %v2123_v23 = vsel %vm1137_vm1, %v2115_v42, %v4898_v45 }
 0x156   : > { %v4907_v55 = vpop.permute.xlu0 %4906  ;;  %v4914_v16 = vunpack.i.h.bf16 %v4912_v4  ;;  %v4913_v36 = vunpack.i.l.bf16 %v4912_v4 }
 0x157   : > { %v4909_v31 = vunpack.i.h.bf16 %v4907_v55  ;;  %v4908_v43 = vunpack.i.l.bf16 %v4907_v55 }
 0x158   : > { %v1696_v25 = vsel %vm1137_vm1, %v1688_v57, %v4913_v36  ;;  %v1672_v21 = vsel %vm1137_vm1, %v1664_v26, %v4914_v16  ;;  %v3774_v16 = vld [vmem:[%s5403_s22 + $0x64] sm:$0xff] }
 0x159   : > { %v4922_v59 = vpop.permute.xlu1 %4921  ;;  %v2131_v20 = vsel %vm1146_vm2, %v2123_v23, %v4908_v43  ;;  %v2107_v30 = vsel %vm1146_vm2, %v2099_v5, %v4909_v31  ;;  %v3806_v5 = vld [vmem:[%s5403_s22 + $0x71] sm:$0xff] }
 0x15a   : > { %v4917_v37 = vpop.permute.xlu0 %4916  ;;  %2891 = vmatprep.mubr.f32.mxu0 %v2131_v20  ;;  %v4924_v53 = vunpack.i.h.bf16 %v4922_v59  ;;  %v4923_v7 = vunpack.i.l.bf16 %v4922_v59 }
 0x15b   : > { %v4919_v33 = vunpack.i.h.bf16 %v4917_v37  ;;  %v4918_v35 = vunpack.i.l.bf16 %v4917_v37  ;;  %2892 = vmatmul.mubr.f32.vlgmr.msra.gmra.mxu0 %v2107_v30 }
 0x15c   : > { %4308 = vmatpush3.msra.mxu0 %v6197_v62  ;;  %v2116_v24 = vsel %vm1128_vm0, %v3805_v0, %v4923_v7  ;;  %v2092_v1 = vsel %vm1128_vm0, %v3773_v3, %v4924_v53 }
 0x15d   : > { %v4932_v54 = vpop.permute.xlu1 %4931  ;;  %v1704_v52 = vsel %vm1146_vm2, %v1696_v25, %v4918_v35  ;;  %v1680_v44 = vsel %vm1146_vm2, %v1672_v21, %v4919_v33  ;;  %4309 = vmatprep.subr.mxu0 %v2381_v50 }
 0x15e   : > { %v4927_v56 = vpop.permute.xlu0 %4926  ;;  %2811 = vmatprep.mubr.f32.mxu1 %v1704_v52  ;;  %4310 = vmatpush3.msra.mxu0 %v2381_v50  ;;  %v4934_v29 = vunpack.i.h.bf16 %v4932_v54  ;;  %v4933_v12 = vunpack.i.l.bf16 %v4932_v54  ;;  %v3715_v52 = vld [vmem:[%s5403_s22 + $0xa3] sm:$0xff] }
 0x15f   : > { %2812 = vmatmul.mubr.f32.gmra.mxu1 %v1680_v44  ;;  %4311 = vmatprep.subr.mxu0 %v2380_v14  ;;  %v4929_v32 = vunpack.i.h.bf16 %v4927_v56  ;;  %v4928_v46 = vunpack.i.l.bf16 %v4927_v56 }
 0x160   : > { %4312 = vmatpush3.msra.mxu0 %v2380_v14  ;;  %v1689_v9 = vsel %vm1128_vm0, %v6262_v51, %v4933_v12  ;;  %v1665_v45 = vsel %vm1128_vm0, %v6222_v6, %v4934_v29 }
 0x161   : > { %v4942_v62 = vpop.permute.xlu1 %4941  ;;  %4313 = vmatprep.subr.mxu0 %v2379_v48  ;;  %v2124_v40 = vsel %vm1137_vm1, %v2116_v24, %v4928_v46  ;;  %v2100_v58 = vsel %vm1137_vm1, %v2092_v1, %v4929_v32 }
 0x162   : > { %v4937_v38 = vpop.permute.xlu0 %4936  ;;  %4314 = vmatpush3.msra.mxu0 %v2379_v48  ;;  %v4944_v15 = vunpack.i.h.bf16 %v4942_v62  ;;  %v4943_v41 = vunpack.i.l.bf16 %v4942_v62 }
 0x163   : > { %v4939_v8 = vunpack.i.h.bf16 %v4937_v38  ;;  %v4938_v2 = vunpack.i.l.bf16 %v4937_v38 }
 0x164   : > { %v1697_v4 = vsel %vm1137_vm1, %v1689_v9, %v4943_v41  ;;  %v1673_v10 = vsel %vm1137_vm1, %v1665_v45, %v4944_v15  ;;  %v3807_v15 = vld [vmem:[%s5403_s22 + $0x81] sm:$0xff] }
 0x165   : > { %v4952_v60 = vpop.permute.xlu1 %4951  ;;  %v2132_v11 = vsel %vm1146_vm2, %v2124_v40, %v4938_v2  ;;  %v2108_v39 = vsel %vm1146_vm2, %v2100_v58, %v4939_v8 }
 0x166   : > { %v4947_v47 = vpop.permute.xlu0 %4946  ;;  %2896 = vmatprep.mubr.f32.mxu0 %v2132_v11  ;;  %v4954_v63 = vunpack.i.h.bf16 %v4952_v60  ;;  %v4953_v31 = vunpack.i.l.bf16 %v4952_v60 }
 0x167   : > { %v4949_v13 = vunpack.i.h.bf16 %v4947_v47  ;;  %v4948_v22 = vunpack.i.l.bf16 %v4947_v47  ;;  %2897 = vmatmul.mubr.f32.gmra.mxu0 %v2108_v39 }
 0x168   : > { %v2117_v30 = vsel %vm1128_vm0, %v3806_v5, %v4953_v31  ;;  %v2093_v37 = vsel %vm1128_vm0, %v3774_v16, %v4954_v63  ;;  %v3868_v31 = vld [vmem:[%s5403_s22 + $0x62] sm:$0xff] }
 0x169   : > { %v4962_v55 = vpop.permute.xlu1 %4961  ;;  %v1705_v42 = vsel %vm1146_vm2, %v1697_v4, %v4948_v22  ;;  %v1681_v34 = vsel %vm1146_vm2, %v1673_v10, %v4949_v13 }
 0x16a   : > { %v4957_v43 = vpop.permute.xlu0 %4956  ;;  %2816 = vmatprep.mubr.f32.mxu1 %v1705_v42  ;;  %v4963_v17 = vunpack.i.l.bf16 %v4962_v55  ;;  %v4964_v50 = vunpack.i.h.bf16 %v4962_v55  ;;  %v3836_v42 = vld [vmem:[%s5403_s22 + $0x55] sm:$0xff] }
 0x16b   : > { %2817 = vmatmul.mubr.f32.gmra.mxu1 %v1681_v34  ;;  %v4959_v51 = vunpack.i.h.bf16 %v4957_v43  ;;  %v4958_v36 = vunpack.i.l.bf16 %v4957_v43 }
 0x16c   : > { %v3957_v23 = vpop.f32.mrf.mxu0  ;;  %v1690_v0 = vsel %vm1128_vm0, %v6204_v27, %v4963_v17  ;;  %v1666_v62 = vsel %vm1128_vm0, %v3715_v52, %v4964_v50  ;;  %v3775_v27 = vld [vmem:[%s5403_s22 + $0x74] sm:$0xff]  ;;  %v3776_v52 = vld [vmem:[%s5403_s22 + $0x84] sm:$0xff] }
 0x16d   : > { %v4972_v6 = vpop.permute.xlu1 %4971  ;;  %v2125_v14 = vsel %vm1137_vm1, %v2117_v30, %v4958_v36  ;;  %v2101_v54 = vsel %vm1137_vm1, %v2093_v37, %v4959_v51 }
 0x16e   : > { %v4967_v59 = vpop.permute.xlu0 %4966  ;;  %v3958_v20 = vpop.f32.mrf.mxu0  ;;  %v4974_v26 = vunpack.i.h.bf16 %v4972_v6  ;;  %v4973_v25 = vunpack.i.l.bf16 %v4972_v6 }
 0x16f   : > { %v4969_v33 = vunpack.i.h.bf16 %v4967_v59  ;;  %v4968_v35 = vunpack.i.l.bf16 %v4967_v59  ;;  %v6398_v57 = vadd.f32 %v3958_v20, %v3957_v23 }
 0x170   : > { %v3960_v21 = vpop.f32.mrf.mxu0  ;;  %v1698_v1 = vsel %vm1137_vm1, %v1690_v0, %v4973_v25  ;;  %v1674_v29 = vsel %vm1137_vm1, %v1666_v62, %v4974_v26 }
 0x171   : > { %v4982_v44 = vpop.permute.xlu1 %4981  ;;  %v2133_v53 = vsel %vm1146_vm2, %v2125_v14, %v4968_v35  ;;  %v2109_v7 = vsel %vm1146_vm2, %v2101_v54, %v4969_v33 }
 0x172   : > { %v4977_v56 = vpop.permute.xlu0 %4976  ;;  %v3961_v48 = vpop.f32.mrf.mxu0  ;;  %2901 = vmatprep.mubr.f32.mxu0 %v2133_v53  ;;  %v4984_v38 = vunpack.i.h.bf16 %v4982_v44  ;;  %v4983_v24 = vunpack.i.l.bf16 %v4982_v44 }
 0x173   : > { %v4979_v3 = vunpack.i.h.bf16 %v4977_v56  ;;  %v4978_v32 = vunpack.i.l.bf16 %v4977_v56  ;;  %v6407_v46 = vadd.f32 %v3961_v48, %v3960_v21  ;;  %2902 = vmatmul.mubr.f32.gmra.mxu0 %v2109_v7 }
 0x174   : > { %v2118_v47 = vsel %vm1128_vm0, %v3807_v15, %v4983_v24  ;;  %v2094_v13 = vsel %vm1128_vm0, %v3775_v27, %v4984_v38  ;;  %v3869_v27 = vld [vmem:[%s5403_s22 + $0x72] sm:$0xff] }
 0x175   : > { %v4992_v12 = vpop.permute.xlu1 %4991  ;;  %v1706_v8 = vsel %vm1146_vm2, %v1698_v1, %v4978_v32  ;;  %v1682_v2 = vsel %vm1146_vm2, %v1674_v29, %v4979_v3 }
 0x176   : > { %v4993_v41 = vunpack.i.l.bf16 %v4992_v12  ;;  %v4987_v40 = vpop.permute.xlu0 %4986  ;;  %2821 = vmatprep.mubr.f32.mxu1 %v1706_v8  ;;  %v4994_v58 = vunpack.i.h.bf16 %v4992_v12 }
 0x177   : > { %v4989_v60 = vunpack.i.h.bf16 %v4987_v40  ;;  %v4988_v11 = vunpack.i.l.bf16 %v4987_v40  ;;  %v3963_v39 = vpop.f32.mrf.mxu0  ;;  %2822 = vmatmul.mubr.f32.gmra.mxu1 %v1682_v2 }
 0x179   : > { %v3964_v22 = vpop.f32.mrf.mxu0  ;;  %v5002_v9 = vpop.permute.xlu1 %5001  ;;  %v2126_v45 = vsel %vm1137_vm1, %v2118_v47, %v4988_v11  ;;  %v2102_v4 = vsel %vm1137_vm1, %v2094_v13, %v4989_v60 }
 0x17a   : > { %v6420_v10 = vadd.f32 %v3964_v22, %v3963_v39  ;;  %v5004_v55 = vunpack.i.h.bf16 %v5002_v9  ;;  %v4997_v34 = vpop.permute.xlu0 %4996  ;;  %v2134_v63 = vsel %vm1146_vm2, %v2126_v45, %v4993_v41  ;;  %v5003_v43 = vunpack.i.l.bf16 %v5002_v9  ;;  %v3837_v41 = vld [vmem:[%s5403_s22 + $0x65] sm:$0xff] }
 0x17b   : > { %v4999_v5 = vunpack.i.h.bf16 %v4997_v34  ;;  %v4998_v16 = vunpack.i.l.bf16 %v4997_v34  ;;  %2906 = vmatprep.mubr.f32.mxu0 %v2134_v63  ;;  %v2110_v51 = vsel %vm1146_vm2, %v2102_v4, %v4994_v58 }
 0x17c   : > { %v3966_v36 = vpop.f32.mrf.mxu0  ;;  %2907 = vmatmul.mubr.f32.gmra.mxu0 %v2110_v51 }
 0x17d   : > { %v2139_v23 = vsel %vm1128_vm0, %v3836_v42, %v4999_v5  ;;  %v5012_v6 = vpop.permute.xlu1 %5011  ;;  %v2163_v17 = vsel %vm1128_vm0, %v3868_v31, %v4998_v16  ;;  %v3777_v16 = vld [vmem:[%s5403_s22 + $0x94] sm:$0xff] }
 0x17e   : > { %v5014_v59 = vunpack.i.h.bf16 %v5012_v6  ;;  %v5013_v20 = vunpack.i.l.bf16 %v5012_v6  ;;  %v5007_v30 = vpop.permute.xlu0 %5006  ;;  %v3967_v37 = vpop.f32.mrf.mxu0  ;;  %v2171_v33 = vsel %vm1137_vm1, %v2163_v17, %v5003_v43  ;;  %v2147_v35 = vsel %vm1137_vm1, %v2139_v23, %v5004_v55 }
 0x17f   : > { %v6428_v50 = vadd.f32 %v3967_v37, %v3966_v36  ;;  %v5009_v26 = vunpack.i.h.bf16 %v5007_v30  ;;  %v5008_v25 = vunpack.i.l.bf16 %v5007_v30 }
 0x180   : > { %v2179_v21 = vsel %vm1146_vm2, %v2171_v33, %v5013_v20  ;;  %v2155_v14 = vsel %vm1146_vm2, %v2147_v35, %v5014_v59 }
 0x181   : > { %v5022_v54 = vpop.permute.xlu1 %5021  ;;  %2996 = vmatprep.mubr.f32.mxu1 %v2179_v21  ;;  %v4013_v56 = vpop.f32.mrf.mxu1  ;;  %v2119_v32 = vsel %vm1128_vm0, %v6232_v28, %v5008_v25  ;;  %v2095_v62 = vsel %vm1128_vm0, %v3776_v52, %v5009_v26 }
 0x182   : > { %v5024_v44 = vunpack.i.h.bf16 %v5022_v54  ;;  %v5023_v53 = vunpack.i.l.bf16 %v5022_v54  ;;  %v5017_v7 = vpop.permute.xlu0 %5016  ;;  %2997 = vmatmul.mubr.f32.vlgmr.msra.gmra.mxu1 %v2155_v14 }
 0x183   : > { %v5019_v48 = vunpack.i.h.bf16 %v5017_v7  ;;  %v5018_v0 = vunpack.i.l.bf16 %v5017_v7  ;;  %v4014_v3 = vpop.f32.mrf.mxu1 }
 0x184   : > { %v4015_v38 = vadd.f32 %v4014_v3, %v4013_v56 }
 0x185   : > { %v5032_v24 = vpop.permute.xlu1 %5031  ;;  %v2127_v1 = vsel %vm1137_vm1, %v2119_v32, %v5018_v0  ;;  %v2103_v29 = vsel %vm1137_vm1, %v2095_v62, %v5019_v48 }
 0x186   : > { %v5034_v12 = vunpack.i.h.bf16 %v5032_v24  ;;  %v5027_v8 = vpop.permute.xlu0 %5026  ;;  %v2135_v2 = vsel %vm1146_vm2, %v2127_v1, %v5023_v53  ;;  %v2111_v15 = vsel %vm1146_vm2, %v2103_v29, %v5024_v44  ;;  %v6445_v40 = vadd.f32 %v4015_v38, %v6398_v57  ;;  %v3870_v44 = vld [vmem:[%s5403_s22 + $0x82] sm:$0xff]  ;;  %v3838_v53 = vld [vmem:[%s5403_s22 + $0x75] sm:$0xff] }
 0x187   : > { %v5033_v28 = vunpack.i.l.bf16 %v5032_v24  ;;  %v5029_v58 = vunpack.i.h.bf16 %v5027_v8  ;;  %v5028_v60 = vunpack.i.l.bf16 %v5027_v8  ;;  %2911 = vmatprep.mubr.f32.mxu0 %v2135_v2 }
 0x188   : > { %v3969_v11 = vpop.f32.mrf.mxu0  ;;  %2912 = vmatmul.mubr.f32.gmra.mxu0 %v2111_v15 }
 0x189   : > { %v5042_v39 = vpop.permute.xlu1 %5041  ;;  %v2164_v47 = vsel %vm1128_vm0, %v3869_v27, %v5028_v60  ;;  %v2140_v13 = vsel %vm1128_vm0, %v3837_v41, %v5029_v58  ;;  %v3810_v58 = vld [vmem:[%s5403_s22 + $0xb1] sm:$0xff]  ;;  %v3778_v60 = vld [vmem:[%s5403_s22 + $0xa4] sm:$0xff] }
 0x18a   : > { %v5044_v22 = vunpack.i.h.bf16 %v5042_v39  ;;  %v5043_v9 = vunpack.i.l.bf16 %v5042_v39  ;;  %v5037_v45 = vpop.permute.xlu0 %5036  ;;  %v3970_v4 = vpop.f32.mrf.mxu0  ;;  %v2172_v57 = vsel %vm1137_vm1, %v2164_v47, %v5033_v28  ;;  %v2148_v42 = vsel %vm1137_vm1, %v2140_v13, %v5034_v12 }
 0x18b   : > { %v6449_v55 = vadd.f32 %v3970_v4, %v3969_v11  ;;  %v5039_v34 = vunpack.i.h.bf16 %v5037_v45  ;;  %v5038_v63 = vunpack.i.l.bf16 %v5037_v45 }
 0x18c   : > { %v2180_v31 = vsel %vm1146_vm2, %v2172_v57, %v5043_v9  ;;  %v2156_v43 = vsel %vm1146_vm2, %v2148_v42, %v5044_v22 }
 0x18d   : > { %v5052_v5 = vpop.permute.xlu1 %5051  ;;  %3001 = vmatprep.mubr.f32.mxu1 %v2180_v31  ;;  %v2120_v30 = vsel %vm1128_vm0, %v6283_v61, %v5038_v63  ;;  %v2096_v37 = vsel %vm1128_vm0, %v3777_v16, %v5039_v34 }
 0x18e   : > { %v5054_v51 = vunpack.i.h.bf16 %v5052_v5  ;;  %v5053_v36 = vunpack.i.l.bf16 %v5052_v5  ;;  %v5047_v23 = vpop.permute.xlu0 %5046  ;;  %v4016_v6 = vpop.f32.mrf.mxu1  ;;  %3002 = vmatmul.mubr.f32.gmra.mxu1 %v2156_v43 }
 0x18f   : > { %v5049_v17 = vunpack.i.h.bf16 %v5047_v23  ;;  %v5048_v59 = vunpack.i.l.bf16 %v5047_v23 }
 0x190   : > { %v4017_v20 = vpop.f32.mrf.mxu1 }
 0x191   : > { %v4018_v33 = vadd.f32 %v4017_v20, %v4016_v6  ;;  %v5062_v35 = vpop.permute.xlu1 %5061  ;;  %v2128_v26 = vsel %vm1137_vm1, %v2120_v30, %v5048_v59  ;;  %v2104_v25 = vsel %vm1137_vm1, %v2096_v37, %v5049_v17 }
 0x192   : > { %v5064_v21 = vunpack.i.h.bf16 %v5062_v35  ;;  %v5057_v14 = vpop.permute.xlu0 %5056  ;;  %v2136_v54 = vsel %vm1146_vm2, %v2128_v26, %v5053_v36  ;;  %v2112_v52 = vsel %vm1146_vm2, %v2104_v25, %v5054_v51  ;;  %v5063_v61 = vunpack.i.l.bf16 %v5062_v35  ;;  %v3839_v36 = vld [vmem:[%s5403_s22 + $0x85] sm:$0xff] }
 0x193   : > { %v6466_v7 = vadd.f32 %v4018_v33, %v6407_v46  ;;  %v5059_v56 = vunpack.i.h.bf16 %v5057_v14  ;;  %v5058_v48 = vunpack.i.l.bf16 %v5057_v14  ;;  %2916 = vmatprep.mubr.f32.mxu0 %v2136_v54 }
 0x194   : > { %v3972_v0 = vpop.f32.mrf.mxu0  ;;  %2917 = vmatmul.mubr.f32.gmra.mxu0 %v2112_v52 }
 0x195   : > { %v5072_v3 = vpop.permute.xlu1 %5071  ;;  %v2165_v32 = vsel %vm1128_vm0, %v3870_v44, %v5058_v48  ;;  %v2141_v62 = vsel %vm1128_vm0, %v3838_v53, %v5059_v56  ;;  %v3779_v56 = vld [vmem:[%s5403_s22 + $0xb4] sm:$0xff] }
 0x196   : > { %v5074_v38 = vunpack.i.h.bf16 %v5072_v3  ;;  %v5073_v24 = vunpack.i.l.bf16 %v5072_v3  ;;  %v5067_v1 = vpop.permute.xlu0 %5066  ;;  %v3973_v29 = vpop.f32.mrf.mxu0  ;;  %v2173_v46 = vsel %vm1137_vm1, %v2165_v32, %v5063_v61  ;;  %v2149_v8 = vsel %vm1137_vm1, %v2141_v62, %v5064_v21 }
 0x197   : > { %v6470_v12 = vadd.f32 %v3973_v29, %v3972_v0  ;;  %v5069_v2 = vunpack.i.h.bf16 %v5067_v1  ;;  %v5068_v15 = vunpack.i.l.bf16 %v5067_v1 }
 0x198   : > { %v2181_v27 = vsel %vm1146_vm2, %v2173_v46, %v5073_v24  ;;  %v2157_v41 = vsel %vm1146_vm2, %v2149_v8, %v5074_v38 }
 0x199   : > { %v5082_v28 = vpop.permute.xlu1 %5081  ;;  %3006 = vmatprep.mubr.f32.mxu1 %v2181_v27  ;;  %v2121_v4 = vsel %vm1128_vm0, %v3810_v58, %v5068_v15  ;;  %v2097_v57 = vsel %vm1128_vm0, %v3778_v60, %v5069_v2  ;;  %v3900_v58 = vld [vmem:[%s5403_s22 + $0x66] sm:$0xff] }
 0x19a   : > { %v5084_v11 = vunpack.i.h.bf16 %v5082_v28  ;;  %v5083_v39 = vunpack.i.l.bf16 %v5082_v28  ;;  %v5077_v47 = vpop.permute.xlu0 %5076  ;;  %v4019_v13 = vpop.f32.mrf.mxu1  ;;  %3007 = vmatmul.mubr.f32.gmra.mxu1 %v2157_v41  ;;  %v3872_v60 = vld [vmem:[%s5403_s22 + $0xa2] sm:$0xff] }
 0x19b   : > { %v5079_v22 = vunpack.i.h.bf16 %v5077_v47  ;;  %v5078_v9 = vunpack.i.l.bf16 %v5077_v47 }
 0x19c   : > { %v4020_v45 = vpop.f32.mrf.mxu1 }
 0x19d   : > { %v4021_v42 = vadd.f32 %v4020_v45, %v4019_v13  ;;  %v5092_v34 = vpop.permute.xlu1 %5091  ;;  %v2129_v63 = vsel %vm1137_vm1, %v2121_v4, %v5078_v9  ;;  %v2105_v31 = vsel %vm1137_vm1, %v2097_v57, %v5079_v22  ;;  %v3901_v4 = vld [vmem:[%s5403_s22 + $0x76] sm:$0xff] }
 0x19e   : > { %v5094_v43 = vunpack.i.h.bf16 %v5092_v34  ;;  %v5087_v5 = vpop.permute.xlu0 %5086  ;;  %v2137_v16 = vsel %vm1146_vm2, %v2129_v63, %v5083_v39  ;;  %v2113_v51 = vsel %vm1146_vm2, %v2105_v31, %v5084_v11  ;;  %v5093_v6 = vunpack.i.l.bf16 %v5092_v34  ;;  %v3840_v11 = vld [vmem:[%s5403_s22 + $0x95] sm:$0xff]  ;;  %v3902_v63 = vld [vmem:[%s5403_s22 + $0x86] sm:$0xff] }
 0x19f   : > { %v6486_v23 = vadd.f32 %v4021_v42, %v6420_v10  ;;  %v5089_v17 = vunpack.i.h.bf16 %v5087_v5  ;;  %v5088_v59 = vunpack.i.l.bf16 %v5087_v5  ;;  %2921 = vmatprep.mubr.f32.mxu0 %v2137_v16 }
 0x1a0   : > { %v3975_v20 = vpop.f32.mrf.mxu0  ;;  %2922 = vmatmul.mubr.f32.gmra.mxu0 %v2113_v51 }
 0x1a1   : > { %v5102_v30 = vpop.permute.xlu1 %5101  ;;  %v2166_v37 = vsel %vm1128_vm0, %v6339_v49, %v5088_v59  ;;  %v2142_v33 = vsel %vm1128_vm0, %v3839_v36, %v5089_v17 }
 0x1a2   : > { %v5104_v35 = vunpack.i.h.bf16 %v5102_v30  ;;  %v5103_v26 = vunpack.i.l.bf16 %v5102_v30  ;;  %v5097_v25 = vpop.permute.xlu0 %5096  ;;  %v3976_v21 = vpop.f32.mrf.mxu0  ;;  %v2174_v10 = vsel %vm1137_vm1, %v2166_v37, %v5093_v6  ;;  %v2150_v54 = vsel %vm1137_vm1, %v2142_v33, %v5094_v43  ;;  %v3873_v30 = vld [vmem:[%s5403_s22 + $0xb2] sm:$0xff]  ;;  %v3841_v37 = vld [vmem:[%s5403_s22 + $0xa5] sm:$0xff] }
 0x1a3   : > { %v6491_v14 = vadd.f32 %v3976_v21, %v3975_v20  ;;  %v5099_v52 = vunpack.i.h.bf16 %v5097_v25  ;;  %v5098_v44 = vunpack.i.l.bf16 %v5097_v25 }
 0x1a4   : > { %v2182_v53 = vsel %vm1146_vm2, %v2174_v10, %v5103_v26  ;;  %v2158_v61 = vsel %vm1146_vm2, %v2150_v54, %v5104_v35  ;;  %v3904_v26 = vld [vmem:[%s5403_s22 + $0xa6] sm:$0xff] }
 0x1a5   : > { %6875 = vst [vmem:[#allocation8_spill] sm:$0xff] %v6491_v14  ;;  %3011 = vmatprep.mubr.f32.mxu1 %v2182_v53  ;;  %v5112_v49 = vpop.permute.xlu1 %5111  ;;  %v2122_v1 = vsel %vm1128_vm0, %v6313_v18, %v5098_v44  ;;  %v2098_v29 = vsel %vm1128_vm0, %v3779_v56, %v5099_v52 }
 0x1a6   : > { %v5107_v48 = vpop.permute.xlu0 %5106  ;;  %v5114_v0 = vunpack.i.h.bf16 %v5112_v49  ;;  %v5113_v3 = vunpack.i.l.bf16 %v5112_v49  ;;  %v4022_v32 = vpop.f32.mrf.mxu1  ;;  %3012 = vmatmul.mubr.f32.gmra.mxu1 %v2158_v61 }
 0x1a7   : > { %v5109_v62 = vunpack.i.h.bf16 %v5107_v48  ;;  %v5108_v38 = vunpack.i.l.bf16 %v5107_v48  ;;  %v3905_v48 = vld [vmem:[%s5403_s22 + $0xb6] sm:$0xff] }
 0x1a8   : > { %v4023_v24 = vpop.f32.mrf.mxu1 }
 0x1a9   : > { %v4024_v46 = vadd.f32 %v4023_v24, %v4022_v32  ;;  %v5122_v8 = vpop.permute.xlu1 %5121  ;;  %v2130_v2 = vsel %vm1137_vm1, %v2122_v1, %v5108_v38  ;;  %v2106_v15 = vsel %vm1137_vm1, %v2098_v29, %v5109_v62  ;;  %v3874_v62 = vld [vmem:[%s5403_s22 + $0xc2] sm:$0xff] }
 0x1aa   : > { %v5117_v27 = vpop.permute.xlu0 %5116  ;;  %v2138_v41 = vsel %vm1146_vm2, %v2130_v2, %v5113_v3  ;;  %v2114_v28 = vsel %vm1146_vm2, %v2106_v15, %v5114_v0  ;;  %v5124_v13 = vunpack.i.h.bf16 %v5122_v8  ;;  %v5123_v22 = vunpack.i.l.bf16 %v5122_v8  ;;  %v3906_v38 = vld [vmem:[%s5403_s22 + $0xc6] sm:$0xff] }
 0x1ab   : > { %v6509_v18 = vadd.f32 %v4024_v46, %v6428_v50  ;;  %v5119_v39 = vunpack.i.h.bf16 %v5117_v27  ;;  %v5118_v47 = vunpack.i.l.bf16 %v5117_v27  ;;  %2926 = vmatprep.mubr.f32.mxu0 %v2138_v41 }
 0x1ac   : > { %v3978_v9 = vpop.f32.mrf.mxu0  ;;  %2927 = vmatmul.mubr.f32.gmra.mxu0 %v2114_v28  ;;  %v3907_v28 = vld [vmem:[%s5403_s22 + $0xd6] sm:$0xff] }
 0x1ad   : > { %v5132_v45 = vpop.permute.xlu1 %5131  ;;  %4315 = vmatprep.mubr.msk.f32.mxu0 %vm1128_vm0, %v3900_v58  ;;  %v2167_v57 = vsel %vm1128_vm0, %v3872_v60, %v5118_v47  ;;  %v2143_v42 = vsel %vm1128_vm0, %v3840_v11, %v5119_v39 }
 0x1ae   : > { %v5127_v34 = vpop.permute.xlu0 %5126  ;;  %v3979_v50 = vpop.f32.mrf.mxu0  ;;  %v5134_v16 = vunpack.i.h.bf16 %v5132_v45  ;;  %v5133_v51 = vunpack.i.l.bf16 %v5132_v45  ;;  %v2175_v36 = vsel %vm1137_vm1, %v2167_v57, %v5123_v22  ;;  %v2151_v6 = vsel %vm1137_vm1, %v2143_v42, %v5124_v13  ;;  %v3843_v57 = vld [vmem:[%s5403_s22 + $0xc5] sm:$0xff] }
 0x1af   : > { %v5129_v31 = vunpack.i.h.bf16 %v5127_v34  ;;  %v5128_v43 = vunpack.i.l.bf16 %v5127_v34  ;;  %v6516_v5 = vadd.f32 %v3979_v50, %v3978_v9 }
 0x1b0   : > { %4316 = vmatmul.mubr.msk.f32.vlgmr.msra.gmra.mxu0 %vm1128_vm0, %v3901_v4  ;;  %v2168_v52 = vsel %vm1128_vm0, %v3873_v30, %v5133_v51  ;;  %v2144_v44 = vsel %vm1128_vm0, %v3841_v37, %v5134_v16  ;;  %v3875_v4 = vld [vmem:[%s5403_s22 + $0xd2] sm:$0xff]  ;;  %v3206_v37 = vld [vmem:[%s6864_s4 + $0x68] sm:$0xff] }
 0x1b1   : > { %6876 = vst [vmem:[#allocation9_spill] sm:$0xff] %v6516_v5  ;;  %v2183_v17 = vsel %vm1146_vm2, %v2175_v36, %v5128_v43  ;;  %v5142_v59 = vpop.permute.xlu1 %5141  ;;  %v2159_v20 = vsel %vm1146_vm2, %v2151_v6, %v5129_v31  ;;  %4318 = vmatprep.mubr.msk.f32.mxu0 %vm1128_vm0, %v3902_v63  ;;  %v3207_v30 = vld [vmem:[%s6864_s4 + $0x70] sm:$0xff] }
 0x1b2   : > { %v5137_v33 = vpop.permute.xlu0 %5136  ;;  %3016 = vmatprep.mubr.f32.mxu1 %v2183_v17  ;;  %v5143_v35 = vunpack.i.l.bf16 %v5142_v59  ;;  %v5144_v10 = vunpack.i.h.bf16 %v5142_v59  ;;  %v6870_v59 = vmov 0.0  }
 0x1b3   : > { %v5139_v25 = vunpack.i.h.bf16 %v5137_v33  ;;  %v5138_v21 = vunpack.i.l.bf16 %v5137_v33  ;;  %v4025_v54 = vpop.f32.mrf.mxu1  ;;  %3017 = vmatmul.mubr.f32.gmra.mxu1 %v2159_v20  ;;  %4327 = vmatprep.subr.mxu1 %v6870_v59  ;;  %v3208_v20 = vld [vmem:[%s6864_s4 + $0x78] sm:$0xff]  ;;  %v3205_v33 = vld [vmem:[%s6864_s4 + $0x60] sm:$0xff] }
 0x1b4   : > { %4319 = vmatmul.mubr.msk.f32.gmra.mxu0 %vm1128_vm0, %v6328_v19  ;;  %v3842_v19 = vld [vmem:[%s5403_s22 + $0xb5] sm:$0xff]  ;;  %4328 = vmatpush3.msra.mxu1 %v3208_v20  ;;  %s3924_s22 = sshll.u32 %s5353_s13, 9  ;;  %s5205_s13 = scalar_lea.vmem %s6811_s17, 512 }
 0x1b5   : > { %v4026_v53 = vpop.f32.mrf.mxu1  ;;  %v5152_v61 = vpop.permute.xlu1 %5151  ;;  %v2176_v49 = vsel %vm1137_vm1, %v2168_v52, %v5138_v21  ;;  %4321 = vmatprep.mubr.msk.f32.mxu0 %vm1128_vm0, %v3904_v26  ;;  %v2152_v56 = vsel %vm1137_vm1, %v2144_v44, %v5139_v25  ;;  %4329 = vmatprep.subr.mxu1 %v6870_v59  ;;  %v3203_v26 = vld [vmem:[%s6864_s4 + $0x50] sm:$0xff]  ;;  %v3202_v25 = vld [vmem:[%s6864_s4 + $0x48] sm:$0xff]  ;;  %v3201_v21 = vld [vmem:[%s6864_s4 + $0x40] sm:$0xff]  ;;  %s6817_s26 = scalar_lea.hbm %s6869_s9, %s3924_s22  ;;  %p5206_p6 = scmp.ne.s32.totalorder %s6811_s17, %s5205_s13 }
 0x1b6   : > { %v4027_v0 = vadd.f32 %v4026_v53, %v4025_v54  ;;  %v5147_v3 = vpop.permute.xlu0 %5146  ;;  %v2184_v32 = vsel %vm1146_vm2, %v2176_v49, %v5143_v35  ;;  %v2160_v29 = vsel %vm1146_vm2, %v2152_v56, %v5144_v10  ;;  %v5154_v8 = vunpack.i.h.bf16 %v5152_v61  ;;  %4330 = vmatpush3.msra.mxu1 %v3207_v30  ;;  %v3204_v35 = vld [vmem:[%s6864_s4 + $0x58] sm:$0xff]  ;;  %v3199_v52 = vld [vmem:[%s6864_s4 + $0x30] sm:$0xff]  ;;  %v3198_v53 = vld [vmem:[%s6864_s4 + $0x28] sm:$0xff] }
 0x1b7   : > { %v5149_v24 = vunpack.i.h.bf16 %v5147_v3  ;;  %v5148_v1 = vunpack.i.l.bf16 %v5147_v3  ;;  %3021 = vmatprep.mubr.f32.mxu1 %v2184_v32  ;;  %v5153_v2 = vunpack.i.l.bf16 %v5152_v61  ;;  %4331 = vmatprep.subr.mxu1 %v6870_v59  ;;  %v3200_v10 = vld [vmem:[%s6864_s4 + $0x38] sm:$0xff]  ;;  %v3197_v49 = vld [vmem:[%s6864_s4 + $0x20] sm:$0xff]  ;;  %v3195_v32 = vld [vmem:[%s6864_s4 + $0x10] sm:$0xff]  ;;  %p5207_p9 = pnand %p5206_p6, %p5370_p5 }
 0x1b8   : > { %v6541_v46 = vadd.f32 %v4027_v0, %v6449_v55  ;;  %3022 = vmatmul.mubr.f32.gmra.mxu1 %v2160_v29  ;;  %4322 = vmatmul.mubr.msk.f32.gmra.mxu0 %vm1128_vm0, %v3905_v48  ;;  %v3196_v0 = vld [vmem:[%s6864_s4 + $0x18] sm:$0xff] }
 0x1b9   : > { %v5162_v15 = vpop.permute.xlu1 %5161  ;;  %v2169_v27 = vsel %vm1128_vm0, %v3874_v62, %v5148_v1  ;;  %v2145_v41 = vsel %vm1128_vm0, %v3842_v19, %v5149_v24  ;;  %4324 = vmatprep.mubr.msk.f32.mxu0 %vm1128_vm0, %v3906_v38  ;;  %4332 = vmatpush3.msra.mxu1 %v3206_v37  ;;  %v3194_v19 = vld [vmem:[%s6864_s4 + $0x8] sm:$0xff]  ;;  %v3193_v1 = vld [vmem:[%s6864_s4] sm:$0xff]  ;;  %p5208_p10 = pneg %p5207_p9 }
 0x1ba   : > { %v5157_v58 = vpop.permute.xlu0 %5156  ;;  %v5164_v55 = vunpack.i.h.bf16 %v5162_v15  ;;  %v5163_v39 = vunpack.i.l.bf16 %v5162_v15  ;;  %v2177_v47 = vsel %vm1137_vm1, %v2169_v27, %v5153_v2  ;;  %v2153_v13 = vsel %vm1137_vm1, %v2145_v41, %v5154_v8  ;;  %4333 = vmatprep.subr.mxu1 %v6870_v59 }
 0x1bb   : > { %v5159_v60 = vunpack.i.h.bf16 %v5157_v58  ;;  %v5158_v11 = vunpack.i.l.bf16 %v5157_v58  ;;  %4334 = vmatpush3.msra.mxu1 %v3205_v33  ;;  %v6596_v54 = vpop.f32.mrf.mxu0 }
 0x1bc   : > { %4325 = vmatmul.mubr.msk.f32.gmra.mxu0 %vm1128_vm0, %v3907_v28  ;;  %v2170_v43 = vsel %vm1128_vm0, %v3875_v4, %v5163_v39  ;;  %v2146_v16 = vsel %vm1128_vm0, %v3843_v57, %v5164_v55  ;;  %4335 = vmatprep.subr.mxu1 %v6870_v59 }
 0x1bd   : > { %v2185_v22 = vsel %vm1146_vm2, %v2177_v47, %v5158_v11  ;;  %v5172_v9 = vpop.permute.xlu1 %5171  ;;  %v2161_v45 = vsel %vm1146_vm2, %v2153_v13, %v5159_v60  ;;  %4336 = vmatpush3.msra.mxu1 %v3204_v35  ;;  %v6608_v61 = vpop.f32.mrf.mxu0 }
 0x1be   : > { %v5167_v42 = vpop.permute.xlu0 %5166  ;;  %3026 = vmatprep.mubr.f32.mxu1 %v2185_v22  ;;  %v5174_v34 = vunpack.i.h.bf16 %v5172_v9  ;;  %v5173_v50 = vunpack.i.l.bf16 %v5172_v9  ;;  %4337 = vmatprep.subr.mxu1 %v6870_v59 }
 0x1bf   : > { %v5169_v63 = vunpack.i.h.bf16 %v5167_v42  ;;  %v5168_v31 = vunpack.i.l.bf16 %v5167_v42  ;;  %3027 = vmatmul.mubr.f32.gmra.mxu1 %v2161_v45  ;;  %v6602_v44 = vpop.f32.mrf.mxu1 }
 0x1c0   : > { %4338 = vmatpush3.msra.mxu1 %v3203_v26 }
 0x1c1   : > { %v2178_v51 = vsel %vm1137_vm1, %v2170_v43, %v5168_v31  ;;  %v2154_v36 = vsel %vm1137_vm1, %v2146_v16, %v5169_v63  ;;  %4339 = vmatprep.subr.mxu1 %v6870_v59  ;;  %v6614_v56 = vpop.f32.mrf.mxu1 }
 0x1c2   : > { %v2186_v6 = vsel %vm1146_vm2, %v2178_v51, %v5173_v50  ;;  %v2162_v17 = vsel %vm1146_vm2, %v2154_v36, %v5174_v34  ;;  %4340 = vmatpush3.msra.mxu1 %v3202_v25 }
 0x1c3   : > { %3031 = vmatprep.mubr.f32.mxu1 %v2186_v6  ;;  %4341 = vmatprep.subr.mxu1 %v6870_v59 }
 0x1c4   : > { %3032 = vmatmul.mubr.f32.gmra.mxu1 %v2162_v17 }
 0x1c5   : > { %4342 = vmatpush3.msra.mxu1 %v3201_v21  ;;  %4359 = vmatprep.mubr.msk.f32.mxu1 %vm5278_vm3, %v6870_v59 }
 0x1c6   : > { %4343 = vmatprep.subr.mxu1 %v6870_v59 }
 0x1c7   : > { %4344 = vmatpush3.msra.mxu1 %v3200_v10  ;;  %v6616_v48 = vpop.f32.mrf.mxu0 }
 0x1c8   : > { %4345 = vmatprep.subr.mxu1 %v6870_v59 }
 0x1c9   : > { %4346 = vmatpush3.msra.mxu1 %v3199_v52  ;;  %v4073_v62 = vpop.f32.mrf.mxu0 }
 0x1ca   : > { %4347 = vmatprep.subr.mxu1 %v6870_v59 }
 0x1cb   : > { %4348 = vmatpush3.msra.mxu1 %v3198_v53  ;;  %v6622_v3 = vpop.f32.mrf.mxu1 }
 0x1cc   : > { %4349 = vmatprep.subr.mxu1 %v6870_v59  ;;  %6877 = vst [vmem:[#allocation10_spill] sm:$0xff] %v6622_v3 }
 0x1cd   : > { %4350 = vmatpush3.msra.mxu1 %v3197_v49  ;;  %v6632_v38 = vpop.f32.mrf.mxu1 }
 0x1ce   : > { %4351 = vmatprep.subr.mxu1 %v6870_v59  ;;  %6878 = vst [vmem:[#allocation11_spill] sm:$0xff] %v6632_v38 }
 0x1cf   : > { %4352 = vmatpush3.msra.mxu1 %v3196_v0 }
 0x1d0   : > { %4353 = vmatprep.subr.mxu1 %v6870_v59 }
 0x1d1   : > { %4354 = vmatpush3.msra.mxu1 %v3195_v32 }
 0x1d2   : > { %4355 = vmatprep.subr.mxu1 %v6870_v59 }
 0x1d3   : > { %v6634_v24 = vpop.f32.mrf.mxu0  ;;  %4356 = vmatpush3.msra.mxu1 %v3194_v19 }
 0x1d4   : > { %4357 = vmatprep.subr.mxu1 %v6870_v59 }
 0x1d5   : > { %4358 = vmatpush3.msra.mxu1 %v3193_v1  ;;  %v4076_v8 = vpop.f32.mrf.mxu0 }
 0x1d6   : > { %4362 = vmatprep.subr.mxu1 %v6870_v59  ;;  %v4074_v59 = vadd.f32 %v4073_v62, %v6616_v48  ;;  %v4077_v14 = vadd.f32 %v4076_v8, %v6634_v24 }
 0x1d7   : > { %v6642_v29 = vpop.f32.mrf.mxu1 }
 0x1d8   : > { %6879 = vst [vmem:[#allocation12_spill] sm:$0xff] %v6642_v29  ;;  %v2689_v29 = vadd.f32 %v4074_v59, %v6466_v7  ;;  %v2694_v24 = vadd.f32 %v4077_v14, %v6486_v23  ;;  %v6703_v23 = vld [vmem:[%s6862_s2] ss:$0 sm:$0xff] }
 0x1d9   : > { %v6646_v2 = vpop.f32.mrf.mxu1 }
 0x1da   : > { %6880 = vst [vmem:[#allocation13_spill] sm:$0xff] %v6646_v2 }
 0x1dc   : > { %v4078_v15 = vpop.f32.mrf.mxu0 }
 0x1de   : > { %v4079_v41 = vpop.f32.mrf.mxu0 }
 0x1e2   : > { %v4125_v27 = vpop.f32.mrf.mxu1 }
 0x1e4   : > { %v4126_v28 = vpop.f32.mrf.mxu1 }
 0x1e8   : > { %v6648_v58 = vpop.f32.mrf.mxu0 }
 0x1ea   : > { %v6650_v11 = vpop.f32.mrf.mxu0 }
 0x1eb   : > { %v4083_v8 = vadd.f32 %v6650_v11, %v6648_v58 }
 0x1ee   : > { %v4128_v60 = vpop.f32.mrf.mxu1 }
 0x1f0   : > { %v4129_v55 = vpop.f32.mrf.mxu1 }
 0x1f4   : > { %v6652_v39 = vpop.f32.mrf.mxu0 }
 0x1f6   : > { %v6654_v13 = vpop.f32.mrf.mxu0 }
 0x1fa   : > { %v4131_v47 = vpop.f32.mrf.mxu1 }
 0x1fc   : > { %v4132_v22 = vpop.f32.mrf.mxu1 }
 0x200   : > { %v6656_v9 = vpop.f32.mrf.mxu0 }
 0x201   : > { %6881 = vst [vmem:[#allocation14_spill] sm:$0xff] %v6656_v9 }
 0x202   : > { %v6658_v4 = vpop.f32.mrf.mxu0 }
 0x203   : > { %6882 = vst [vmem:[#allocation15_spill] sm:$0xff] %v6658_v4 }
 0x206   : > { %v4134_v45 = vpop.f32.mrf.mxu1 }
 0x208   : > { %v4135_v57 = vpop.f32.mrf.mxu1 }
 0x209   : > { %v4136_v4 = vadd.f32 %v4135_v57, %v4134_v45 }
 0x20c   : > { %v6660_v42 = vpop.f32.mrf.mxu0 }
 0x20d   : > { %6883 = vst [vmem:[#allocation16_spill] sm:$0xff] %v6660_v42  ;;  %v4080_v42 = vadd.f32 %v4079_v41, %v4078_v15 }
 0x20e   : > { %v6662_v50 = vpop.f32.mrf.mxu0 }
 0x20f   : > { %6884 = vst [vmem:[#allocation17_spill] sm:$0xff] %v6662_v50  ;;  %v4130_v50 = vadd.f32 %v4129_v55, %v4128_v60  ;;  %v2699_v3 = vadd.f32 %v4080_v42, %v6509_v18 }
 0x211   : > { %v2794_v62 = vadd.f32 %v4130_v50, %v2689_v29 }
 0x213   : > { %v4137_v34 = vpop.f32.mrf.mxu1 }
 0x215   : > { %v4138_v63 = vpop.f32.mrf.mxu1 }
 0x216   : > { %v4139_v45 = vadd.f32 %v4138_v63, %v4137_v34 }
 0x21b   : > { %v4181_v31 = vpop.f32.mrf.mxu0 }
 0x21d   : > { %v4182_v16 = vpop.f32.mrf.mxu0 }
 0x21e   : > { %v4183_v38 = vadd.f32 %v4182_v16, %v4181_v31 }
 0x21f   : > { %v6664_v43 = vpop.f32.mrf.mxu1 }
 0x221   : > { %v6666_v51 = vpop.f32.mrf.mxu1 }
 0x227   : > { %v4184_v36 = vpop.f32.mrf.mxu0 }
 0x229   : > { %v4185_v17 = vpop.f32.mrf.mxu0 }
 0x22b   : > { %v6668_v6 = vpop.f32.mrf.mxu1 }
 0x22c   : > { %6885 = vst [vmem:[#allocation18_spill] sm:$0xff] %v6668_v6  ;;  %v4186_v6 = vadd.f32 %v4185_v17, %v4184_v36 }
 0x22d   : > { %v6670_v20 = vpop.f32.mrf.mxu1 }
 0x22e   : > { %6886 = vst [vmem:[#allocation19_spill] sm:$0xff] %v6670_v20  ;;  %v4127_v20 = vadd.f32 %v4126_v28, %v4125_v27  ;;  %v2899_v7 = vadd.f32 %v4186_v6, %v2794_v62  ;;  %v2804_v28 = vadd.f32 %v4136_v4, %v2699_v3  ;;  %v6893_v62 = vld [vmem:[#allocation15_spill] sm:$0xff] }
 0x233   : > { %v4187_v30 = vpop.f32.mrf.mxu0 }
 0x235   : > { %v4188_v33 = vpop.f32.mrf.mxu0 }
 0x236   : > { %v4189_v60 = vadd.f32 %v4188_v33, %v4187_v30 }
 0x237   : > { %v6672_v37 = vpop.f32.mrf.mxu1 }
 0x238   : > { %6887 = vst [vmem:[#allocation20_spill] sm:$0xff] %v6672_v37 }
 0x239   : > { %v6674_v35 = vpop.f32.mrf.mxu1 }
 0x23a   : > { %6888 = vst [vmem:[#allocation21_spill] sm:$0xff] %v6674_v35  ;;  %v4071_v35 = vadd.f32 %v6608_v61, %v6596_v54  ;;  %v4133_v54 = vadd.f32 %v4132_v22, %v4131_v47  ;;  %v4030_v47 = vadd.f32 %v6614_v56, %v6602_v44  ;;  %v6711_v44 = vld [vmem:[%s6863_s3] ss:$0 sm:$0xff] }
 0x23c   : > { %v4190_v26 = vpop.f32.mrf.mxu0  ;;  %v2684_v48 = vadd.f32 %v4071_v35, %v6445_v40  ;;  %v2799_v22 = vadd.f32 %v4133_v54, %v2694_v24  ;;  %v2604_v31 = vadd.f32 %v4030_v47, %v6470_v12 }
 0x23e   : > { %v4191_v21 = vpop.f32.mrf.mxu0  ;;  %v2789_v41 = vadd.f32 %v4127_v20, %v2684_v48  ;;  %v2904_v42 = vadd.f32 %v4189_v60, %v2799_v22  ;;  %v6895_v60 = vld [vmem:[#allocation18_spill] sm:$0xff]  ;;  %v6897_v22 = vld [vmem:[#allocation12_spill] sm:$0xff] }
 0x23f   : > { %v4192_v59 = vadd.f32 %v4191_v21, %v4190_v26  ;;  %v6891_v21 = vld [vmem:[#allocation11_spill] sm:$0xff] }
 0x240   : > { %v2894_v29 = vadd.f32 %v4183_v38, %v2789_v41  ;;  %v2704_v38 = vadd.f32 %v4083_v8, %v6541_v46  ;;  %v4142_v46 = vadd.f32 %v6666_v51, %v6664_v43  ;;  %v6890_v51 = vld [vmem:[#allocation10_spill] sm:$0xff] }
 0x241   : > { %v2909_v14 = vadd.f32 %v4192_v59, %v2804_v28  ;;  %v6894_v28 = vld [vmem:[#allocation8_spill] sm:$0xff] }
 0x242   : > { %v4237_v25 = vpop.f32.mrf.mxu1  ;;  %v2809_v16 = vadd.f32 %v4139_v45, %v2704_v38  ;;  %v6898_v45 = vld [vmem:[#allocation13_spill] sm:$0xff] }
 0x244   : > { %v4238_v10 = vpop.f32.mrf.mxu1 }
 0x245   : > { %v4239_v27 = vadd.f32 %v4238_v10, %v4237_v25  ;;  %v4033_v10 = vadd.f32 %v6891_v21, %v6890_v51 }
 0x247   : > { %v2999_v11 = vadd.f32 %v4239_v27, %v2894_v29  ;;  %v2609_v29 = vadd.f32 %v4033_v10, %v6894_v28 }
 0x248   : > { %v4193_v52 = vpop.f32.mrf.mxu0 }
 0x24a   : > { %v4194_v49 = vpop.f32.mrf.mxu0 }
 0x24b   : > { %v4195_v4 = vadd.f32 %v4194_v49, %v4193_v52 }
 0x24e   : > { %v4240_v53 = vpop.f32.mrf.mxu1 }
 0x250   : > { %v4241_v0 = vpop.f32.mrf.mxu1 }
 0x254   : > { %v6676_v32 = vpop.f32.mrf.mxu0 }
 0x256   : > { %v6678_v1 = vpop.f32.mrf.mxu0 }
 0x257   : > { %v4198_v33 = vadd.f32 %v6678_v1, %v6676_v32  ;;  %v6892_v1 = vld [vmem:[#allocation14_spill] sm:$0xff] }
 0x258   : > { %v4089_v54 = vadd.f32 %v6893_v62, %v6892_v1 }
 0x25a   : > { %v4243_v19 = vpop.f32.mrf.mxu1 }
 0x25c   : > { %v4244_v5 = vpop.f32.mrf.mxu1 }
 0x25d   : > { %v4245_v58 = vadd.f32 %v4244_v5, %v4243_v19 }
 0x25f   : > { %v3009_v20 = vadd.f32 %v4245_v58, %v2904_v42 }
 0x260   : > { %v6681_v37 = vpop.f32.mrf.mxu0 }
 0x261   : > { %6889 = vst [vmem:[#allocation22_spill] sm:$0xff] %v6681_v37  ;;  %v4242_v37 = vadd.f32 %v4241_v0, %v4240_v53 }
 0x262   : > { %v6687_v9 = vpop.f32.mrf.mxu0 }
 0x263   : > { %v3004_v18 = vadd.f32 %v4242_v37, %v2899_v7  ;;  %v2914_v37 = vadd.f32 %v4195_v4, %v2809_v16  ;;  %v6900_v4 = vld [vmem:[#allocation16_spill] sm:$0xff] }
 0x266   : > { %v4246_v2 = vpop.f32.mrf.mxu1 }
 0x268   : > { %v4247_v61 = vpop.f32.mrf.mxu1 }
 0x269   : > { %v4248_v55 = vadd.f32 %v4247_v61, %v4246_v2  ;;  %v4086_v2 = vadd.f32 %v6654_v13, %v6652_v39 }
 0x26b   : > { %v3014_v5 = vadd.f32 %v4248_v55, %v2909_v14  ;;  %v2709_v30 = vadd.f32 %v4086_v2, %v2604_v31  ;;  %v6896_v55 = vld [vmem:[#allocation19_spill] sm:$0xff] }
 0x26c   : > { %v6691_v15 = vpop.f32.mrf.mxu0 }
 0x26d   : > { %v2814_v52 = vadd.f32 %v4142_v46, %v2709_v30 }
 0x26e   : > { %v6696_v40 = vpop.f32.mrf.mxu0 }
 0x26f   : > { %v2919_v61 = vadd.f32 %v4198_v33, %v2814_v52 }
 0x270   : > { %v4317_v57 = vpop.f32.mrf.mxu0 }
 0x271   : > { %v3109_v3 = vadd.f32 %v4317_v57, %v3004_v18  ;;  %v4145_v18 = vadd.f32 %v6896_v55, %v6895_v60  ;;  %v4036_v57 = vadd.f32 %v6898_v45, %v6897_v22  ;;  %v6905_v22 = vmov 0.0   ;;  %v3281_v45 = vld [vmem:[%s6866_s6 + $0x8] sm:$0xff] }
 0x272   : > { %v3103_v56 = vpop.f32.mrf.mxu0 }
 0x273   : > { %v3150_v34 = vmul.f32 %v6703_v23, %v3109_v3  ;;  %v3104_v50 = vadd.f32 %v3103_v56, %v2999_v11  ;;  %v4249_v63 = vpop.f32.mrf.mxu1  ;;  %v2714_v3 = vadd.f32 %v4089_v54, %v2609_v29  ;;  %v6899_v11 = vld [vmem:[#allocation22_spill] sm:$0xff]  ;;  %v6901_v56 = vld [vmem:[#allocation17_spill] sm:$0xff] }
 0x274   : > { %v4320_v39 = vpop.f32.mrf.mxu0  ;;  %v4201_v38 = vadd.f32 %v6687_v9, %v6899_v11  ;;  %v4092_v42 = vadd.f32 %v6901_v56, %v6900_v4 }
 0x275   : > { %v3165_v13 = vadd.f32 %v6711_v44, %v3150_v34  ;;  %v3149_v36 = vmul.f32 %v6703_v23, %v3104_v50  ;;  %v3119_v6 = vadd.f32 %v4320_v39, %v3014_v5  ;;  %v4250_v17 = vpop.f32.mrf.mxu1  ;;  %v2819_v16 = vadd.f32 %v4145_v18, %v2714_v3  ;;  %v6902_v39 = vld [vmem:[#allocation9_spill] sm:$0xff] }
 0x276   : > { %v4251_v35 = vadd.f32 %v4250_v17, %v4249_v63  ;;  %v3113_v26 = vpop.f32.mrf.mxu0 }
 0x277   : > { %v3164_v12 = vadd.f32 %v6711_v44, %v3149_v36  ;;  %v3152_v25 = vmul.f32 %v6703_v23, %v3119_v6  ;;  %v3114_v43 = vadd.f32 %v3113_v26, %v3009_v20  ;;  %v6725_v19 = vmax.f32 %v3165_v13, 0.0  ;;  %v6903_v36 = vld [vmem:[#allocation20_spill] sm:$0xff]  ;;  %v6904_v6 = vld [vmem:[#allocation21_spill] sm:$0xff] }
 0x278   : > { %v4252_v53 = vpop.f32.mrf.mxu1  ;;  %v4323_v49 = vpop.f32.mrf.mxu0  ;;  %v3019_v0 = vadd.f32 %v4251_v35, %v2914_v37  ;;  %v2614_v13 = vadd.f32 %v4036_v57, %v6902_v39  ;;  %v4148_v17 = vadd.f32 %v6904_v6, %v6903_v36  ;;  %v2924_v37 = vadd.f32 %v4201_v38, %v2819_v16  ;;  %v3280_v57 = vld [vmem:[%s6866_s6] sm:$0xff] }
 0x279   : > { %v6727_v48 = vmax.f32 %v3164_v12, 0.0  ;;  %v3151_v32 = vmul.f32 %v6703_v23, %v3114_v43  ;;  %v3167_v27 = vadd.f32 %v6711_v44, %v3152_v25  ;;  %v4204_v12 = vadd.f32 %v6696_v40, %v6691_v15 }
 0x27a   : > { %v4253_v41 = vpop.f32.mrf.mxu1  ;;  %v3123_v7 = vpop.f32.mrf.mxu0  ;;  %v2719_v26 = vadd.f32 %v4092_v42, %v2614_v13  ;;  %v3379_v13 = vlaneseq }
 0x27b   : > { %v3180_v59 = vadd.f32 %v6725_v19, %v6727_v48  ;;  %v3166_v24 = vadd.f32 %v6711_v44, %v3151_v32  ;;  %v4254_v8 = vadd.f32 %v4253_v41, %v4252_v53  ;;  %v3124_v47 = vadd.f32 %v3123_v7, %v3019_v0 }
 0x27c   : > { %v3175_v34 = vmax.f32 %v3167_v27, 0.0  ;;  %v4326_v31 = vpop.f32.mrf.mxu0  ;;  %v2824_v52 = vadd.f32 %v4148_v17, %v2719_v26  ;;  %v3380_v36 = vshrl.u32 %v3379_v13, 7 }
 0x27d   : > { %v6741_v14 = vmax.f32 %v3166_v24, 0.0  ;;  %v3024_v58 = vadd.f32 %v4254_v8, %v2919_v61  ;;  %v3153_v2 = vmul.f32 %v6703_v23, %v3124_v47 }
 0x27e   : > { %v3133_v25 = vpop.f32.mrf.mxu0  ;;  %v2929_v32 = vadd.f32 %v4204_v12, %v2824_v52  ;;  %v3381_v6 = vsub.s32 0, %v3380_v36 }
 0x27f   : > { %v3181_v50 = vadd.f32 %v3180_v59, %v6741_v14  ;;  %v3129_v63 = vadd.f32 %v4323_v49, %v3024_v58  ;;  %v4255_v5 = vpop.f32.mrf.mxu1  ;;  %v3168_v46 = vadd.f32 %v6711_v44, %v3153_v2 }
 0x281   : > { %v4256_v9 = vpop.f32.mrf.mxu1  ;;  %v3154_v20 = vmul.f32 %v6703_v23, %v3129_v63  ;;  %v3182_v30 = vadd.f32 %v3181_v50, %v3175_v34  ;;  %v3176_v35 = vmax.f32 %v3168_v46, 0.0 }
 0x282   : > { %v4257_v33 = vadd.f32 %v4256_v9, %v4255_v5 }
 0x283   : > { %v3169_v43 = vadd.f32 %v6711_v44, %v3154_v20  ;;  %v3183_v10 = vadd.f32 %v3182_v30, %v3176_v35  ;;  %v3375_v20 = vld [vmem:[%s6868_s8] sm:$0xff]  ;;  %v3376_v30 = vld [vmem:[%s6868_s8 + $0x8] sm:$0xff] }
 0x284   : > { %v4258_v51 = vpop.f32.mrf.mxu1  ;;  %v3029_v21 = vadd.f32 %v4257_v33, %v2924_v37  ;;  %v3377_v33 = vld [vmem:[%s6868_s8 + $0x10] sm:$0xff] }
 0x285   : > { %v3177_v53 = vmax.f32 %v3169_v43, 0.0 }
 0x286   : > { %v3134_v49 = vadd.f32 %v3133_v25, %v3029_v21  ;;  %v4259_v0 = vpop.f32.mrf.mxu1  ;;  %v3378_v25 = vld [vmem:[%s6868_s8 + $0x18] sm:$0xff] }
 0x287   : > { %v4260_v1 = vadd.f32 %v4259_v0, %v4258_v51  ;;  %v3184_v62 = vadd.f32 %v3183_v10, %v3177_v53 }
 0x288   : > { %v3155_v54 = vmul.f32 %v6703_v23, %v3134_v49 }
 0x289   : > { %v3034_v61 = vadd.f32 %v4260_v1, %v2929_v32 }
 0x28a   : > { %v3170_v41 = vadd.f32 %v6711_v44, %v3155_v54 }
 0x28b   : > { %v3139_v7 = vadd.f32 %v4326_v31, %v3034_v61 }
 0x28c   : > { %v3178_v15 = vmax.f32 %v3170_v41, 0.0 }
 0x28d   : > { %v3156_v40 = vmul.f32 %v6703_v23, %v3139_v7  ;;  %v3283_v23 = vld [vmem:[%s6866_s6 + $0x18] sm:$0xff] }
 0x28e   : > { %v3185_v59 = vadd.f32 %v3184_v62, %v3178_v15 }
 0x28f   : > { %v3171_v27 = vadd.f32 %v6711_v44, %v3156_v40  ;;  %v3282_v44 = vld [vmem:[%s6866_s6 + $0x10] sm:$0xff] }
 0x291   : > { %v3179_v24 = vmax.f32 %v3171_v27, 0.0 }
 0x293   : > { %4373 = vmatprep.subr.mxu0 %v3179_v24  ;;  %v3186_v8 = vadd.f32 %v3185_v59, %v3179_v24 }
 0x294   : > { %4374 = vmatpush3.xpose.msra.mxu0 %v3179_v24 }
 0x295   : > { %4375 = vmatprep.subr.mxu0 %v3178_v15  ;;  %v3187_v28 = vrot.slane %v3186_v8, 4 }
 0x297   : > { %v3188_v29 = vadd.f32 %v3187_v28, %v3186_v8 }
 0x298   : > { %4376 = vmatpush3.xpose.msra.mxu0 %v3178_v15 }
 0x299   : > { %4377 = vmatprep.subr.mxu0 %v3177_v53  ;;  %v3189_v60 = vrot.slane %v3188_v29, 2 }
 0x29b   : > { %v3190_v55 = vadd.f32 %v3189_v60, %v3188_v29 }
 0x29c   : > { %4378 = vmatpush3.xpose.msra.mxu0 %v3177_v53 }
 0x29d   : > { %4379 = vmatprep.subr.mxu0 %v3176_v35  ;;  %v3191_v18 = vrot.slane %v3190_v55, 1 }
 0x29f   : > { %v3192_v47 = vadd.f32 %v3191_v18, %v3190_v55 }
 0x2a0   : > { %4380 = vmatpush3.xpose.msra.mxu0 %v3176_v35 }
 0x2a1   : > { %4360 = vmatmul.mubr.f32.vlgmr.msra.gmra.mxu1 %v3192_v47  ;;  %4381 = vmatprep.subr.mxu0 %v3175_v34 }
 0x2a2   : > { %4363 = vmatpush3.msra.mxu1 %v3283_v23  ;;  %4370 = vmatprep.mubr.msk.f32.mxu1 %vm5278_vm3, %v6905_v22 }
 0x2a3   : > { %4364 = vmatprep.subr.mxu1 %v6905_v22 }
 0x2a4   : > { %4382 = vmatpush3.xpose.msra.mxu0 %v3175_v34  ;;  %4365 = vmatpush3.msra.mxu1 %v3282_v44 }
 0x2a5   : > { %4383 = vmatprep.subr.mxu0 %v6741_v14  ;;  %4366 = vmatprep.subr.mxu1 %v6905_v22 }
 0x2a6   : > { %4367 = vmatpush3.msra.mxu1 %v3281_v45 }
 0x2a7   : > { %4368 = vmatprep.subr.mxu1 %v6905_v22 }
 0x2a8   : > { %4384 = vmatpush3.xpose.msra.mxu0 %v6741_v14  ;;  %4369 = vmatpush3.msra.mxu1 %v3280_v57 }
 0x2a9   : > { %4385 = vmatprep.subr.mxu0 %v6725_v19 }
 0x2ac   : > { %4386 = vmatpush3.xpose.msra.mxu0 %v6725_v19  ;;  %v3209_v19 = vld [vmem:[%s6865_s5] sm:$0x1] }
 0x2ad   : > { %4387 = vmatprep.subr.mxu0 %v6727_v48 }
 0x2b0   : > { %4388 = vmatpush3.xpose.msra.mxu0 %v6727_v48  ;;  %v3284_v48 = vld [vmem:[%s6867_s7] sm:$0x1] }
 0x361   : > { %v3276_v14 = vpop.f32.mrf.mxu1 }
 0x362   : > { %v3277_v58 = vadd.f32 %v3276_v14, %v3209_v19 }
 0x363   : > { %v4361_v3 = vpop.f32.mrf.mxu1 }
 0x364   : > { %4371 = vmatmul.mubr.msk.f32.vlgmr.msra.gmra.mxu1 %vm1128_vm0, %v3277_v58 }
 0x424   : > { %v3354_v11 = vpop.f32.mrf.mxu1 }
 0x425   : > { %v3355_v38 = vadd.f32 %v3354_v11, %v3284_v48 }
 0x426   : > { %v4372_v2 = vpop.f32.mrf.mxu1 }
 0x427   : > { %3358 = vrot.lane.b32.xlu0 %v3355_v38, %s5275_s23 }
 0x499   : > { %v3359_v4 = vpop.permute.xlu0 %3358 }
 0x49a   : > { %v3360_v56 = vmax.f32 %v3355_v38, %v3359_v4 }
 0x49c   : > { %3361 = vrot.lane.b32.xlu1 %v3360_v56, %s5276_s24 }
 0x50e   : > { %v3362_v42 = vpop.permute.xlu1 %3361 }
 0x50f   : > { %v3363_v34 = vmax.f32 %v3360_v56, %v3362_v42 }
 0x511   : > { %v3364_v50 = vsub.f32 %v3355_v38, %v3363_v34 }
 0x513   : > { %v3365_v63 = vmul.f32 1.442695, %v3364_v50 }
 0x515   : > { %5175 = vpow2.f32 %v3365_v63 }
 0x522   : > { %v5176_v5 = vpop.eup %5175 }
 0x523   : > { %3367 = vrot.lane.b32.xlu0 %v5176_v5, %s5275_s23  ;;  %s6820_s23 = scalar_lea.sflag [#allocation4], %s338_s29 }
 0x595   : > { %v3368_v31 = vpop.permute.xlu0 %3367 }
 0x596   : > { %v3369_v16 = vadd.f32 %v5176_v5, %v3368_v31 }
 0x598   : > { %3370 = vrot.lane.b32.xlu1 %v3369_v16, %s5276_s24  ;;  %s5279_s24 = smov [#allocation5]  }
 0x599   : > { %s5209_s27 = sshll.u32 %s5279_s24, 4  ;;  %s5210_s27 = int_to_ptr.vmem [resolvable:$false] %s5209_s27 }
 0x59a   : > { %s5211_s28 = scalar_lea.vmem %s5210_s27, 1024  ;;  %p5212_p11 = scmp.lt.s32.totalorder %s6811_s17, %s5210_s27 }
 0x59b   : > { %p5213_p12 = scmp.lt.s32.totalorder %s5211_s28, %s5205_s13 }
 0x59d   : > { %p5214_p13 = por %p5213_p12, %p5212_p11 }
 0x59f   : > { %p5215_p0 = pnand %p5214_p13, %p5208_p10 }
 0x60a   : > { %v3371_v46 = vpop.permute.xlu1 %3370 }
 0x60b   : > { %v3372_v39 = vadd.f32 %v3371_v46, %v3369_v16 }
 0x60d   : > { %5177 = vrcp.f32 %v3372_v39 }
 0x61a   : > { %v5178_v17 = vpop.eup %5177 }
 0x61b   : > { %v3374_v9 = vmul.f32 %v5178_v17, %v5176_v5 }
 0x61d   : > { %v3382_v37 = vrot.slane %v3374_v9, %v3381_v6 }
 0x61f   : > { %v3383_v35 = vmul.f32 %v3382_v37, %v3375_v20  ;;  %v3384_v26 = vmul.f32 %v3382_v37, %v3376_v30  ;;  %v3385_v12 = vmul.f32 %v3382_v37, %v3377_v33  ;;  %v3386_v43 = vmul.f32 %v3382_v37, %v3378_v25 }
 0x621   : > { %4389 = vmatprep.mubr.f32.mxu0 %v3383_v35 }
 0x622   : > { %4390 = vmatmul.mubr.f32.vlgmr.msra.gmra.mxu0 %v3384_v26 }
 0x623   : > { %4392 = vmatprep.mubr.f32.mxu0 %v3385_v12 }
 0x626   : > { %4393 = vmatmul.mubr.f32.gmra.mxu0 %v3386_v43 }
 0x6e2   : > { %v4391_v51 = vpop.f32.mrf.mxu0 }
 0x6e3   : > { %3473 = vst.msk [vmem:[%s340_s16 + $0x8] sm:$0xff] %vm1137_vm1, %v4391_v51 }
 0x6e4   : > { %v3453_v21 = vpop.f32.mrf.mxu0 }
 0x6e5   : > { %3472 = vst.msk [vmem:[%s340_s16] sm:$0xff] %vm1137_vm1, %v3453_v21 }
 0x6e6   : > { %v4394_v10 = vpop.f32.mrf.mxu0 }
 0x6e7   : > { %3475 = vst.msk [vmem:[%s340_s16 + $0x18] sm:$0xff] %vm1137_vm1, %v4394_v10 }
 0x6e8   : > { %v3463_v52 = vpop.f32.mrf.mxu0 }
 0x6e9   : > { %3474 = vst.msk [vmem:[%s340_s16 + $0x10] sm:$0xff] %vm1137_vm1, %v3463_v52 }
 0x6ea   : > { %5218 = shalt.err (!%p5215_p0)
}
 0x6eb   : > { %s5219_s29 = scalar_lea.hbm %s6817_s26, 512  ;;  %s5223_s22 = scalar_lea.hbm %s6869_s9, 1024 }
 0x6ec   : > { %p5220_p1 = scmp.ne.s32.totalorder %s6817_s26, %s5219_s29  ;;  %p5224_p4 = scmp.lt.s32.totalorder %s6817_s26, %s6869_s9 }
 0x6ed   : > { %p5225_p7 = scmp.lt.s32.totalorder %s5223_s22, %s5219_s29 }
 0x6ee   : > { %p5221_p2 = pnand %p5220_p1, %p5370_p5 }
 0x6ef   : > { %p5226_p8 = por %p5225_p7, %p5224_p4 }
 0x6f0   : > { %p5222_p3 = pneg %p5221_p2 }
 0x6f2   : > { %p5227_p6 = pnand %p5226_p8, %p5222_p3 }
 0x6f4   : > { %5230 = shalt.err (!%p5227_p6)
}
 0x6f5   : > { %s5280_s13 = smov 128   ;;  %s5281_s24 = smov 8  }
 0x6f6   : > { %4400 = dma.vmem_to_hbm [thread:$0]  (%p5370_p5), %s6811_s17, 512, %s6817_s26, %s6820_s23, %s5280_s13, %s5280_s13, %s5281_s24  }
 0x6f7 PF: > { %p4412_p9 = scmp.ge.s32.totalorder %s5269_s12, 2  ;;  %s3505_s27 = sand.u32 1, %s5257_s30  }
 0x6f8   : > { %p6906_p10 = scmp.ne.s32.totalorder %s6873_s20, 0  ;;  %s3506_s28 = scalar_lea.sflag [#allocation4], %s3505_s27 }
 0x6fa   : > { %p4407_p11 = pnand %p4412_p9, %p6906_p10 }
 0x6fc   : > { %p4408_p12 = pneg %p4407_p11 }
 0x6fe   : > { %5252 = dma.done.wait (%p4408_p12), %s3506_s28, 512  }
 0x6ff   : > { %5254 = vsyncadd (%p4408_p12), %s3506_s28, 4294966784  ;;  %p20_p13 = scmp.ge.s32.totalorder %s5357_s15, 4   ;;  %s6907_s30 = smov %s5261_s10 }
 0x700   : > { %s6908_s10 = smov %s5265_s11  ;;  %s6909_s11 = smov %s5368_s18 }
 0x701   : > { %s6910_s12 = smov %s5357_s15  ;;  %22 = sbr.rel (!%p20_p13) target bundleno = 4 (0x4), region = 102 }
 0x706   :  { %3511 = vsyncpa [#allocation3], 1 }
 0x707   :  { %3513 = vsyncpa [#allocation3 + $0x1], 1 }
 0x708   :  { %3514 = vsyncpa [#allocation4], 1 }
 0x709   :  { %3516 = vsyncpa [#allocation4 + $0x1], 1 }

</bundles_post_ra>
